<compile_context>
chip_gen: v5e
topology: v5e:2x2
jax: 0.10.0
libtpu: 0.0.40
codegen_flags: <defaults>
</compile_context>

<pallas_src>
import jax
import jax.numpy as jnp
from jax.experimental import pallas as pl
from jax.experimental.pallas import tpu as pltpu


def _upsample_conv_kernel(x_ref, w_ref, b_ref, o_ref, acc_ref):
    """One (batch, row-tile) step of the fused 2x-upsample + 3x3 conv.

    x_ref  : (1, 1, TI+2, W+2, C)  original-resolution tile, 1-px zero halo
    w_ref  : (16, C, C)            phase-combined weights, idx = ((a*2+b)*2+p)*2+q
    b_ref  : (1, C)                conv bias
    o_ref  : (1, 4, TI, W, C)      phase-separated output, phase = 2*a + b
                                   o[0, 2a+b, m, j] == out_upsampled[2m+a, 2j+b]
    acc_ref: (TI*W, C) f32         VMEM accumulator scratch
    """
    ti = o_ref.shape[2]
    wd = o_ref.shape[3]
    ch = o_ref.shape[4]

    xt = x_ref[0, 0]                                    # (TI+2, W+2, C)

    # Hoist the 9 distinct shifted taps of the (un-upsampled) tile; each tap is
    # reused by up to 4 output phases.  Row shifts slice the cheap outer dim;
    # column shifts are small slices of the original-resolution tile (4x
    # smaller than the upsampled tile of the previous version).
    # TODO(synk): fold the column shift into a pltpu.roll to keep it on the XLU.
    taps = {}
    for s in range(3):
        for u in range(3):
            taps[(s, u)] = xt[s:s + ti, u:u + wd, :].reshape(ti * wd, ch)

    bias = b_ref[...].astype(jnp.float32)               # (1, C)

    for a in range(2):
        for b in range(2):
            for p in range(2):
                for q in range(2):
                    widx = ((a * 2 + b) * 2 + p) * 2 + q
                    contrib = jnp.dot(taps[(a + p, b + q)], w_ref[widx],
                                      preferred_element_type=jnp.float32)
                    if p == 0 and q == 0:
                        acc_ref[...] = contrib
                    else:
                        acc_ref[...] += contrib
            o_ref[0, 2 * a + b] = (
                (acc_ref[...] + bias).reshape(ti, wd, ch).astype(o_ref.dtype))


def _largest_divisor_at_most(n, cap):
    cap = max(1, min(cap, n))
    for d in range(cap, 0, -1):
        if n % d == 0:
            return d
    return 1


def _row_tile_cap(H, W, C, in_elt, out_elt, budget_bytes):
    """Largest input-row tile whose double-buffered working set fits the budget."""
    cap = 1
    for ti in range(1, H + 1):
        need = (2 * (ti + 2) * (W + 2) * C * in_elt       # input tile, double buffered
                + 2 * 4 * ti * W * C * out_elt            # output tile, double buffered
                + 2 * 16 * C * C * in_elt                 # phase-combined weights
                + ti * W * C * 4                          # f32 accumulator scratch
                + (2 << 20))                              # headroom
        if need <= budget_bytes:
            cap = ti
    return cap


def upsample_forward(x_nchw, weight_oihw, bias, *, tile_rows=None, use_bf16=False,
                     vmem_budget_bytes=32 * 1024 * 1024):
    """UpSample.forward: nearest 2x upsample + Conv2d(C, C, 3, padding=1).

    x_nchw     : (B, C, H, W)   float32 (PyTorch layout)
    weight_oihw: (C, C, 3, 3)   float32 (PyTorch Conv2d layout)
    bias       : (C,)           float32
    tile_rows  : max input-resolution rows per grid step (auto from VMEM budget
                 if None; the budget is conservative so it also fits v7x 64 MiB)
    use_bf16   : cast activations/weights to bf16 for the MXU (f32 accumulation)
    returns    : (B, C, 2H, 2W) in x's dtype
    """
    B, C, H, W = x_nchw.shape
    compute_dtype = jnp.bfloat16 if use_bf16 else x_nchw.dtype
    in_elt = jnp.dtype(compute_dtype).itemsize
    out_elt = jnp.dtype(x_nchw.dtype).itemsize

    # --- choose the input-row tile (output tile = 2*TI rows) -----------------
    cap = _row_tile_cap(H, W, C, in_elt, out_elt, vmem_budget_bytes)
    if tile_rows is not None:
        cap = min(cap, tile_rows)
    ti = _largest_divisor_at_most(H, cap)
    nt = H // ti

    # --- layout + halo construction (original resolution only) ---------------
    # NCHW -> NHWC (channels on the lane axis), then a single 1-px zero pad of
    # the ORIGINAL image: it provides both the conv 'same' border of the
    # upsampled image and the row-tile halo source.
    # TODO(synk): for tiny C (like the C=4 test) the lane axis is mostly idle;
    # a lane-dense (W,C)->lane repacking / VPU conv would be needed for perf.
    x_nhwc = jnp.transpose(x_nchw, (0, 2, 3, 1))
    x_pad = jnp.pad(x_nhwc, ((0, 0), (1, 1), (1, 1), (0, 0)))        # (B, H+2, W+2, C)

    # Overlapping (halo) windows cannot be expressed with plain blocked
    # index_maps, so duplicate the 2 halo rows per tile here.  This works on the
    # un-upsampled tensor, i.e. ~(TI+2)/TI of 1/4 of the previous HBM traffic.
    x_tiles = jnp.stack(
        [x_pad[:, t * ti:t * ti + ti + 2] for t in range(nt)], axis=1
    ).astype(compute_dtype)                                          # (B, nt, TI+2, W+2, C)

    # --- fold the 3x3 weights into per-phase 2x2 effective weights -----------
    # Output pixel (2i+a, 2j+b) of conv3x3(upsample2x(x)) only touches input
    # rows {i-1+a, i+a} and cols {j-1+b, j+b}; the 3x3 taps collapse onto those
    # with summed weights (exact).
    w_hwio = jnp.transpose(weight_oihw, (2, 3, 1, 0)).astype(jnp.float32)   # (3,3,C,C)
    sel = jnp.array([[[1., 0., 0.], [0., 1., 1.]],
                     [[1., 1., 0.], [0., 0., 1.]]], jnp.float32)            # [phase][tap][k]
    w_eff = jnp.einsum('apk,bql,klio->abpqio', sel, sel, w_hwio)            # (2,2,2,2,C,C)
    w_eff = w_eff.reshape(16, C, C).astype(compute_dtype)
    b_2d = bias.reshape(1, C).astype(jnp.float32)

    # --- VMEM limit derived from the chosen tile ------------------------------
    need = (2 * (ti + 2) * (W + 2) * C * in_elt + 2 * 4 * ti * W * C * out_elt
            + 2 * 16 * C * C * in_elt + ti * W * C * 4)
    vmem_limit = int(min(max(2 * need + (8 << 20), 16 << 20), 64 << 20))

    out_phases = pl.pallas_call(
        _upsample_conv_kernel,
        out_shape=jax.ShapeDtypeStruct((B, 4, H, W, C), x_nchw.dtype),
        grid_spec=pltpu.PrefetchScalarGridSpec(
            num_scalar_prefetch=0,
            grid=(B, nt),
            in_specs=[
                pl.BlockSpec((1, 1, ti + 2, W + 2, C),
                             lambda bn, t: (bn, t, 0, 0, 0)),
                pl.BlockSpec((16, C, C), lambda bn, t: (0, 0, 0)),
                pl.BlockSpec((1, C), lambda bn, t: (0, 0)),
            ],
            out_specs=pl.BlockSpec((1, 4, ti, W, C),
                                   lambda bn, t: (bn, 0, t, 0, 0)),
            scratch_shapes=[pltpu.VMEM((ti * W, C), jnp.float32)],
        ),
        compiler_params=pltpu.CompilerParams(
            dimension_semantics=("parallel", "parallel"),
            vmem_limit_bytes=vmem_limit,
        ),
    )(x_tiles, w_eff, b_2d)

    # --- de-interleave the 4 phases, fused with the NHWC->NCHW transpose -----
    # out_phases[n, 2a+b, i, j, c] == out_upsampled_nhwc[n, 2i+a, 2j+b, c]
    out_6d = out_phases.reshape(B, 2, 2, H, W, C)
    out_nchw = jnp.transpose(out_6d, (0, 5, 3, 1, 4, 2)).reshape(B, C, 2 * H, 2 * W)
    # TODO(synk): if the surrounding model consumed NHWC, the boundary transpose
    # (and this de-interleave) could be dropped entirely.
    return out_nchw


if __name__ == "__main__":
    key = jax.random.PRNGKey(0)
    k_x, k_w, k_b = jax.random.split(key, 3)

    B, C, H, W = 2, 4, 16, 16
    x = jax.random.normal(k_x, (B, C, H, W), dtype=jnp.float32)

    # Deterministic synthetic Conv2d(C, C, 3) parameters (PyTorch-style fan-in
    # uniform bound), not loaded from any checkpoint.
    fan_in = C * 3 * 3
    bound = 1.0 / (fan_in ** 0.5)
    weight = jax.random.uniform(k_w, (C, C, 3, 3), jnp.float32, -bound, bound)
    bias = jax.random.uniform(k_b, (C,), jnp.float32, -bound, bound)

    # f32 path, forced multi-tile (tile_rows=8 -> 2 row tiles) to exercise halos.
    out = jax.block_until_ready(upsample_forward(x, weight, bias, tile_rows=8))
    assert out.shape == (B, C, 2 * H, 2 * W), out.shape

    # Reference: nearest 2x upsample + SAME 3x3 conv via XLA.
    x_up = jnp.repeat(jnp.repeat(x, 2, axis=2), 2, axis=3)
    ref = jax.lax.conv_general_dilated(
        x_up, weight, window_strides=(1, 1), padding="SAME",
        dimension_numbers=("NCHW", "OIHW", "NCHW"),
    ) + bias[None, :, None, None]
    err = float(jnp.max(jnp.abs(out - ref)))
    assert jnp.allclose(out, ref, atol=1e-4, rtol=1e-4), err

    # bf16 MXU path (f32 accumulation) — looser tolerance.
    out_bf16 = jax.block_until_ready(
        upsample_forward(x, weight, bias, tile_rows=8, use_bf16=True))
    assert jnp.allclose(out_bf16, ref, atol=5e-2, rtol=5e-2), \
        float(jnp.max(jnp.abs(out_bf16 - ref)))

    print("KERNEL_OK")
</pallas_src>

<mosaic_0001>
module attributes {stable_mosaic.version = 11 : i64} {
  func.func @_upsample_conv_kernel(%arg0: i32, %arg1: i32, %arg2: memref<1x1x10x18x4xf32, #tpu.memory_space<vmem>>, %arg3: memref<16x4x4xf32, #tpu.memory_space<vmem>>, %arg4: memref<1x4xf32, #tpu.memory_space<vmem>>, %arg5: memref<1x4x8x16x4xf32, #tpu.memory_space<vmem>>, %arg6: memref<128x4xf32, #tpu.memory_space<vmem>>) attributes {dimension_semantics = [#tpu.dimension_semantics<parallel>, #tpu.dimension_semantics<parallel>], iteration_bounds = array<i64: 2, 2>, scalar_prefetch = 0 : i64, scratch_operands = 1 : i64, tpu.core_type = #tpu.core_type<tc>, window_params = [{transform_indices = @transform_0, window_bounds = array<i64: 1, 1, 10, 18, 4>}, {pipeline_mode = #tpu.pipeline_mode<synchronous>, transform_indices = @transform_1, window_bounds = array<i64: 16, 4, 4>}, {pipeline_mode = #tpu.pipeline_mode<synchronous>, transform_indices = @transform_2, window_bounds = array<i64: 1, 4>}, {transform_indices = @transform_3, window_bounds = array<i64: 1, 4, 8, 16, 4>}]} {
    %c0 = arith.constant 0 : index
    %c0_0 = arith.constant 0 : index
    %c0_1 = arith.constant 0 : index
    %c0_2 = arith.constant 0 : index
    %c0_3 = arith.constant 0 : index
    %0 = vector.load %arg2[%c0, %c0_0, %c0_1, %c0_2, %c0_3] : memref<1x1x10x18x4xf32, #tpu.memory_space<vmem>>, vector<1x1x10x18x4xf32>
    %1 = vector.shape_cast %0 : vector<1x1x10x18x4xf32> to vector<10x18x4xf32>
    %2 = vector.extract_strided_slice %1 {offsets = [0, 0, 0], sizes = [8, 16, 4], strides = [1, 1, 1]} : vector<10x18x4xf32> to vector<8x16x4xf32>
    %3 = vector.shape_cast %2 : vector<8x16x4xf32> to vector<128x4xf32>
    %4 = vector.extract_strided_slice %1 {offsets = [0, 1, 0], sizes = [8, 16, 4], strides = [1, 1, 1]} : vector<10x18x4xf32> to vector<8x16x4xf32>
    %5 = vector.shape_cast %4 : vector<8x16x4xf32> to vector<128x4xf32>
    %6 = vector.extract_strided_slice %1 {offsets = [0, 2, 0], sizes = [8, 16, 4], strides = [1, 1, 1]} : vector<10x18x4xf32> to vector<8x16x4xf32>
    %7 = vector.shape_cast %6 : vector<8x16x4xf32> to vector<128x4xf32>
    %8 = vector.extract_strided_slice %1 {offsets = [1, 0, 0], sizes = [8, 16, 4], strides = [1, 1, 1]} : vector<10x18x4xf32> to vector<8x16x4xf32>
    %9 = vector.shape_cast %8 : vector<8x16x4xf32> to vector<128x4xf32>
    %10 = vector.extract_strided_slice %1 {offsets = [1, 1, 0], sizes = [8, 16, 4], strides = [1, 1, 1]} : vector<10x18x4xf32> to vector<8x16x4xf32>
    %11 = vector.shape_cast %10 : vector<8x16x4xf32> to vector<128x4xf32>
    %12 = vector.extract_strided_slice %1 {offsets = [1, 2, 0], sizes = [8, 16, 4], strides = [1, 1, 1]} : vector<10x18x4xf32> to vector<8x16x4xf32>
    %13 = vector.shape_cast %12 : vector<8x16x4xf32> to vector<128x4xf32>
    %14 = vector.extract_strided_slice %1 {offsets = [2, 0, 0], sizes = [8, 16, 4], strides = [1, 1, 1]} : vector<10x18x4xf32> to vector<8x16x4xf32>
    %15 = vector.shape_cast %14 : vector<8x16x4xf32> to vector<128x4xf32>
    %16 = vector.extract_strided_slice %1 {offsets = [2, 1, 0], sizes = [8, 16, 4], strides = [1, 1, 1]} : vector<10x18x4xf32> to vector<8x16x4xf32>
    %17 = vector.shape_cast %16 : vector<8x16x4xf32> to vector<128x4xf32>
    %18 = vector.extract_strided_slice %1 {offsets = [2, 2, 0], sizes = [8, 16, 4], strides = [1, 1, 1]} : vector<10x18x4xf32> to vector<8x16x4xf32>
    %19 = vector.shape_cast %18 : vector<8x16x4xf32> to vector<128x4xf32>
    %c0_4 = arith.constant 0 : index
    %c0_5 = arith.constant 0 : index
    %20 = vector.load %arg4[%c0_4, %c0_5] : memref<1x4xf32, #tpu.memory_space<vmem>>, vector<1x4xf32>
    %c0_6 = arith.constant 0 : index
    %c0_7 = arith.constant 0 : index
    %c0_8 = arith.constant 0 : index
    %21 = vector.load %arg3[%c0_6, %c0_7, %c0_8] : memref<16x4x4xf32, #tpu.memory_space<vmem>>, vector<1x4x4xf32>
    %22 = vector.shape_cast %21 : vector<1x4x4xf32> to vector<4x4xf32>
    %cst = arith.constant dense<0.000000e+00> : vector<128x4xf32>
    %23 = tpu.matmul %3, %22, %cst {dimension_numbers = #tpu.dot_dimension_numbers<[1], [0], [0], [1], [0, 0, 1, 1], [], []>} : vector<128x4xf32>, vector<4x4xf32>, vector<128x4xf32> -> vector<128x4xf32>
    %c0_9 = arith.constant 0 : index
    %c0_10 = arith.constant 0 : index
    %24 = vector.load %arg6[%c0_9, %c0_10] : memref<128x4xf32, #tpu.memory_space<vmem>>, vector<128x4xf32>
    tpu.vector_store %arg6[%c0_9, %c0_10], %23 {strides = array<i32>} : memref<128x4xf32, #tpu.memory_space<vmem>>, vector<128x4xf32>,
    %c1 = arith.constant 1 : index
    %c0_11 = arith.constant 0 : index
    %c0_12 = arith.constant 0 : index
    %25 = vector.load %arg3[%c1, %c0_11, %c0_12] : memref<16x4x4xf32, #tpu.memory_space<vmem>>, vector<1x4x4xf32>
    %26 = vector.shape_cast %25 : vector<1x4x4xf32> to vector<4x4xf32>
    %cst_13 = arith.constant dense<0.000000e+00> : vector<128x4xf32>
    %27 = tpu.matmul %5, %26, %cst_13 {dimension_numbers = #tpu.dot_dimension_numbers<[1], [0], [0], [1], [0, 0, 1, 1], [], []>} : vector<128x4xf32>, vector<4x4xf32>, vector<128x4xf32> -> vector<128x4xf32>
    %c0_14 = arith.constant 0 : index
    %c0_15 = arith.constant 0 : index
    %28 = vector.load %arg6[%c0_14, %c0_15] : memref<128x4xf32, #tpu.memory_space<vmem>>, vector<128x4xf32>
    %29 = arith.addf %28, %27 : vector<128x4xf32>
    %c0_16 = arith.constant 0 : index
    %c0_17 = arith.constant 0 : index
    %30 = vector.load %arg6[%c0_16, %c0_17] : memref<128x4xf32, #tpu.memory_space<vmem>>, vector<128x4xf32>
    tpu.vector_store %arg6[%c0_16, %c0_17], %29 {strides = array<i32>} : memref<128x4xf32, #tpu.memory_space<vmem>>, vector<128x4xf32>,
    %c2 = arith.constant 2 : index
    %c0_18 = arith.constant 0 : index
    %c0_19 = arith.constant 0 : index
    %31 = vector.load %arg3[%c2, %c0_18, %c0_19] : memref<16x4x4xf32, #tpu.memory_space<vmem>>, vector<1x4x4xf32>
    %32 = vector.shape_cast %31 : vector<1x4x4xf32> to vector<4x4xf32>
    %cst_20 = arith.constant dense<0.000000e+00> : vector<128x4xf32>
    %33 = tpu.matmul %9, %32, %cst_20 {dimension_numbers = #tpu.dot_dimension_numbers<[1], [0], [0], [1], [0, 0, 1, 1], [], []>} : vector<128x4xf32>, vector<4x4xf32>, vector<128x4xf32> -> vector<128x4xf32>
    %c0_21 = arith.constant 0 : index
    %c0_22 = arith.constant 0 : index
    %34 = vector.load %arg6[%c0_21, %c0_22] : memref<128x4xf32, #tpu.memory_space<vmem>>, vector<128x4xf32>
    %35 = arith.addf %34, %33 : vector<128x4xf32>
    %c0_23 = arith.constant 0 : index
    %c0_24 = arith.constant 0 : index
    %36 = vector.load %arg6[%c0_23, %c0_24] : memref<128x4xf32, #tpu.memory_space<vmem>>, vector<128x4xf32>
    tpu.vector_store %arg6[%c0_23, %c0_24], %35 {strides = array<i32>} : memref<128x4xf32, #tpu.memory_space<vmem>>, vector<128x4xf32>,
    %c3 = arith.constant 3 : index
    %c0_25 = arith.constant 0 : index
    %c0_26 = arith.constant 0 : index
    %37 = vector.load %arg3[%c3, %c0_25, %c0_26] : memref<16x4x4xf32, #tpu.memory_space<vmem>>, vector<1x4x4xf32>
    %38 = vector.shape_cast %37 : vector<1x4x4xf32> to vector<4x4xf32>
    %cst_27 = arith.constant dense<0.000000e+00> : vector<128x4xf32>
    %39 = tpu.matmul %11, %38, %cst_27 {dimension_numbers = #tpu.dot_dimension_numbers<[1], [0], [0], [1], [0, 0, 1, 1], [], []>} : vector<128x4xf32>, vector<4x4xf32>, vector<128x4xf32> -> vector<128x4xf32>
    %c0_28 = arith.constant 0 : index
    %c0_29 = arith.constant 0 : index
    %40 = vector.load %arg6[%c0_28, %c0_29] : memref<128x4xf32, #tpu.memory_space<vmem>>, vector<128x4xf32>
    %41 = arith.addf %40, %39 : vector<128x4xf32>
    %c0_30 = arith.constant 0 : index
    %c0_31 = arith.constant 0 : index
    %42 = vector.load %arg6[%c0_30, %c0_31] : memref<128x4xf32, #tpu.memory_space<vmem>>, vector<128x4xf32>
    tpu.vector_store %arg6[%c0_30, %c0_31], %41 {strides = array<i32>} : memref<128x4xf32, #tpu.memory_space<vmem>>, vector<128x4xf32>,
    %c0_32 = arith.constant 0 : index
    %c0_33 = arith.constant 0 : index
    %43 = vector.load %arg6[%c0_32, %c0_33] : memref<128x4xf32, #tpu.memory_space<vmem>>, vector<128x4xf32>
    %44 = vector.broadcast %20 : vector<1x4xf32> to vector<128x4xf32>
    %45 = arith.addf %43, %44 : vector<128x4xf32>
    %46 = vector.shape_cast %45 : vector<128x4xf32> to vector<8x16x4xf32>
    %c0_34 = arith.constant 0 : index
    %c0_35 = arith.constant 0 : index
    %c0_36 = arith.constant 0 : index
    %c0_37 = arith.constant 0 : index
    %c0_38 = arith.constant 0 : index
    %47 = vector.load %arg5[%c0_34, %c0_35, %c0_36, %c0_37, %c0_38] : memref<1x4x8x16x4xf32, #tpu.memory_space<vmem>>, vector<1x1x8x16x4xf32>
    %48 = vector.shape_cast %47 : vector<1x1x8x16x4xf32> to vector<8x16x4xf32>
    %49 = vector.shape_cast %46 : vector<8x16x4xf32> to vector<1x1x8x16x4xf32>
    tpu.vector_store %arg5[%c0_34, %c0_35, %c0_36, %c0_37, %c0_38], %49 {strides = array<i32>} : memref<1x4x8x16x4xf32, #tpu.memory_space<vmem>>, vector<1x1x8x16x4xf32>,
    %c4 = arith.constant 4 : index
    %c0_39 = arith.constant 0 : index
    %c0_40 = arith.constant 0 : index
    %50 = vector.load %arg3[%c4, %c0_39, %c0_40] : memref<16x4x4xf32, #tpu.memory_space<vmem>>, vector<1x4x4xf32>
    %51 = vector.shape_cast %50 : vector<1x4x4xf32> to vector<4x4xf32>
    %cst_41 = arith.constant dense<0.000000e+00> : vector<128x4xf32>
    %52 = tpu.matmul %5, %51, %cst_41 {dimension_numbers = #tpu.dot_dimension_numbers<[1], [0], [0], [1], [0, 0, 1, 1], [], []>} : vector<128x4xf32>, vector<4x4xf32>, vector<128x4xf32> -> vector<128x4xf32>
    %c0_42 = arith.constant 0 : index
    %c0_43 = arith.constant 0 : index
    %53 = vector.load %arg6[%c0_42, %c0_43] : memref<128x4xf32, #tpu.memory_space<vmem>>, vector<128x4xf32>
    tpu.vector_store %arg6[%c0_42, %c0_43], %52 {strides = array<i32>} : memref<128x4xf32, #tpu.memory_space<vmem>>, vector<128x4xf32>,
    %c5 = arith.constant 5 : index
    %c0_44 = arith.constant 0 : index
    %c0_45 = arith.constant 0 : index
    %54 = vector.load %arg3[%c5, %c0_44, %c0_45] : memref<16x4x4xf32, #tpu.memory_space<vmem>>, vector<1x4x4xf32>
    %55 = vector.shape_cast %54 : vector<1x4x4xf32> to vector<4x4xf32>
    %cst_46 = arith.constant dense<0.000000e+00> : vector<128x4xf32>
    %56 = tpu.matmul %7, %55, %cst_46 {dimension_numbers = #tpu.dot_dimension_numbers<[1], [0], [0], [1], [0, 0, 1, 1], [], []>} : vector<128x4xf32>, vector<4x4xf32>, vector<128x4xf32> -> vector<128x4xf32>
    %c0_47 = arith.constant 0 : index
    %c0_48 = arith.constant 0 : index
    %57 = vector.load %arg6[%c0_47, %c0_48] : memref<128x4xf32, #tpu.memory_space<vmem>>, vector<128x4xf32>
    %58 = arith.addf %57, %56 : vector<128x4xf32>
    %c0_49 = arith.constant 0 : index
    %c0_50 = arith.constant 0 : index
    %59 = vector.load %arg6[%c0_49, %c0_50] : memref<128x4xf32, #tpu.memory_space<vmem>>, vector<128x4xf32>
    tpu.vector_store %arg6[%c0_49, %c0_50], %58 {strides = array<i32>} : memref<128x4xf32, #tpu.memory_space<vmem>>, vector<128x4xf32>,
    %c6 = arith.constant 6 : index
    %c0_51 = arith.constant 0 : index
    %c0_52 = arith.constant 0 : index
    %60 = vector.load %arg3[%c6, %c0_51, %c0_52] : memref<16x4x4xf32, #tpu.memory_space<vmem>>, vector<1x4x4xf32>
    %61 = vector.shape_cast %60 : vector<1x4x4xf32> to vector<4x4xf32>
    %cst_53 = arith.constant dense<0.000000e+00> : vector<128x4xf32>
    %62 = tpu.matmul %11, %61, %cst_53 {dimension_numbers = #tpu.dot_dimension_numbers<[1], [0], [0], [1], [0, 0, 1, 1], [], []>} : vector<128x4xf32>, vector<4x4xf32>, vector<128x4xf32> -> vector<128x4xf32>
    %c0_54 = arith.constant 0 : index
    %c0_55 = arith.constant 0 : index
    %63 = vector.load %arg6[%c0_54, %c0_55] : memref<128x4xf32, #tpu.memory_space<vmem>>, vector<128x4xf32>
    %64 = arith.addf %63, %62 : vector<128x4xf32>
    %c0_56 = arith.constant 0 : index
    %c0_57 = arith.constant 0 : index
    %65 = vector.load %arg6[%c0_56, %c0_57] : memref<128x4xf32, #tpu.memory_space<vmem>>, vector<128x4xf32>
    tpu.vector_store %arg6[%c0_56, %c0_57], %64 {strides = array<i32>} : memref<128x4xf32, #tpu.memory_space<vmem>>, vector<128x4xf32>,
    %c7 = arith.constant 7 : index
    %c0_58 = arith.constant 0 : index
    %c0_59 = arith.constant 0 : index
    %66 = vector.load %arg3[%c7, %c0_58, %c0_59] : memref<16x4x4xf32, #tpu.memory_space<vmem>>, vector<1x4x4xf32>
    %67 = vector.shape_cast %66 : vector<1x4x4xf32> to vector<4x4xf32>
    %cst_60 = arith.constant dense<0.000000e+00> : vector<128x4xf32>
    %68 = tpu.matmul %13, %67, %cst_60 {dimension_numbers = #tpu.dot_dimension_numbers<[1], [0], [0], [1], [0, 0, 1, 1], [], []>} : vector<128x4xf32>, vector<4x4xf32>, vector<128x4xf32> -> vector<128x4xf32>
    %c0_61 = arith.constant 0 : index
    %c0_62 = arith.constant 0 : index
    %69 = vector.load %arg6[%c0_61, %c0_62] : memref<128x4xf32, #tpu.memory_space<vmem>>, vector<128x4xf32>
    %70 = arith.addf %69, %68 : vector<128x4xf32>
    %c0_63 = arith.constant 0 : index
    %c0_64 = arith.constant 0 : index
    %71 = vector.load %arg6[%c0_63, %c0_64] : memref<128x4xf32, #tpu.memory_space<vmem>>, vector<128x4xf32>
    tpu.vector_store %arg6[%c0_63, %c0_64], %70 {strides = array<i32>} : memref<128x4xf32, #tpu.memory_space<vmem>>, vector<128x4xf32>,
    %c0_65 = arith.constant 0 : index
    %c0_66 = arith.constant 0 : index
    %72 = vector.load %arg6[%c0_65, %c0_66] : memref<128x4xf32, #tpu.memory_space<vmem>>, vector<128x4xf32>
    %73 = vector.broadcast %20 : vector<1x4xf32> to vector<128x4xf32>
    %74 = arith.addf %72, %73 : vector<128x4xf32>
    %75 = vector.shape_cast %74 : vector<128x4xf32> to vector<8x16x4xf32>
    %c0_67 = arith.constant 0 : index
    %c1_68 = arith.constant 1 : index
    %c0_69 = arith.constant 0 : index
    %c0_70 = arith.constant 0 : index
    %c0_71 = arith.constant 0 : index
    %76 = vector.load %arg5[%c0_67, %c1_68, %c0_69, %c0_70, %c0_71] : memref<1x4x8x16x4xf32, #tpu.memory_space<vmem>>, vector<1x1x8x16x4xf32>
    %77 = vector.shape_cast %76 : vector<1x1x8x16x4xf32> to vector<8x16x4xf32>
    %78 = vector.shape_cast %75 : vector<8x16x4xf32> to vector<1x1x8x16x4xf32>
    tpu.vector_store %arg5[%c0_67, %c1_68, %c0_69, %c0_70, %c0_71], %78 {strides = array<i32>} : memref<1x4x8x16x4xf32, #tpu.memory_space<vmem>>, vector<1x1x8x16x4xf32>,
    %c8 = arith.constant 8 : index
    %c0_72 = arith.constant 0 : index
    %c0_73 = arith.constant 0 : index
    %79 = vector.load %arg3[%c8, %c0_72, %c0_73] : memref<16x4x4xf32, #tpu.memory_space<vmem>>, vector<1x4x4xf32>
    %80 = vector.shape_cast %79 : vector<1x4x4xf32> to vector<4x4xf32>
    %cst_74 = arith.constant dense<0.000000e+00> : vector<128x4xf32>
    %81 = tpu.matmul %9, %80, %cst_74 {dimension_numbers = #tpu.dot_dimension_numbers<[1], [0], [0], [1], [0, 0, 1, 1], [], []>} : vector<128x4xf32>, vector<4x4xf32>, vector<128x4xf32> -> vector<128x4xf32>
    %c0_75 = arith.constant 0 : index
    %c0_76 = arith.constant 0 : index
    %82 = vector.load %arg6[%c0_75, %c0_76] : memref<128x4xf32, #tpu.memory_space<vmem>>, vector<128x4xf32>
    tpu.vector_store %arg6[%c0_75, %c0_76], %81 {strides = array<i32>} : memref<128x4xf32, #tpu.memory_space<vmem>>, vector<128x4xf32>,
    %c9 = arith.constant 9 : index
    %c0_77 = arith.constant 0 : index
    %c0_78 = arith.constant 0 : index
    %83 = vector.load %arg3[%c9, %c0_77, %c0_78] : memref<16x4x4xf32, #tpu.memory_space<vmem>>, vector<1x4x4xf32>
    %84 = vector.shape_cast %83 : vector<1x4x4xf32> to vector<4x4xf32>
    %cst_79 = arith.constant dense<0.000000e+00> : vector<128x4xf32>
    %85 = tpu.matmul %11, %84, %cst_79 {dimension_numbers = #tpu.dot_dimension_numbers<[1], [0], [0], [1], [0, 0, 1, 1], [], []>} : vector<128x4xf32>, vector<4x4xf32>, vector<128x4xf32> -> vector<128x4xf32>
    %c0_80 = arith.constant 0 : index
    %c0_81 = arith.constant 0 : index
    %86 = vector.load %arg6[%c0_80, %c0_81] : memref<128x4xf32, #tpu.memory_space<vmem>>, vector<128x4xf32>
    %87 = arith.addf %86, %85 : vector<128x4xf32>
    %c0_82 = arith.constant 0 : index
    %c0_83 = arith.constant 0 : index
    %88 = vector.load %arg6[%c0_82, %c0_83] : memref<128x4xf32, #tpu.memory_space<vmem>>, vector<128x4xf32>
    tpu.vector_store %arg6[%c0_82, %c0_83], %87 {strides = array<i32>} : memref<128x4xf32, #tpu.memory_space<vmem>>, vector<128x4xf32>,
    %c10 = arith.constant 10 : index
    %c0_84 = arith.constant 0 : index
    %c0_85 = arith.constant 0 : index
    %89 = vector.load %arg3[%c10, %c0_84, %c0_85] : memref<16x4x4xf32, #tpu.memory_space<vmem>>, vector<1x4x4xf32>
    %90 = vector.shape_cast %89 : vector<1x4x4xf32> to vector<4x4xf32>
    %cst_86 = arith.constant dense<0.000000e+00> : vector<128x4xf32>
    %91 = tpu.matmul %15, %90, %cst_86 {dimension_numbers = #tpu.dot_dimension_numbers<[1], [0], [0], [1], [0, 0, 1, 1], [], []>} : vector<128x4xf32>, vector<4x4xf32>, vector<128x4xf32> -> vector<128x4xf32>
    %c0_87 = arith.constant 0 : index
    %c0_88 = arith.constant 0 : index
    %92 = vector.load %arg6[%c0_87, %c0_88] : memref<128x4xf32, #tpu.memory_space<vmem>>, vector<128x4xf32>
    %93 = arith.addf %92, %91 : vector<128x4xf32>
    %c0_89 = arith.constant 0 : index
    %c0_90 = arith.constant 0 : index
    %94 = vector.load %arg6[%c0_89, %c0_90] : memref<128x4xf32, #tpu.memory_space<vmem>>, vector<128x4xf32>
    tpu.vector_store %arg6[%c0_89, %c0_90], %93 {strides = array<i32>} : memref<128x4xf32, #tpu.memory_space<vmem>>, vector<128x4xf32>,
    %c11 = arith.constant 11 : index
    %c0_91 = arith.constant 0 : index
    %c0_92 = arith.constant 0 : index
    %95 = vector.load %arg3[%c11, %c0_91, %c0_92] : memref<16x4x4xf32, #tpu.memory_space<vmem>>, vector<1x4x4xf32>
    %96 = vector.shape_cast %95 : vector<1x4x4xf32> to vector<4x4xf32>
    %cst_93 = arith.constant dense<0.000000e+00> : vector<128x4xf32>
    %97 = tpu.matmul %17, %96, %cst_93 {dimension_numbers = #tpu.dot_dimension_numbers<[1], [0], [0], [1], [0, 0, 1, 1], [], []>} : vector<128x4xf32>, vector<4x4xf32>, vector<128x4xf32> -> vector<128x4xf32>
    %c0_94 = arith.constant 0 : index
    %c0_95 = arith.constant 0 : index
    %98 = vector.load %arg6[%c0_94, %c0_95] : memref<128x4xf32, #tpu.memory_space<vmem>>, vector<128x4xf32>
    %99 = arith.addf %98, %97 : vector<128x4xf32>
    %c0_96 = arith.constant 0 : index
    %c0_97 = arith.constant 0 : index
    %100 = vector.load %arg6[%c0_96, %c0_97] : memref<128x4xf32, #tpu.memory_space<vmem>>, vector<128x4xf32>
    tpu.vector_store %arg6[%c0_96, %c0_97], %99 {strides = array<i32>} : memref<128x4xf32, #tpu.memory_space<vmem>>, vector<128x4xf32>,
    %c0_98 = arith.constant 0 : index
    %c0_99 = arith.constant 0 : index
    %101 = vector.load %arg6[%c0_98, %c0_99] : memref<128x4xf32, #tpu.memory_space<vmem>>, vector<128x4xf32>
    %102 = vector.broadcast %20 : vector<1x4xf32> to vector<128x4xf32>
    %103 = arith.addf %101, %102 : vector<128x4xf32>
    %104 = vector.shape_cast %103 : vector<128x4xf32> to vector<8x16x4xf32>
    %c0_100 = arith.constant 0 : index
    %c2_101 = arith.constant 2 : index
    %c0_102 = arith.constant 0 : index
    %c0_103 = arith.constant 0 : index
    %c0_104 = arith.constant 0 : index
    %105 = vector.load %arg5[%c0_100, %c2_101, %c0_102, %c0_103, %c0_104] : memref<1x4x8x16x4xf32, #tpu.memory_space<vmem>>, vector<1x1x8x16x4xf32>
    %106 = vector.shape_cast %105 : vector<1x1x8x16x4xf32> to vector<8x16x4xf32>
    %107 = vector.shape_cast %104 : vector<8x16x4xf32> to vector<1x1x8x16x4xf32>
    tpu.vector_store %arg5[%c0_100, %c2_101, %c0_102, %c0_103, %c0_104], %107 {strides = array<i32>} : memref<1x4x8x16x4xf32, #tpu.memory_space<vmem>>, vector<1x1x8x16x4xf32>,
    %c12 = arith.constant 12 : index
    %c0_105 = arith.constant 0 : index
    %c0_106 = arith.constant 0 : index
    %108 = vector.load %arg3[%c12, %c0_105, %c0_106] : memref<16x4x4xf32, #tpu.memory_space<vmem>>, vector<1x4x4xf32>
    %109 = vector.shape_cast %108 : vector<1x4x4xf32> to vector<4x4xf32>
    %cst_107 = arith.constant dense<0.000000e+00> : vector<128x4xf32>
    %110 = tpu.matmul %11, %109, %cst_107 {dimension_numbers = #tpu.dot_dimension_numbers<[1], [0], [0], [1], [0, 0, 1, 1], [], []>} : vector<128x4xf32>, vector<4x4xf32>, vector<128x4xf32> -> vector<128x4xf32>
    %c0_108 = arith.constant 0 : index
    %c0_109 = arith.constant 0 : index
    %111 = vector.load %arg6[%c0_108, %c0_109] : memref<128x4xf32, #tpu.memory_space<vmem>>, vector<128x4xf32>
    tpu.vector_store %arg6[%c0_108, %c0_109], %110 {strides = array<i32>} : memref<128x4xf32, #tpu.memory_space<vmem>>, vector<128x4xf32>,
    %c13 = arith.constant 13 : index
    %c0_110 = arith.constant 0 : index
    %c0_111 = arith.constant 0 : index
    %112 = vector.load %arg3[%c13, %c0_110, %c0_111] : memref<16x4x4xf32, #tpu.memory_space<vmem>>, vector<1x4x4xf32>
    %113 = vector.shape_cast %112 : vector<1x4x4xf32> to vector<4x4xf32>
    %cst_112 = arith.constant dense<0.000000e+00> : vector<128x4xf32>
    %114 = tpu.matmul %13, %113, %cst_112 {dimension_numbers = #tpu.dot_dimension_numbers<[1], [0], [0], [1], [0, 0, 1, 1], [], []>} : vector<128x4xf32>, vector<4x4xf32>, vector<128x4xf32> -> vector<128x4xf32>
    %c0_113 = arith.constant 0 : index
    %c0_114 = arith.constant 0 : index
    %115 = vector.load %arg6[%c0_113, %c0_114] : memref<128x4xf32, #tpu.memory_space<vmem>>, vector<128x4xf32>
    %116 = arith.addf %115, %114 : vector<128x4xf32>
    %c0_115 = arith.constant 0 : index
    %c0_116 = arith.constant 0 : index
    %117 = vector.load %arg6[%c0_115, %c0_116] : memref<128x4xf32, #tpu.memory_space<vmem>>, vector<128x4xf32>
    tpu.vector_store %arg6[%c0_115, %c0_116], %116 {strides = array<i32>} : memref<128x4xf32, #tpu.memory_space<vmem>>, vector<128x4xf32>,
    %c14 = arith.constant 14 : index
    %c0_117 = arith.constant 0 : index
    %c0_118 = arith.constant 0 : index
    %118 = vector.load %arg3[%c14, %c0_117, %c0_118] : memref<16x4x4xf32, #tpu.memory_space<vmem>>, vector<1x4x4xf32>
    %119 = vector.shape_cast %118 : vector<1x4x4xf32> to vector<4x4xf32>
    %cst_119 = arith.constant dense<0.000000e+00> : vector<128x4xf32>
    %120 = tpu.matmul %17, %119, %cst_119 {dimension_numbers = #tpu.dot_dimension_numbers<[1], [0], [0], [1], [0, 0, 1, 1], [], []>} : vector<128x4xf32>, vector<4x4xf32>, vector<128x4xf32> -> vector<128x4xf32>
    %c0_120 = arith.constant 0 : index
    %c0_121 = arith.constant 0 : index
    %121 = vector.load %arg6[%c0_120, %c0_121] : memref<128x4xf32, #tpu.memory_space<vmem>>, vector<128x4xf32>
    %122 = arith.addf %121, %120 : vector<128x4xf32>
    %c0_122 = arith.constant 0 : index
    %c0_123 = arith.constant 0 : index
    %123 = vector.load %arg6[%c0_122, %c0_123] : memref<128x4xf32, #tpu.memory_space<vmem>>, vector<128x4xf32>
    tpu.vector_store %arg6[%c0_122, %c0_123], %122 {strides = array<i32>} : memref<128x4xf32, #tpu.memory_space<vmem>>, vector<128x4xf32>,
    %c15 = arith.constant 15 : index
    %c0_124 = arith.constant 0 : index
    %c0_125 = arith.constant 0 : index
    %124 = vector.load %arg3[%c15, %c0_124, %c0_125] : memref<16x4x4xf32, #tpu.memory_space<vmem>>, vector<1x4x4xf32>
    %125 = vector.shape_cast %124 : vector<1x4x4xf32> to vector<4x4xf32>
    %cst_126 = arith.constant dense<0.000000e+00> : vector<128x4xf32>
    %126 = tpu.matmul %19, %125, %cst_126 {dimension_numbers = #tpu.dot_dimension_numbers<[1], [0], [0], [1], [0, 0, 1, 1], [], []>} : vector<128x4xf32>, vector<4x4xf32>, vector<128x4xf32> -> vector<128x4xf32>
    %c0_127 = arith.constant 0 : index
    %c0_128 = arith.constant 0 : index
    %127 = vector.load %arg6[%c0_127, %c0_128] : memref<128x4xf32, #tpu.memory_space<vmem>>, vector<128x4xf32>
    %128 = arith.addf %127, %126 : vector<128x4xf32>
    %c0_129 = arith.constant 0 : index
    %c0_130 = arith.constant 0 : index
    %129 = vector.load %arg6[%c0_129, %c0_130] : memref<128x4xf32, #tpu.memory_space<vmem>>, vector<128x4xf32>
    tpu.vector_store %arg6[%c0_129, %c0_130], %128 {strides = array<i32>} : memref<128x4xf32, #tpu.memory_space<vmem>>, vector<128x4xf32>,
    %c0_131 = arith.constant 0 : index
    %c0_132 = arith.constant 0 : index
    %130 = vector.load %arg6[%c0_131, %c0_132] : memref<128x4xf32, #tpu.memory_space<vmem>>, vector<128x4xf32>
    %131 = vector.broadcast %20 : vector<1x4xf32> to vector<128x4xf32>
    %132 = arith.addf %130, %131 : vector<128x4xf32>
    %133 = vector.shape_cast %132 : vector<128x4xf32> to vector<8x16x4xf32>
    %c0_133 = arith.constant 0 : index
    %c3_134 = arith.constant 3 : index
    %c0_135 = arith.constant 0 : index
    %c0_136 = arith.constant 0 : index
    %c0_137 = arith.constant 0 : index
    %134 = vector.load %arg5[%c0_133, %c3_134, %c0_135, %c0_136, %c0_137] : memref<1x4x8x16x4xf32, #tpu.memory_space<vmem>>, vector<1x1x8x16x4xf32>
    %135 = vector.shape_cast %134 : vector<1x1x8x16x4xf32> to vector<8x16x4xf32>
    %136 = vector.shape_cast %133 : vector<8x16x4xf32> to vector<1x1x8x16x4xf32>
    tpu.vector_store %arg5[%c0_133, %c3_134, %c0_135, %c0_136, %c0_137], %136 {strides = array<i32>} : memref<1x4x8x16x4xf32, #tpu.memory_space<vmem>>, vector<1x1x8x16x4xf32>,
    return
  }
  func.func @transform_0(%arg0: i32, %arg1: i32) -> (i32, i32, i32, i32, i32) {
    %c0_i32 = arith.constant 0 : i32
    %c0_i32_0 = arith.constant 0 : i32
    %c0_i32_1 = arith.constant 0 : i32
    %c0_i32_2 = arith.constant 0 : i32
    return %arg0, %arg1, %c0_i32, %c0_i32_0, %c0_i32_1 : i32, i32, i32, i32, i32
  }
  func.func @transform_1(%arg0: i32, %arg1: i32) -> (i32, i32, i32) {
    %c0_i32 = arith.constant 0 : i32
    %c0_i32_0 = arith.constant 0 : i32
    %c0_i32_1 = arith.constant 0 : i32
    %c0_i32_2 = arith.constant 0 : i32
    return %c0_i32, %c0_i32_0, %c0_i32_1 : i32, i32, i32
  }
  func.func @transform_2(%arg0: i32, %arg1: i32) -> (i32, i32) {
    %c0_i32 = arith.constant 0 : i32
    %c0_i32_0 = arith.constant 0 : i32
    %c0_i32_1 = arith.constant 0 : i32
    return %c0_i32, %c0_i32_0 : i32, i32
  }
  func.func @transform_3(%arg0: i32, %arg1: i32) -> (i32, i32, i32, i32, i32) {
    %c0_i32 = arith.constant 0 : i32
    %c0_i32_0 = arith.constant 0 : i32
    %c0_i32_1 = arith.constant 0 : i32
    %c0_i32_2 = arith.constant 0 : i32
    return %arg0, %c0_i32, %arg1, %c0_i32_0, %c0_i32_1 : i32, i32, i32, i32, i32
  }
}

</mosaic_0001>

<bundles_post_ra>
// kernel: tpu_custom_call.1
= control target key start
LH: loop header
LB: loop body
LE: loop exit
PB: predicated region body
PF: predicated region fallthrough
CT: control target
= control target key end

     0   :  { %s3311_s12 = smov 0   ;;  %s3313_s13 = smov 0   ;;  %s4828_s0 = inlined_call_operand.vmem [shape: f32[2,2,10,18,4], index: 0, kind: input, shape index: {}]   ;;  %s4829_s1 = inlined_call_operand.vmem [shape: f32[16,4,4], index: 1, kind: input, shape index: {}]   ;;  %s4830_s2 = inlined_call_operand.vmem [shape: f32[1,4], index: 2, kind: input, shape index: {}]   ;;  %s4831_s3 = inlined_call_operand.vmem [shape: f32[2,4,16,16,4], index: 3, kind: output, shape index: {}]  }
   0x1   :  { %s3315_s14 = smov 0   ;;  %s3317_s15 = smov 0  }
   0x2   :  { %s3319_s16 = smov 0   ;;  %s3321_s17 = smov 0  }
   0x3   :  { %s3323_s18 = smov 0  }
   0x4 LB: > { %s22_s19 = sadd.s32 1, %s3281_s16  ;;  %s25_s20 = sadd.s32 1, %s3285_s17  ;;  %s3289_s18 = sphi %s3323_s18, %s13_s18   ;;  %s3285_s17 = sphi %s3321_s17, %s4838_s17   ;;  %s3281_s16 = sphi %s3319_s16, %s4837_s16   ;;  %s3277_s15 = sphi %s3317_s15, %s4836_s15   ;;  %s3273_s14 = sphi %s3315_s14, %s4835_s14   ;;  %s3269_s13 = sphi %s3313_s13, %s4834_s13   ;;  %s3265_s12 = sphi %s3311_s12, %s4833_s12  }
   0x5   : > { %p23_p0 = scmp.ge.s32.totalorder %s22_s19, 2  ;;  %s2808_s21 = sadd.s32 4294967295, %s3289_s18  }
   0x6   : > { %p114_p1 = scmp.ne.s32.totalorder %s3269_s13, %s3265_s12  ;;  %p115_p2 = scmp.eq.s32.totalorder %s2808_s21, 3 }
   0x7   : > { %s4840_s19 = smov (%p23_p0, %s22_s19), 0  ;;  %s4842_s20 = smov (!%p23_p0, %s25_s20), %s3285_s17 }
   0x8   : > { %s100_s22 = ssub.s32 %s3281_s16, %s4840_s19  ;;  %p27_p3 = scmp.ge.s32.totalorder %s4842_s20, 2 }
   0x9   : > { %p2812_p4 = scmp.ge.s32.totalorder %s3289_s18, 1  ;;  %p3357_p5 = por %p115_p2, %p114_p1 }
   0xa   : > { %p157_p6 = scmp.lt.s32.totalorder %s3289_s18, 5  ;;  %s4844_s20 = smov (%p27_p3, %s4842_s20), 0 }
   0xb   : > { %s99_s24 = ssub.s32 %s3285_s17, %s4844_s20  ;;  %s104_s26 = sadd.s32 1, %s3269_s13 }
   0xc   : > { %p158_p7 = pnand %p2812_p4, %p157_p6  ;;  %s101_s25 = sor.u32 %s100_s22, %s99_s24 }
   0xd   : > { %p102_p8 = scmp.eq.s32.totalorder %s101_s25, 0  ;;  %p184_p9 = scmp.lt.s32.totalorder (!%p158_p7), %s3277_s15, 1 }
   0xe   : > { %161 = sbr.rel (%p158_p7) target bundleno = 732 (0x2dc), region = 32  ;;  %p186_p10 = scmp.lt.s32.totalorder (!%p158_p7), %s3273_s14, 1 }
   0xf   : > { %s3368_s27 = scalar_select %p102_p8, %s3269_s13, %s104_s26  }
  0x10   : > { %s181_s29 = sand.u32 (!%p158_p7), 1, %s3265_s12  }
  0x13   : > { %v357_v0 = vld [vmem:[%s4829_s1] sm:$0xf]  ;;  %vm391_vm0 = vcmask 1043456   ;;  %v2886_v1 = vld [vmem:[%s4829_s1 + $0x10] sm:$0xf]  ;;  %s185_s7 = scalar_select %p184_p9, %s3277_s15, 1 }
  0x14   : > { %2815 = vmatpush.msk.msra.mxu0 %vm391_vm0, %v357_v0  ;;  %v2832_v2 = vld [vmem:[%s4829_s1 + $0x4] sm:$0xf]  ;;  %v2904_v3 = vld [vmem:[%s4829_s1 + $0x14] sm:$0xf]  ;;  %v2850_v4 = vld [vmem:[%s4829_s1 + $0x8] sm:$0xf] }
  0x15   : > { %2833 = vmatpush.msk.msra.mxu1 %vm391_vm0, %v2832_v2  ;;  %s187_s21 = scalar_select %p186_p10, %s3273_s14, 1  ;;  %2851 = vmatpush.msk.msra.mxu2 %vm391_vm0, %v2850_v4  ;;  %v2922_v5 = vld [vmem:[%s4829_s1 + $0x18] sm:$0xf]  ;;  %v2868_v6 = vld [vmem:[%s4829_s1 + $0xc] sm:$0xf]  ;;  %vm358_vm1 = vcmask 31744  }
  0x16   : > { %2887 = vmatpush.msk.msrb.mxu0 %vm391_vm0, %v2886_v1  ;;  %s3159_s28 = smul.u32 60, %s185_s7  ;;  %2869 = vmatpush.msk.msra.mxu3 %vm391_vm0, %v2868_v6  ;;  %v2940_v7 = vld [vmem:[%s4829_s1 + $0x1c] sm:$0xf]  ;;  %vm248_vm2 = vcmask 1046528   ;;  %v2974_v4 = vld [vmem:[%s4829_s1 + $0x20] sm:$0xf] }
  0x17   : > { %2905 = vmatpush.msk.msrb.mxu1 %vm391_vm0, %v2904_v3  ;;  %2923 = vmatpush.msk.msrb.mxu2 %vm391_vm0, %v2922_v5  ;;  %s3158_s4 = smul.u32 30, %s187_s21  ;;  %vm289_vm3 = vcmask 1045504   ;;  %s3153_s30 = sshll.u32 (%p3357_p5), %s3277_s15, 7 }
  0x18   : > { %2941 = vmatpush.msk.msrb.mxu3 %vm391_vm0, %v2940_v7 }
  0x19   : > { %s190_s5 = sadd.s32 %s3159_s28, %s3158_s4 }
  0x1a   : > { %s2814_s6 = sshll.u32 %s190_s5, 3  ;;  %s2813_s5 = sshll.u32 %s181_s29, 9 }
  0x1b   : > { %s3409_s10 = scalar_lea.vmem %s4828_s0, %s2814_s6  ;;  %s3806_s12 = scalar_lea.vmem [#allocation3], %s2813_s5 }
  0x1c   : > { %v3412_v8 = vld [vmem:[%s3409_s10] sm:$0xff]  ;;  %v3415_v9 = vld [vmem:[%s3409_s10 + $0x8] sm:$0xff]  ;;  %v3418_v10 = vld [vmem:[%s3409_s10 + $0x18] sm:$0xff]  ;;  %s3157_s29 = sshll.u32 (%p3357_p5), %s3273_s14, 4 }
  0x1d   : > { %v249_v11 = vrot.slane %v3412_v8, 1  ;;  %2816 = vmatmul.msk.f32.vlgmr.msra.gmra.mxu0 %vm358_vm1, %v3412_v8  ;;  %v250_v12 = vrot.slane %v3415_v9, 1  ;;  %2852 = vmatmul.msk.f32.vlgmr.msra.gmra.mxu2 %vm358_vm1, %v3418_v10  ;;  %v254_v13 = vrot.slane %v3418_v10, 1  ;;  %v3428_v14 = vld [vmem:[%s3409_s10 + $0x10] sm:$0x3]  ;;  %v3431_v15 = vld [vmem:[%s3409_s10 + $0x20] sm:$0xff]  ;;  %s2446_s4 = sadd.s32 (%p3357_p5), %s3157_s29, %s3153_s30 }
  0x1e   : > { %v255_v17 = vrot.slane %v3431_v15, 1  ;;  %v3440_v18 = vld [vmem:[%s3409_s10 + $0x28] sm:$0x3]  ;;  %v252_v19 = vrot.slane %v3428_v14, 1  ;;  %v3462_v24 = vld [vmem:[%s3409_s10 + $0x38] sm:$0xff]  ;;  %v3465_v25 = vld [vmem:[%s3409_s10 + $0x30] sm:$0xff]  ;;  %2975 = vmatpush.msk.msra.mxu0 %vm391_vm0, %v2974_v4 }
  0x1f   : > { %v3434_v16 = vsel %vm248_vm2, %v249_v11, %v250_v12  ;;  %v257_v21 = vrot.slane %v3440_v18, 1  ;;  %v259_v26 = vrot.slane %v3465_v25, 1  ;;  %v260_v27 = vrot.slane %v3462_v24, 1  ;;  %v3481_v29 = vld [vmem:[%s3409_s10 + $0x40] sm:$0x3]  ;;  %v3496_v32 = vld [vmem:[%s3409_s10 + $0x50] sm:$0xff] }
  0x20   : > { %2834 = vmatmul.msk.f32.vlgmr.msra.gmra.mxu1 %vm358_vm1, %v3434_v16  ;;  %v3444_v20 = vsel %vm248_vm2, %v254_v13, %v255_v17  ;;  %v3452_v22 = vsel %vm248_vm2, %v250_v12, %v252_v19  ;;  %v262_v30 = vrot.slane %v3481_v29, 1  ;;  %v3499_v33 = vld [vmem:[%s3409_s10 + $0x48] sm:$0xff]  ;;  %v265_v35 = vrot.slane %v3496_v32, 1  ;;  %v3515_v37 = vld [vmem:[%s3409_s10 + $0x58] sm:$0x3]  ;;  %v3533_v41 = vld [vmem:[%s3409_s10 + $0x60] sm:$0xff] }
  0x21   : > { %2870 = vmatmul.msk.f32.vlgmr.msra.gmra.mxu3 %vm358_vm1, %v3444_v20  ;;  %v3457_v23 = vsel %vm248_vm2, %v255_v17, %v257_v21  ;;  %v3476_v28 = vsel %vm248_vm2, %v259_v26, %v260_v27  ;;  %v264_v34 = vrot.slane %v3499_v33, 1  ;;  %v267_v38 = vrot.slane %v3515_v37, 1  ;;  %v3530_v40 = vld [vmem:[%s3409_s10 + $0x68] sm:$0xff]  ;;  %v3549_v45 = vld [vmem:[%s3409_s10 + $0x70] sm:$0x3]  ;;  %v3564_v48 = vld [vmem:[%s3409_s10 + $0x80] sm:$0xff] }
  0x22   : > { %v3491_v31 = vsel %vm248_vm2, %v260_v27, %v262_v30  ;;  %v269_v42 = vrot.slane %v3533_v41, 1  ;;  %v270_v43 = vrot.slane %v3530_v40, 1  ;;  %v272_v46 = vrot.slane %v3549_v45, 1  ;;  %v3567_v49 = vld [vmem:[%s3409_s10 + $0x78] sm:$0xff]  ;;  %v3583_v53 = vld [vmem:[%s3409_s10 + $0x88] sm:$0x3] }
  0x23   : > { %v3510_v36 = vsel %vm248_vm2, %v264_v34, %v265_v35  ;;  %v3525_v39 = vsel %vm248_vm2, %v265_v35, %v267_v38  ;;  %v274_v50 = vrot.slane %v3567_v49, 1  ;;  %v275_v51 = vrot.slane %v3564_v48, 1  ;;  %v3598_v56 = vld [vmem:[%s3409_s10 + $0x98] sm:$0xff]  ;;  %v3601_v57 = vld [vmem:[%s3409_s10 + $0x90] sm:$0xff]  ;;  %v3617_v61 = vld [vmem:[%s3409_s10 + $0xa0] sm:$0x3] }
  0x24   : > { %v3544_v44 = vsel %vm248_vm2, %v269_v42, %v270_v43  ;;  %v3559_v47 = vsel %vm248_vm2, %v270_v43, %v272_v46  ;;  %v277_v54 = vrot.slane %v3583_v53, 1  ;;  %v279_v58 = vrot.slane %v3601_v57, 1  ;;  %v3632_v0 = vld [vmem:[%s3409_s10 + $0xb0] sm:$0xff]  ;;  %v3635_v1 = vld [vmem:[%s3409_s10 + $0xa8] sm:$0xff]  ;;  %v3657_v11 = vld [vmem:[%s3409_s10 + $0xb8] sm:$0x3] }
  0x25   : > { %2817 = vmatmul.msk.f32.gmra.mxu0 %vm358_vm1, %v3415_v9  ;;  %2853 = vmatmul.msk.f32.gmra.mxu2 %vm358_vm1, %v3431_v15  ;;  %v3578_v52 = vsel %vm248_vm2, %v274_v50, %v275_v51  ;;  %v280_v59 = vrot.slane %v3598_v56, 1  ;;  %v282_v62 = vrot.slane %v3617_v61, 1  ;;  %v284_v2 = vrot.slane %v3635_v1, 1  ;;  %v3681_v19 = vld [vmem:[%s3409_s10 + $0xc8] sm:$0xff]  ;;  %v3684_v21 = vld [vmem:[%s3409_s10 + $0xc0] sm:$0xff]  ;;  %s3154_s5 = sshll.u32 (%p3357_p5), %s2446_s4, 3 }
  0x26   : > { %v3593_v55 = vsel %vm248_vm2, %v275_v51, %v277_v54  ;;  %v285_v3 = vrot.slane %v3632_v0, 1  ;;  %v290_v6 = vrot.slane %v3412_v8, 2  ;;  %v291_v7 = vrot.slane %v3415_v9, 2  ;;  %v2992_v8 = vld [vmem:[%s4829_s1 + $0x24] sm:$0xf]  ;;  %s4679_s8 = scalar_lea.vmem (%p3357_p5), %s4831_s3, %s3154_s5 }
  0x27   : > { %v3612_v60 = vsel %vm248_vm2, %v279_v58, %v280_v59  ;;  %v3627_v63 = vsel %vm248_vm2, %v280_v59, %v282_v62  ;;  %v287_v12 = vrot.slane %v3657_v11, 1  ;;  %v3010_v9 = vld [vmem:[%s4829_s1 + $0x28] sm:$0xf]  ;;  %2993 = vmatpush.msk.msra.mxu1 %vm391_vm0, %v2992_v8  ;;  %v333_v26 = vrot.slane %v3684_v21, 1  ;;  %v3700_v34 = vld [vmem:[%s3409_s10 + $0xd0] sm:$0x3] }
  0x28   : > { %2835 = vmatmul.msk.f32.gmra.mxu1 %vm358_vm1, %v3452_v22  ;;  %v3650_v5 = vsel %vm248_vm2, %v284_v2, %v285_v3  ;;  %v292_v13 = vsel %vm289_vm3, %v290_v6, %v291_v7  ;;  %3011 = vmatpush.msk.msra.mxu2 %vm391_vm0, %v3010_v9  ;;  %v334_v27 = vrot.slane %v3681_v19, 1  ;;  %v336_v35 = vrot.slane %v3700_v34, 1  ;;  %v3028_v38 = vld [vmem:[%s4829_s1 + $0x2c] sm:$0xf] }
  0x29   : > { %2871 = vmatmul.msk.f32.gmra.mxu3 %vm358_vm1, %v3457_v23  ;;  %v3676_v17 = vsel %vm248_vm2, %v285_v3, %v287_v12  ;;  %v295_v46 = vrot.slane %v3418_v10, 2  ;;  %v296_v50 = vrot.slane %v3431_v15, 2  ;;  %v293_v59 = vrot.slane %v3428_v14, 2 }
  0x2a   : > { %v3695_v30 = vsel %vm248_vm2, %v333_v26, %v334_v27  ;;  %3029 = vmatpush.msk.msra.mxu3 %vm391_vm0, %v3028_v38  ;;  %v3714_v42 = vsel %vm248_vm2, %v334_v27, %v336_v35 }
  0x2b   : > { %v3728_v54 = vsel %vm289_vm3, %v295_v46, %v296_v50  ;;  %v294_v3 = vsel %vm289_vm3, %v291_v7, %v293_v59  ;;  %v300_v7 = vrot.slane %v3465_v25, 2 }
  0x2d   : > { %2818 = vmatmul.msk.f32.gmra.mxu0 %vm358_vm1, %v3418_v10  ;;  %2854 = vmatmul.msk.f32.gmra.mxu2 %vm358_vm1, %v3465_v25 }
  0x30   : > { %2836 = vmatmul.msk.f32.gmra.mxu1 %vm358_vm1, %v3444_v20 }
  0x31   : > { %2872 = vmatmul.msk.f32.gmra.mxu3 %vm358_vm1, %v3476_v28 }
  0x35   : > { %2819 = vmatmul.msk.f32.gmra.mxu0 %vm358_vm1, %v3431_v15  ;;  %2855 = vmatmul.msk.f32.gmra.mxu2 %vm358_vm1, %v3462_v24  ;;  %v298_v15 = vrot.slane %v3440_v18, 2 }
  0x37   : > { %v3743_v4 = vsel %vm289_vm3, %v296_v50, %v298_v15  ;;  %v303_v50 = vrot.slane %v3481_v29, 2 }
  0x38   : > { %2837 = vmatmul.msk.f32.gmra.mxu1 %vm358_vm1, %v3457_v23 }
  0x39   : > { %2873 = vmatmul.msk.f32.gmra.mxu3 %vm358_vm1, %v3491_v31 }
  0x3d   : > { %2820 = vmatmul.msk.f32.gmra.mxu0 %vm358_vm1, %v3465_v25  ;;  %2856 = vmatmul.msk.f32.gmra.mxu2 %vm358_vm1, %v3499_v33 }
  0x40   : > { %2838 = vmatmul.msk.f32.gmra.mxu1 %vm358_vm1, %v3476_v28 }
  0x41   : > { %2874 = vmatmul.msk.f32.gmra.mxu3 %vm358_vm1, %v3510_v36 }
  0x45   : > { %2821 = vmatmul.msk.f32.gmra.mxu0 %vm358_vm1, %v3462_v24  ;;  %2857 = vmatmul.msk.f32.gmra.mxu2 %vm358_vm1, %v3496_v32 }
  0x48   : > { %2839 = vmatmul.msk.f32.gmra.mxu1 %vm358_vm1, %v3491_v31 }
  0x49   : > { %2875 = vmatmul.msk.f32.gmra.mxu3 %vm358_vm1, %v3525_v39 }
  0x4d   : > { %2822 = vmatmul.msk.f32.gmra.mxu0 %vm358_vm1, %v3499_v33  ;;  %2858 = vmatmul.msk.f32.gmra.mxu2 %vm358_vm1, %v3533_v41 }
  0x50   : > { %2840 = vmatmul.msk.f32.gmra.mxu1 %vm358_vm1, %v3510_v36 }
  0x51   : > { %2876 = vmatmul.msk.f32.gmra.mxu3 %vm358_vm1, %v3544_v44 }
  0x55   : > { %2823 = vmatmul.msk.f32.gmra.mxu0 %vm358_vm1, %v3496_v32  ;;  %2859 = vmatmul.msk.f32.gmra.mxu2 %vm358_vm1, %v3530_v40 }
  0x58   : > { %2841 = vmatmul.msk.f32.gmra.mxu1 %vm358_vm1, %v3525_v39 }
  0x59   : > { %2877 = vmatmul.msk.f32.gmra.mxu3 %vm358_vm1, %v3559_v47 }
  0x5d   : > { %2824 = vmatmul.msk.f32.gmra.mxu0 %vm358_vm1, %v3533_v41  ;;  %2860 = vmatmul.msk.f32.gmra.mxu2 %vm358_vm1, %v3567_v49 }
  0x60   : > { %2842 = vmatmul.msk.f32.gmra.mxu1 %vm358_vm1, %v3544_v44 }
  0x61   : > { %2878 = vmatmul.msk.f32.gmra.mxu3 %vm358_vm1, %v3578_v52 }
  0x65   : > { %2825 = vmatmul.msk.f32.gmra.mxu0 %vm358_vm1, %v3530_v40  ;;  %2861 = vmatmul.msk.f32.gmra.mxu2 %vm358_vm1, %v3564_v48 }
  0x68   : > { %2843 = vmatmul.msk.f32.gmra.mxu1 %vm358_vm1, %v3559_v47 }
  0x69   : > { %2879 = vmatmul.msk.f32.gmra.mxu3 %vm358_vm1, %v3593_v55 }
  0x6d   : > { %2826 = vmatmul.msk.f32.gmra.mxu0 %vm358_vm1, %v3567_v49  ;;  %2862 = vmatmul.msk.f32.gmra.mxu2 %vm358_vm1, %v3601_v57 }
  0x70   : > { %2844 = vmatmul.msk.f32.gmra.mxu1 %vm358_vm1, %v3578_v52 }
  0x71   : > { %2880 = vmatmul.msk.f32.gmra.mxu3 %vm358_vm1, %v3612_v60 }
  0x75   : > { %2827 = vmatmul.msk.f32.gmra.mxu0 %vm358_vm1, %v3564_v48  ;;  %2863 = vmatmul.msk.f32.gmra.mxu2 %vm358_vm1, %v3598_v56 }
  0x78   : > { %2845 = vmatmul.msk.f32.gmra.mxu1 %vm358_vm1, %v3593_v55 }
  0x79   : > { %2881 = vmatmul.msk.f32.gmra.mxu3 %vm358_vm1, %v3627_v63 }
  0x7d   : > { %2828 = vmatmul.msk.f32.gmra.mxu0 %vm358_vm1, %v3601_v57  ;;  %2864 = vmatmul.msk.f32.gmra.mxu2 %vm358_vm1, %v3635_v1 }
  0x80   : > { %2846 = vmatmul.msk.f32.gmra.mxu1 %vm358_vm1, %v3612_v60 }
  0x81   : > { %2882 = vmatmul.msk.f32.gmra.mxu3 %vm358_vm1, %v3650_v5 }
  0x85   : > { %2829 = vmatmul.msk.f32.gmra.mxu0 %vm358_vm1, %v3598_v56  ;;  %2865 = vmatmul.msk.f32.gmra.mxu2 %vm358_vm1, %v3632_v0 }
  0x88   : > { %2847 = vmatmul.msk.f32.gmra.mxu1 %vm358_vm1, %v3627_v63 }
  0x89   : > { %2883 = vmatmul.msk.f32.gmra.mxu3 %vm358_vm1, %v3676_v17 }
  0x8d   : > { %2830 = vmatmul.msk.f32.gmra.mxu0 %vm358_vm1, %v3635_v1  ;;  %2866 = vmatmul.msk.f32.gmra.mxu2 %vm358_vm1, %v3684_v21 }
  0x90   : > { %2848 = vmatmul.msk.f32.gmra.mxu1 %vm358_vm1, %v3650_v5 }
  0x91   : > { %2884 = vmatmul.msk.f32.gmra.mxu3 %vm358_vm1, %v3695_v30 }
  0x95   : > { %2831 = vmatmul.msk.f32.gmra.mxu0 %vm358_vm1, %v3632_v0  ;;  %2867 = vmatmul.msk.f32.gmra.mxu2 %vm358_vm1, %v3681_v19 }
  0x98   : > { %2849 = vmatmul.msk.f32.gmra.mxu1 %vm358_vm1, %v3676_v17 }
  0x99   : > { %2885 = vmatmul.msk.f32.gmra.mxu3 %vm358_vm1, %v3714_v42 }
  0x9a   : > { %v412_v43 = vpop.f32.mrf.mxu0 }
  0x9b   : > { %460 = vst.msk [vmem:[#allocation2] sm:$0xff] %vm358_vm1, %v412_v43 }
  0x9d   : > { %2888 = vmatmul.msk.f32.vlgmr.msrb.gmra.mxu0 %vm358_vm1, %v3434_v16  ;;  %v530_v51 = vpop.f32.mrf.mxu1  ;;  %2924 = vmatmul.msk.f32.vlgmr.msrb.gmra.mxu2 %vm358_vm1, %v3444_v20 }
  0xa0   : > { %2906 = vmatmul.msk.f32.vlgmr.msrb.gmra.mxu1 %vm358_vm1, %v292_v13  ;;  %v652_v58 = vpop.f32.mrf.mxu2  ;;  %v301_v13 = vrot.slane %v3462_v24, 2 }
  0xa1   : > { %2942 = vmatmul.msk.f32.vlgmr.msrb.gmra.mxu3 %vm358_vm1, %v3728_v54 }
  0xa2   : > { %v415_v62 = vpop.f32.mrf.mxu0  ;;  %v578_v2 = vld [vmem:[#allocation2] sm:$0xff]  ;;  %v3758_v35 = vsel %vm289_vm3, %v300_v7, %v301_v13  ;;  %v3773_v15 = vsel %vm289_vm3, %v301_v13, %v303_v50  ;;  %v308_v50 = vrot.slane %v3515_v37, 2 }
  0xa3   : > { %461 = vst.msk [vmem:[#allocation2 + $0x8] sm:$0xff] %vm358_vm1, %v415_v62  ;;  %v594_v10 = vadd.f32 %v578_v2, %v530_v51 }
  0xa4   : > { %v774_v14 = vpop.f32.mrf.mxu3 }
  0xa5   : > { %610 = vst.msk [vmem:[#allocation2] sm:$0xff] %vm358_vm1, %v594_v10  ;;  %2889 = vmatmul.msk.f32.gmra.mxu0 %vm358_vm1, %v3452_v22  ;;  %v533_v16 = vpop.f32.mrf.mxu1  ;;  %2925 = vmatmul.msk.f32.gmra.mxu2 %vm358_vm1, %v3457_v23 }
  0xa8   : > { %2907 = vmatmul.msk.f32.gmra.mxu1 %vm358_vm1, %v294_v3  ;;  %v655_v6 = vpop.f32.mrf.mxu2 }
  0xa9   : > { %2943 = vmatmul.msk.f32.gmra.mxu3 %vm358_vm1, %v3743_v4 }
  0xaa   : > { %v418_v12 = vpop.f32.mrf.mxu0  ;;  %v579_v18 = vld [vmem:[#allocation2 + $0x8] sm:$0xff] }
  0xab   : > { %462 = vst.msk [vmem:[#allocation2 + $0x10] sm:$0xff] %vm358_vm1, %v418_v12  ;;  %v595_v22 = vadd.f32 %v579_v18, %v533_v16  ;;  %v305_v12 = vrot.slane %v3499_v33, 2 }
  0xac   : > { %v700_v8 = vld [vmem:[#allocation2] sm:$0xff]  ;;  %v777_v27 = vpop.f32.mrf.mxu3 }
  0xad   : > { %611 = vst.msk [vmem:[#allocation2 + $0x8] sm:$0xff] %vm358_vm1, %v595_v22  ;;  %v716_v9 = vadd.f32 %v700_v8, %v652_v58  ;;  %2890 = vmatmul.msk.f32.gmra.mxu0 %vm358_vm1, %v3444_v20  ;;  %v536_v26 = vpop.f32.mrf.mxu1  ;;  %2926 = vmatmul.msk.f32.gmra.mxu2 %vm358_vm1, %v3476_v28  ;;  %v3792_v8 = vld [vmem:[%s4830_s2] ss:$0 sm:$0xff] }
  0xaf   : > { %732 = vst.msk [vmem:[#allocation2] sm:$0xff] %vm358_vm1, %v716_v9 }
  0xb0   : > { %2908 = vmatmul.msk.f32.gmra.mxu1 %vm358_vm1, %v3728_v54  ;;  %v658_v24 = vpop.f32.mrf.mxu2 }
  0xb1   : > { %2944 = vmatmul.msk.f32.gmra.mxu3 %vm358_vm1, %v3758_v35 }
  0xb2   : > { %v421_v38 = vpop.f32.mrf.mxu0  ;;  %v580_v43 = vld [vmem:[#allocation2 + $0x10] sm:$0xff] }
  0xb3   : > { %463 = vst.msk [vmem:[#allocation2 + $0x18] sm:$0xff] %vm358_vm1, %v421_v38  ;;  %v596_v46 = vadd.f32 %v580_v43, %v536_v26 }
  0xb4   : > { %v701_v51 = vld [vmem:[#allocation2 + $0x8] sm:$0xff]  ;;  %v780_v62 = vpop.f32.mrf.mxu3 }
  0xb5   : > { %612 = vst.msk [vmem:[#allocation2 + $0x10] sm:$0xff] %vm358_vm1, %v596_v46  ;;  %v717_v58 = vadd.f32 %v701_v51, %v655_v6  ;;  %2891 = vmatmul.msk.f32.gmra.mxu0 %vm358_vm1, %v3457_v23  ;;  %v539_v59 = vpop.f32.mrf.mxu1  ;;  %2927 = vmatmul.msk.f32.gmra.mxu2 %vm358_vm1, %v3491_v31 }
  0xb6   : > { %v822_v2 = vld [vmem:[#allocation2] sm:$0xff] }
  0xb7   : > { %733 = vst.msk [vmem:[#allocation2 + $0x8] sm:$0xff] %vm358_vm1, %v717_v58  ;;  %v838_v10 = vadd.f32 %v822_v2, %v774_v14  ;;  %v306_v14 = vrot.slane %v3496_v32, 2 }
  0xb8   : > { %2909 = vmatmul.msk.f32.gmra.mxu1 %vm358_vm1, %v3743_v4  ;;  %v661_v29 = vpop.f32.mrf.mxu2 }
  0xb9   : > { %854 = vst.msk [vmem:[#allocation2] sm:$0xff] %vm358_vm1, %v838_v10  ;;  %2945 = vmatmul.msk.f32.gmra.mxu3 %vm358_vm1, %v3773_v15  ;;  %v3796_v9 = vsel %vm289_vm3, %v305_v12, %v306_v14 }
  0xba   : > { %v424_v16 = vpop.f32.mrf.mxu0  ;;  %v581_v3 = vld [vmem:[#allocation2 + $0x18] sm:$0xff] }
  0xbb   : > { %464 = vst.msk [vmem:[#allocation2 + $0x20] sm:$0xff] %vm358_vm1, %v424_v16  ;;  %v597_v6 = vadd.f32 %v581_v3, %v539_v59  ;;  %v3817_v16 = vsel %vm289_vm3, %v306_v14, %v308_v50  ;;  %v310_v14 = vrot.slane %v3533_v41, 2 }
  0xbc   : > { %v702_v18 = vld [vmem:[#allocation2 + $0x10] sm:$0xff]  ;;  %v783_v13 = vpop.f32.mrf.mxu3 }
  0xbd   : > { %613 = vst.msk [vmem:[#allocation2 + $0x18] sm:$0xff] %vm358_vm1, %v597_v6  ;;  %v718_v22 = vadd.f32 %v702_v18, %v658_v24  ;;  %2892 = vmatmul.msk.f32.gmra.mxu0 %vm358_vm1, %v3476_v28  ;;  %v542_v7 = vpop.f32.mrf.mxu1  ;;  %2928 = vmatmul.msk.f32.gmra.mxu2 %vm358_vm1, %v3510_v36 }
  0xbe   : > { %v823_v33 = vld [vmem:[#allocation2 + $0x8] sm:$0xff] }
  0xbf   : > { %734 = vst.msk [vmem:[#allocation2 + $0x10] sm:$0xff] %vm358_vm1, %v718_v22  ;;  %v839_v32 = vadd.f32 %v823_v33, %v777_v27  ;;  %v311_v22 = vrot.slane %v3530_v40, 2 }
  0xc0   : > { %2910 = vmatmul.msk.f32.gmra.mxu1 %vm358_vm1, %v3758_v35  ;;  %v664_v26 = vpop.f32.mrf.mxu2  ;;  %v870_v24 = vld [vmem:[#allocation2] sm:$0xff] }
  0xc1   : > { %855 = vst.msk [vmem:[#allocation2 + $0x8] sm:$0xff] %vm358_vm1, %v839_v32  ;;  %v889_v38 = vadd.f32 %v3792_v8, %v870_v24  ;;  %2946 = vmatmul.msk.f32.gmra.mxu3 %vm358_vm1, %v3796_v9  ;;  %v3837_v40 = vsel %vm289_vm3, %v310_v14, %v311_v22 }
  0xc2   : > { %v427_v43 = vpop.f32.mrf.mxu0  ;;  %v582_v46 = vld [vmem:[#allocation2 + $0x20] sm:$0xff] }
  0xc3   : > { %465 = vst.msk [vmem:[#allocation2 + $0x28] sm:$0xff] %vm358_vm1, %v427_v43  ;;  %v598_v27 = vadd.f32 %v582_v46, %v542_v7 }
  0xc4   : > { %v703_v51 = vld [vmem:[#allocation2 + $0x18] sm:$0xff]  ;;  %905 = vst.msk [vmem:[%s3806_s12] sm:$0xff] %vm358_vm1, %v889_v38  ;;  %v786_v2 = vpop.f32.mrf.mxu3 }
  0xc5   : > { %614 = vst.msk [vmem:[#allocation2 + $0x20] sm:$0xff] %vm358_vm1, %v598_v27  ;;  %v719_v58 = vadd.f32 %v703_v51, %v661_v29  ;;  %2893 = vmatmul.msk.f32.gmra.mxu0 %vm358_vm1, %v3491_v31  ;;  %v545_v59 = vpop.f32.mrf.mxu1  ;;  %2929 = vmatmul.msk.f32.gmra.mxu2 %vm358_vm1, %v3525_v39  ;;  %v313_v51 = vrot.slane %v3549_v45, 2 }
  0xc6   : > { %v824_v10 = vld [vmem:[#allocation2 + $0x10] sm:$0xff] }
  0xc7   : > { %735 = vst.msk [vmem:[#allocation2 + $0x18] sm:$0xff] %vm358_vm1, %v719_v58  ;;  %v840_v37 = vadd.f32 %v824_v10, %v780_v62  ;;  %v3856_v45 = vsel %vm289_vm3, %v311_v22, %v313_v51  ;;  %v315_v22 = vrot.slane %v3567_v49, 2  ;;  %v318_v51 = vrot.slane %v3583_v53, 2 }
  0xc8   : > { %2911 = vmatmul.msk.f32.gmra.mxu1 %vm358_vm1, %v3773_v15  ;;  %v667_v29 = vpop.f32.mrf.mxu2  ;;  %v871_v3 = vld [vmem:[#allocation2 + $0x8] sm:$0xff] }
  0xc9   : > { %856 = vst.msk [vmem:[#allocation2 + $0x10] sm:$0xff] %vm358_vm1, %v840_v37  ;;  %v890_v6 = vadd.f32 %v3792_v8, %v871_v3  ;;  %2947 = vmatmul.msk.f32.gmra.mxu3 %vm358_vm1, %v3817_v16 }
  0xca   : > { %v430_v12 = vpop.f32.mrf.mxu0  ;;  %v583_v18 = vld [vmem:[#allocation2 + $0x28] sm:$0xff] }
  0xcb   : > { %466 = vst.msk [vmem:[#allocation2 + $0x30] sm:$0xff] %vm358_vm1, %v430_v12  ;;  %v599_v62 = vadd.f32 %v583_v18, %v545_v59 }
  0xcc   : > { %v704_v7 = vld [vmem:[#allocation2 + $0x20] sm:$0xff]  ;;  %906 = vst.msk [vmem:[%s3806_s12 + $0x8] sm:$0xff] %vm358_vm1, %v890_v6  ;;  %v789_v24 = vpop.f32.mrf.mxu3 }
  0xcd   : > { %615 = vst.msk [vmem:[#allocation2 + $0x28] sm:$0xff] %vm358_vm1, %v599_v62  ;;  %v720_v33 = vadd.f32 %v704_v7, %v664_v26  ;;  %2894 = vmatmul.msk.f32.gmra.mxu0 %vm358_vm1, %v3510_v36  ;;  %v548_v32 = vpop.f32.mrf.mxu1  ;;  %2930 = vmatmul.msk.f32.gmra.mxu2 %vm358_vm1, %v3544_v44  ;;  %v316_v7 = vrot.slane %v3564_v48, 2 }
  0xce   : > { %v825_v38 = vld [vmem:[#allocation2 + $0x18] sm:$0xff] }
  0xcf   : > { %736 = vst.msk [vmem:[#allocation2 + $0x20] sm:$0xff] %vm358_vm1, %v720_v33  ;;  %v841_v41 = vadd.f32 %v825_v38, %v783_v13  ;;  %v3876_v48 = vsel %vm289_vm3, %v315_v22, %v316_v7  ;;  %v3895_v53 = vsel %vm289_vm3, %v316_v7, %v318_v51  ;;  %v320_v22 = vrot.slane %v3601_v57, 2 }
  0xd0   : > { %2912 = vmatmul.msk.f32.gmra.mxu1 %vm358_vm1, %v3796_v9  ;;  %v670_v26 = vpop.f32.mrf.mxu2  ;;  %v872_v43 = vld [vmem:[#allocation2 + $0x10] sm:$0xff]  ;;  %v321_v7 = vrot.slane %v3598_v56, 2 }
  0xd1   : > { %857 = vst.msk [vmem:[#allocation2 + $0x18] sm:$0xff] %vm358_vm1, %v841_v41  ;;  %v891_v46 = vadd.f32 %v3792_v8, %v872_v43  ;;  %2948 = vmatmul.msk.f32.gmra.mxu3 %vm358_vm1, %v3837_v40 }
  0xd2   : > { %v433_v27 = vpop.f32.mrf.mxu0  ;;  %v584_v50 = vld [vmem:[#allocation2 + $0x30] sm:$0xff]  ;;  %v3915_v56 = vsel %vm289_vm3, %v320_v22, %v321_v7  ;;  %v326_v22 = vrot.slane %v3632_v0, 2 }
  0xd3   : > { %467 = vst.msk [vmem:[#allocation2 + $0x38] sm:$0xff] %vm358_vm1, %v433_v27  ;;  %v600_v13 = vadd.f32 %v584_v50, %v548_v32 }
  0xd4   : > { %v705_v58 = vld [vmem:[#allocation2 + $0x28] sm:$0xff]  ;;  %907 = vst.msk [vmem:[%s3806_s12 + $0x10] sm:$0xff] %vm358_vm1, %v891_v46  ;;  %v792_v37 = vpop.f32.mrf.mxu3 }
  0xd5   : > { %616 = vst.msk [vmem:[#allocation2 + $0x30] sm:$0xff] %vm358_vm1, %v600_v13  ;;  %v721_v59 = vadd.f32 %v705_v58, %v667_v29  ;;  %2895 = vmatmul.msk.f32.gmra.mxu0 %vm358_vm1, %v3525_v39  ;;  %v551_v10 = vpop.f32.mrf.mxu1  ;;  %2931 = vmatmul.msk.f32.gmra.mxu2 %vm358_vm1, %v3559_v47 }
  0xd6   : > { %v826_v3 = vld [vmem:[#allocation2 + $0x20] sm:$0xff] }
  0xd7   : > { %737 = vst.msk [vmem:[#allocation2 + $0x28] sm:$0xff] %vm358_vm1, %v721_v59  ;;  %v842_v6 = vadd.f32 %v826_v3, %v786_v2 }
  0xd8   : > { %2913 = vmatmul.msk.f32.gmra.mxu1 %vm358_vm1, %v3817_v16  ;;  %v673_v29 = vpop.f32.mrf.mxu2  ;;  %v873_v12 = vld [vmem:[#allocation2 + $0x18] sm:$0xff] }
  0xd9   : > { %858 = vst.msk [vmem:[#allocation2 + $0x20] sm:$0xff] %vm358_vm1, %v842_v6  ;;  %v892_v18 = vadd.f32 %v3792_v8, %v873_v12  ;;  %2949 = vmatmul.msk.f32.gmra.mxu3 %vm358_vm1, %v3856_v45 }
  0xda   : > { %v436_v62 = vpop.f32.mrf.mxu0  ;;  %v585_v14 = vld [vmem:[#allocation2 + $0x38] sm:$0xff] }
  0xdb   : > { %468 = vst.msk [vmem:[#allocation2 + $0x40] sm:$0xff] %vm358_vm1, %v436_v62  ;;  %v601_v2 = vadd.f32 %v585_v14, %v551_v10 }
  0xdc   : > { %v706_v33 = vld [vmem:[#allocation2 + $0x30] sm:$0xff]  ;;  %908 = vst.msk [vmem:[%s3806_s12 + $0x18] sm:$0xff] %vm358_vm1, %v892_v18  ;;  %v795_v41 = vpop.f32.mrf.mxu3 }
  0xdd   : > { %617 = vst.msk [vmem:[#allocation2 + $0x38] sm:$0xff] %vm358_vm1, %v601_v2  ;;  %v722_v32 = vadd.f32 %v706_v33, %v670_v26  ;;  %2896 = vmatmul.msk.f32.gmra.mxu0 %vm358_vm1, %v3544_v44  ;;  %v554_v38 = vpop.f32.mrf.mxu1  ;;  %2932 = vmatmul.msk.f32.gmra.mxu2 %vm358_vm1, %v3578_v52 }
  0xde   : > { %v827_v43 = vld [vmem:[#allocation2 + $0x28] sm:$0xff] }
  0xdf   : > { %738 = vst.msk [vmem:[#allocation2 + $0x30] sm:$0xff] %vm358_vm1, %v722_v32  ;;  %v843_v49 = vadd.f32 %v827_v43, %v789_v24 }
  0xe0   : > { %2914 = vmatmul.msk.f32.gmra.mxu1 %vm358_vm1, %v3837_v40  ;;  %v676_v26 = vpop.f32.mrf.mxu2  ;;  %v874_v46 = vld [vmem:[#allocation2 + $0x20] sm:$0xff] }
  0xe1   : > { %859 = vst.msk [vmem:[#allocation2 + $0x28] sm:$0xff] %vm358_vm1, %v843_v49  ;;  %v893_v27 = vadd.f32 %v3792_v8, %v874_v46  ;;  %2950 = vmatmul.msk.f32.gmra.mxu3 %vm358_vm1, %v3876_v48 }
  0xe2   : > { %v439_v50 = vpop.f32.mrf.mxu0  ;;  %v586_v13 = vld [vmem:[#allocation2 + $0x40] sm:$0xff] }
  0xe3   : > { %469 = vst.msk [vmem:[#allocation2 + $0x48] sm:$0xff] %vm358_vm1, %v439_v50  ;;  %v602_v24 = vadd.f32 %v586_v13, %v554_v38 }
  0xe4   : > { %v707_v58 = vld [vmem:[#allocation2 + $0x38] sm:$0xff]  ;;  %909 = vst.msk [vmem:[%s3806_s12 + $0x20] sm:$0xff] %vm358_vm1, %v893_v27  ;;  %v798_v3 = vpop.f32.mrf.mxu3 }
  0xe5   : > { %618 = vst.msk [vmem:[#allocation2 + $0x40] sm:$0xff] %vm358_vm1, %v602_v24  ;;  %v723_v59 = vadd.f32 %v707_v58, %v673_v29  ;;  %2897 = vmatmul.msk.f32.gmra.mxu0 %vm358_vm1, %v3559_v47  ;;  %v557_v10 = vpop.f32.mrf.mxu1  ;;  %2933 = vmatmul.msk.f32.gmra.mxu2 %vm358_vm1, %v3593_v55  ;;  %v323_v24 = vrot.slane %v3617_v61, 2 }
  0xe6   : > { %v828_v6 = vld [vmem:[#allocation2 + $0x30] sm:$0xff] }
  0xe7   : > { %739 = vst.msk [vmem:[#allocation2 + $0x38] sm:$0xff] %vm358_vm1, %v723_v59  ;;  %v844_v12 = vadd.f32 %v828_v6, %v792_v37  ;;  %v3934_v61 = vsel %vm289_vm3, %v321_v7, %v323_v24 }
  0xe8   : > { %2915 = vmatmul.msk.f32.gmra.mxu1 %vm358_vm1, %v3856_v45  ;;  %v679_v29 = vpop.f32.mrf.mxu2  ;;  %v875_v18 = vld [vmem:[#allocation2 + $0x28] sm:$0xff] }
  0xe9   : > { %860 = vst.msk [vmem:[#allocation2 + $0x30] sm:$0xff] %vm358_vm1, %v844_v12  ;;  %v894_v62 = vadd.f32 %v3792_v8, %v875_v18  ;;  %2951 = vmatmul.msk.f32.gmra.mxu3 %vm358_vm1, %v3895_v53 }
  0xea   : > { %v442_v14 = vpop.f32.mrf.mxu0  ;;  %v587_v2 = vld [vmem:[#allocation2 + $0x48] sm:$0xff] }
  0xeb   : > { %470 = vst.msk [vmem:[#allocation2 + $0x50] sm:$0xff] %vm358_vm1, %v442_v14  ;;  %v603_v37 = vadd.f32 %v587_v2, %v557_v10 }
  0xec   : > { %v708_v33 = vld [vmem:[#allocation2 + $0x40] sm:$0xff]  ;;  %910 = vst.msk [vmem:[%s3806_s12 + $0x28] sm:$0xff] %vm358_vm1, %v894_v62  ;;  %v801_v43 = vpop.f32.mrf.mxu3 }
  0xed   : > { %619 = vst.msk [vmem:[#allocation2 + $0x48] sm:$0xff] %vm358_vm1, %v603_v37  ;;  %v724_v32 = vadd.f32 %v708_v33, %v676_v26  ;;  %2898 = vmatmul.msk.f32.gmra.mxu0 %vm358_vm1, %v3578_v52  ;;  %v560_v38 = vpop.f32.mrf.mxu1  ;;  %2934 = vmatmul.msk.f32.gmra.mxu2 %vm358_vm1, %v3612_v60  ;;  %v325_v37 = vrot.slane %v3635_v1, 2 }
  0xee   : > { %v829_v49 = vld [vmem:[#allocation2 + $0x38] sm:$0xff] }
  0xef   : > { %740 = vst.msk [vmem:[#allocation2 + $0x40] sm:$0xff] %vm358_vm1, %v724_v32  ;;  %v845_v57 = vadd.f32 %v829_v49, %v795_v41  ;;  %v3954_v0 = vsel %vm289_vm3, %v325_v37, %v326_v22 }
  0xf0   : > { %2916 = vmatmul.msk.f32.gmra.mxu1 %vm358_vm1, %v3876_v48  ;;  %v682_v26 = vpop.f32.mrf.mxu2  ;;  %v876_v46 = vld [vmem:[#allocation2 + $0x30] sm:$0xff] }
  0xf1   : > { %861 = vst.msk [vmem:[#allocation2 + $0x38] sm:$0xff] %vm358_vm1, %v845_v57  ;;  %v895_v27 = vadd.f32 %v3792_v8, %v876_v46  ;;  %2952 = vmatmul.msk.f32.gmra.mxu3 %vm358_vm1, %v3915_v56  ;;  %v3062_v57 = vld [vmem:[%s4829_s1 + $0x30] sm:$0xf] }
  0xf2   : > { %v445_v50 = vpop.f32.mrf.mxu0  ;;  %v588_v13 = vld [vmem:[#allocation2 + $0x50] sm:$0xff]  ;;  %3063 = vmatpush.msk.msrb.mxu0 %vm391_vm0, %v3062_v57 }
  0xf3   : > { %471 = vst.msk [vmem:[#allocation2 + $0x58] sm:$0xff] %vm358_vm1, %v445_v50  ;;  %v604_v41 = vadd.f32 %v588_v13, %v560_v38 }
  0xf4   : > { %v709_v51 = vld [vmem:[#allocation2 + $0x48] sm:$0xff]  ;;  %911 = vst.msk [vmem:[%s3806_s12 + $0x30] sm:$0xff] %vm358_vm1, %v895_v27  ;;  %v804_v10 = vpop.f32.mrf.mxu3 }
  0xf5   : > { %620 = vst.msk [vmem:[#allocation2 + $0x50] sm:$0xff] %vm358_vm1, %v604_v41  ;;  %v725_v58 = vadd.f32 %v709_v51, %v679_v29  ;;  %2899 = vmatmul.msk.f32.gmra.mxu0 %vm358_vm1, %v3593_v55  ;;  %v563_v59 = vpop.f32.mrf.mxu1  ;;  %2935 = vmatmul.msk.f32.gmra.mxu2 %vm358_vm1, %v3627_v63  ;;  %v328_v41 = vrot.slane %v3657_v11, 2 }
  0xf6   : > { %v830_v6 = vld [vmem:[#allocation2 + $0x40] sm:$0xff] }
  0xf7   : > { %741 = vst.msk [vmem:[#allocation2 + $0x48] sm:$0xff] %vm358_vm1, %v725_v58  ;;  %v846_v12 = vadd.f32 %v830_v6, %v798_v3  ;;  %v3977_v11 = vsel %vm289_vm3, %v326_v22, %v328_v41  ;;  %v338_v22 = vrot.slane %v3684_v21, 2 }
  0xf8   : > { %2917 = vmatmul.msk.f32.gmra.mxu1 %vm358_vm1, %v3895_v53  ;;  %v685_v29 = vpop.f32.mrf.mxu2  ;;  %v877_v18 = vld [vmem:[#allocation2 + $0x38] sm:$0xff] }
  0xf9   : > { %862 = vst.msk [vmem:[#allocation2 + $0x40] sm:$0xff] %vm358_vm1, %v846_v12  ;;  %v896_v62 = vadd.f32 %v3792_v8, %v877_v18  ;;  %2953 = vmatmul.msk.f32.gmra.mxu3 %vm358_vm1, %v3934_v61  ;;  %v3080_v18 = vld [vmem:[%s4829_s1 + $0x34] sm:$0xf] }
  0xfa   : > { %v448_v14 = vpop.f32.mrf.mxu0  ;;  %v589_v2 = vld [vmem:[#allocation2 + $0x58] sm:$0xff]  ;;  %3081 = vmatpush.msk.msrb.mxu1 %vm391_vm0, %v3080_v18 }
  0xfb   : > { %472 = vst.msk [vmem:[#allocation2 + $0x60] sm:$0xff] %vm358_vm1, %v448_v14  ;;  %v605_v3 = vadd.f32 %v589_v2, %v563_v59 }
  0xfc   : > { %v710_v7 = vld [vmem:[#allocation2 + $0x50] sm:$0xff]  ;;  %912 = vst.msk [vmem:[%s3806_s12 + $0x38] sm:$0xff] %vm358_vm1, %v896_v62  ;;  %v807_v38 = vpop.f32.mrf.mxu3 }
  0xfd   : > { %621 = vst.msk [vmem:[#allocation2 + $0x58] sm:$0xff] %vm358_vm1, %v605_v3  ;;  %v726_v33 = vadd.f32 %v710_v7, %v682_v26  ;;  %2900 = vmatmul.msk.f32.gmra.mxu0 %vm358_vm1, %v3612_v60  ;;  %v566_v32 = vpop.f32.mrf.mxu1  ;;  %2936 = vmatmul.msk.f32.gmra.mxu2 %vm358_vm1, %v3650_v5  ;;  %v339_v7 = vrot.slane %v3681_v19, 2 }
  0xfe   : > { %v831_v49 = vld [vmem:[#allocation2 + $0x48] sm:$0xff] }
  0xff   : > { %742 = vst.msk [vmem:[#allocation2 + $0x50] sm:$0xff] %vm358_vm1, %v726_v33  ;;  %v847_v1 = vadd.f32 %v831_v49, %v801_v43  ;;  %v4005_v19 = vsel %vm289_vm3, %v338_v22, %v339_v7  ;;  %v3217_v22 = vld [vmem:[%s3409_s10 + $0x18] sm:$0xff] }
 0x100   : > { %2918 = vmatmul.msk.f32.gmra.mxu1 %vm358_vm1, %v3915_v56  ;;  %v688_v26 = vpop.f32.mrf.mxu2  ;;  %v878_v46 = vld [vmem:[#allocation2 + $0x40] sm:$0xff] }
 0x101   : > { %863 = vst.msk [vmem:[#allocation2 + $0x48] sm:$0xff] %vm358_vm1, %v847_v1  ;;  %v897_v27 = vadd.f32 %v3792_v8, %v878_v46  ;;  %2954 = vmatmul.msk.f32.gmra.mxu3 %vm358_vm1, %v3954_v0 }
 0x102   : > { %v451_v43 = vpop.f32.mrf.mxu0  ;;  %v590_v50 = vld [vmem:[#allocation2 + $0x60] sm:$0xff] }
 0x103   : > { %473 = vst.msk [vmem:[#allocation2 + $0x68] sm:$0xff] %vm358_vm1, %v451_v43  ;;  %v606_v13 = vadd.f32 %v590_v50, %v566_v32 }
 0x104   : > { %v711_v24 = vld [vmem:[#allocation2 + $0x58] sm:$0xff]  ;;  %913 = vst.msk [vmem:[%s3806_s12 + $0x40] sm:$0xff] %vm358_vm1, %v897_v27  ;;  %v810_v59 = vpop.f32.mrf.mxu3 }
 0x105   : > { %622 = vst.msk [vmem:[#allocation2 + $0x60] sm:$0xff] %vm358_vm1, %v606_v13  ;;  %v727_v51 = vadd.f32 %v711_v24, %v685_v29  ;;  %2901 = vmatmul.msk.f32.gmra.mxu0 %vm358_vm1, %v3627_v63  ;;  %v569_v58 = vpop.f32.mrf.mxu1  ;;  %2937 = vmatmul.msk.f32.gmra.mxu2 %vm358_vm1, %v3676_v17  ;;  %v341_v13 = vrot.slane %v3700_v34, 2 }
 0x106   : > { %v832_v6 = vld [vmem:[#allocation2 + $0x50] sm:$0xff] }
 0x107   : > { %743 = vst.msk [vmem:[#allocation2 + $0x58] sm:$0xff] %vm358_vm1, %v727_v51  ;;  %v848_v12 = vadd.f32 %v832_v6, %v804_v10  ;;  %v3098_v10 = vld [vmem:[%s4829_s1 + $0x38] sm:$0xf]  ;;  %v3116_v6 = vld [vmem:[%s4829_s1 + $0x3c] sm:$0xf]  ;;  %v4028_v18 = vsel %vm289_vm3, %v339_v7, %v341_v13 }
 0x108   : > { %2919 = vmatmul.msk.f32.gmra.mxu1 %vm358_vm1, %v3934_v61  ;;  %v691_v29 = vpop.f32.mrf.mxu2  ;;  %v879_v62 = vld [vmem:[#allocation2 + $0x48] sm:$0xff]  ;;  %3099 = vmatpush.msk.msrb.mxu2 %vm391_vm0, %v3098_v10  ;;  %v3219_v13 = vld [vmem:[%s3409_s10 + $0x38] sm:$0xff] }
 0x109   : > { %864 = vst.msk [vmem:[#allocation2 + $0x50] sm:$0xff] %vm358_vm1, %v848_v12  ;;  %v898_v14 = vadd.f32 %v3792_v8, %v879_v62  ;;  %2955 = vmatmul.msk.f32.gmra.mxu3 %vm358_vm1, %v3977_v11 }
 0x10a   : > { %v454_v2 = vpop.f32.mrf.mxu0  ;;  %v591_v3 = vld [vmem:[#allocation2 + $0x68] sm:$0xff]  ;;  %3117 = vmatpush.msk.msrb.mxu3 %vm391_vm0, %v3116_v6 }
 0x10b   : > { %474 = vst.msk [vmem:[#allocation2 + $0x70] sm:$0xff] %vm358_vm1, %v454_v2  ;;  %v607_v37 = vadd.f32 %v591_v3, %v569_v58 }
 0x10c   : > { %v712_v33 = vld [vmem:[#allocation2 + $0x60] sm:$0xff]  ;;  %914 = vst.msk [vmem:[%s3806_s12 + $0x48] sm:$0xff] %vm358_vm1, %v898_v14  ;;  %v813_v1 = vpop.f32.mrf.mxu3 }
 0x10d   : > { %623 = vst.msk [vmem:[#allocation2 + $0x68] sm:$0xff] %vm358_vm1, %v607_v37  ;;  %v728_v32 = vadd.f32 %v712_v33, %v688_v26  ;;  %2902 = vmatmul.msk.f32.gmra.mxu0 %vm358_vm1, %v3650_v5  ;;  %v572_v49 = vpop.f32.mrf.mxu1  ;;  %2938 = vmatmul.msk.f32.gmra.mxu2 %vm358_vm1, %v3695_v30 }
 0x10e   : > { %v833_v57 = vld [vmem:[#allocation2 + $0x58] sm:$0xff] }
 0x10f   : > { %744 = vst.msk [vmem:[#allocation2 + $0x60] sm:$0xff] %vm358_vm1, %v728_v32  ;;  %v849_v21 = vadd.f32 %v833_v57, %v807_v38 }
 0x110   : > { %2920 = vmatmul.msk.f32.gmra.mxu1 %vm358_vm1, %v3954_v0  ;;  %v694_v26 = vpop.f32.mrf.mxu2  ;;  %v880_v46 = vld [vmem:[#allocation2 + $0x50] sm:$0xff] }
 0x111   : > { %865 = vst.msk [vmem:[#allocation2 + $0x58] sm:$0xff] %vm358_vm1, %v849_v21  ;;  %v899_v27 = vadd.f32 %v3792_v8, %v880_v46  ;;  %2956 = vmatmul.msk.f32.gmra.mxu3 %vm358_vm1, %v4005_v19 }
 0x112   : > { %v457_v43 = vpop.f32.mrf.mxu0  ;;  %v592_v50 = vld [vmem:[#allocation2 + $0x70] sm:$0xff] }
 0x113   : > { %475 = vst.msk [vmem:[#allocation2 + $0x78] sm:$0xff] %vm358_vm1, %v457_v43  ;;  %v608_v38 = vadd.f32 %v592_v50, %v572_v49  ;;  %v3218_v50 = vld [vmem:[%s3409_s10 + $0x20] sm:$0xff] }
 0x114   : > { %v713_v41 = vld [vmem:[#allocation2 + $0x68] sm:$0xff]  ;;  %915 = vst.msk [vmem:[%s3806_s12 + $0x50] sm:$0xff] %vm358_vm1, %v899_v27  ;;  %v816_v58 = vpop.f32.mrf.mxu3 }
 0x115   : > { %624 = vst.msk [vmem:[#allocation2 + $0x70] sm:$0xff] %vm358_vm1, %v608_v38  ;;  %v729_v24 = vadd.f32 %v713_v41, %v691_v29  ;;  %2903 = vmatmul.msk.f32.gmra.mxu0 %vm358_vm1, %v3676_v17  ;;  %v575_v51 = vpop.f32.mrf.mxu1  ;;  %2939 = vmatmul.msk.f32.gmra.mxu2 %vm358_vm1, %v3714_v42 }
 0x116   : > { %v834_v12 = vld [vmem:[#allocation2 + $0x60] sm:$0xff] }
 0x117   : > { %745 = vst.msk [vmem:[#allocation2 + $0x68] sm:$0xff] %vm358_vm1, %v729_v24  ;;  %v850_v34 = vadd.f32 %v834_v12, %v810_v59 }
 0x118   : > { %2921 = vmatmul.msk.f32.gmra.mxu1 %vm358_vm1, %v3977_v11  ;;  %v697_v29 = vpop.f32.mrf.mxu2  ;;  %v881_v62 = vld [vmem:[#allocation2 + $0x58] sm:$0xff] }
 0x119   : > { %866 = vst.msk [vmem:[#allocation2 + $0x60] sm:$0xff] %vm358_vm1, %v850_v34  ;;  %v900_v10 = vadd.f32 %v3792_v8, %v881_v62  ;;  %2957 = vmatmul.msk.f32.gmra.mxu3 %vm358_vm1, %v4028_v18 }
 0x11a   : > { %v593_v14 = vld [vmem:[#allocation2 + $0x78] sm:$0xff]  ;;  %v943_v2 = vpop.f32.mrf.mxu0 }
 0x11b   : > { %v609_v3 = vadd.f32 %v593_v14, %v575_v51  ;;  %991 = vst.msk [vmem:[#allocation2] sm:$0xff] %vm358_vm1, %v943_v2  ;;  %v3220_v2 = vld [vmem:[%s3409_s10 + $0x30] sm:$0xff] }
 0x11c   : > { %v714_v59 = vld [vmem:[#allocation2 + $0x70] sm:$0xff]  ;;  %916 = vst.msk [vmem:[%s3806_s12 + $0x58] sm:$0xff] %vm358_vm1, %v900_v10  ;;  %v819_v33 = vpop.f32.mrf.mxu3 }
 0x11d   : > { %625 = vst.msk [vmem:[#allocation2 + $0x78] sm:$0xff] %vm358_vm1, %v609_v3  ;;  %v730_v37 = vadd.f32 %v714_v59, %v694_v26  ;;  %2976 = vmatmul.msk.f32.vlgmr.msra.gmra.mxu0 %vm358_vm1, %v3217_v22  ;;  %v1061_v7 = vpop.f32.mrf.mxu1  ;;  %3012 = vmatmul.msk.f32.vlgmr.msra.gmra.mxu2 %vm358_vm1, %v3465_v25  ;;  %v3221_v59 = vld [vmem:[%s3409_s10 + $0x48] sm:$0xff] }
 0x11e   : > { %v835_v32 = vld [vmem:[#allocation2 + $0x68] sm:$0xff] }
 0x11f   : > { %746 = vst.msk [vmem:[#allocation2 + $0x70] sm:$0xff] %vm358_vm1, %v730_v37  ;;  %v851_v49 = vadd.f32 %v835_v32, %v813_v1 }
 0x120   : > { %2994 = vmatmul.msk.f32.vlgmr.msra.gmra.mxu1 %vm358_vm1, %v3444_v20  ;;  %v1179_v57 = vpop.f32.mrf.mxu2  ;;  %v882_v21 = vld [vmem:[#allocation2 + $0x60] sm:$0xff] }
 0x121   : > { %867 = vst.msk [vmem:[#allocation2 + $0x68] sm:$0xff] %vm358_vm1, %v851_v49  ;;  %v901_v26 = vadd.f32 %v3792_v8, %v882_v21  ;;  %3030 = vmatmul.msk.f32.vlgmr.msra.gmra.mxu3 %vm358_vm1, %v3476_v28 }
 0x122   : > { %v946_v46 = vpop.f32.mrf.mxu0  ;;  %v1109_v27 = vld [vmem:[#allocation2] sm:$0xff] }
 0x123   : > { %992 = vst.msk [vmem:[#allocation2 + $0x8] sm:$0xff] %vm358_vm1, %v946_v46  ;;  %v1125_v25 = vadd.f32 %v1109_v27, %v1061_v7 }
 0x124   : > { %v715_v43 = vld [vmem:[#allocation2 + $0x78] sm:$0xff]  ;;  %917 = vst.msk [vmem:[%s3806_s12 + $0x60] sm:$0xff] %vm358_vm1, %v901_v26  ;;  %v1301_v41 = vpop.f32.mrf.mxu3 }
 0x125   : > { %1141 = vst.msk [vmem:[#allocation2] sm:$0xff] %vm358_vm1, %v1125_v25  ;;  %v731_v1 = vadd.f32 %v715_v43, %v697_v29  ;;  %2977 = vmatmul.msk.f32.gmra.mxu0 %vm358_vm1, %v3218_v50  ;;  %v1064_v38 = vpop.f32.mrf.mxu1  ;;  %3013 = vmatmul.msk.f32.gmra.mxu2 %vm358_vm1, %v3219_v13  ;;  %v3222_v43 = vld [vmem:[%s3409_s10 + $0x50] sm:$0xff] }
 0x126   : > { %v836_v24 = vld [vmem:[#allocation2 + $0x70] sm:$0xff] }
 0x127   : > { %747 = vst.msk [vmem:[#allocation2 + $0x78] sm:$0xff] %vm358_vm1, %v731_v1  ;;  %v852_v51 = vadd.f32 %v836_v24, %v816_v58 }
 0x128   : > { %2995 = vmatmul.msk.f32.gmra.mxu1 %vm358_vm1, %v3457_v23  ;;  %v1182_v6 = vpop.f32.mrf.mxu2  ;;  %v883_v12 = vld [vmem:[#allocation2 + $0x68] sm:$0xff] }
 0x129   : > { %868 = vst.msk [vmem:[#allocation2 + $0x70] sm:$0xff] %vm358_vm1, %v852_v51  ;;  %v902_v34 = vadd.f32 %v3792_v8, %v883_v12  ;;  %3031 = vmatmul.msk.f32.gmra.mxu3 %vm358_vm1, %v3491_v31 }
 0x12a   : > { %v949_v29 = vpop.f32.mrf.mxu0  ;;  %v1110_v62 = vld [vmem:[#allocation2 + $0x8] sm:$0xff] }
 0x12b   : > { %993 = vst.msk [vmem:[#allocation2 + $0x10] sm:$0xff] %vm358_vm1, %v949_v29  ;;  %v1126_v10 = vadd.f32 %v1110_v62, %v1064_v38 }
 0x12c   : > { %v1227_v14 = vld [vmem:[#allocation2] sm:$0xff]  ;;  %918 = vst.msk [vmem:[%s3806_s12 + $0x68] sm:$0xff] %vm358_vm1, %v902_v34  ;;  %v1304_v37 = vpop.f32.mrf.mxu3 }
 0x12d   : > { %1142 = vst.msk [vmem:[#allocation2 + $0x8] sm:$0xff] %vm358_vm1, %v1126_v10  ;;  %v1243_v58 = vadd.f32 %v1227_v14, %v1179_v57  ;;  %2978 = vmatmul.msk.f32.gmra.mxu0 %vm358_vm1, %v3220_v2  ;;  %v1067_v3 = vpop.f32.mrf.mxu1  ;;  %3014 = vmatmul.msk.f32.gmra.mxu2 %vm358_vm1, %v3221_v59  ;;  %v3223_v10 = vld [vmem:[%s3409_s10 + $0x60] sm:$0xff] }
 0x12e   : > { %v837_v22 = vld [vmem:[#allocation2 + $0x78] sm:$0xff] }
 0x12f   : > { %1259 = vst.msk [vmem:[#allocation2] sm:$0xff] %vm358_vm1, %v1243_v58  ;;  %v853_v7 = vadd.f32 %v837_v22, %v819_v33 }
 0x130   : > { %2996 = vmatmul.msk.f32.gmra.mxu1 %vm358_vm1, %v3476_v28  ;;  %v1185_v32 = vpop.f32.mrf.mxu2  ;;  %v884_v49 = vld [vmem:[#allocation2 + $0x70] sm:$0xff] }
 0x131   : > { %869 = vst.msk [vmem:[#allocation2 + $0x78] sm:$0xff] %vm358_vm1, %v853_v7  ;;  %v903_v57 = vadd.f32 %v3792_v8, %v884_v49  ;;  %3032 = vmatmul.msk.f32.gmra.mxu3 %vm358_vm1, %v3510_v36 }
 0x132   : > { %v952_v21 = vpop.f32.mrf.mxu0  ;;  %v1111_v26 = vld [vmem:[#allocation2 + $0x10] sm:$0xff] }
 0x133   : > { %994 = vst.msk [vmem:[#allocation2 + $0x18] sm:$0xff] %vm358_vm1, %v952_v21  ;;  %v1127_v46 = vadd.f32 %v1111_v26, %v1067_v3  ;;  %v3224_v26 = vld [vmem:[%s3409_s10 + $0x68] sm:$0xff] }
 0x134   : > { %v1228_v27 = vld [vmem:[#allocation2 + $0x8] sm:$0xff]  ;;  %919 = vst.msk [vmem:[%s3806_s12 + $0x70] sm:$0xff] %vm358_vm1, %v903_v57  ;;  %v1307_v1 = vpop.f32.mrf.mxu3 }
 0x135   : > { %1143 = vst.msk [vmem:[#allocation2 + $0x10] sm:$0xff] %vm358_vm1, %v1127_v46  ;;  %v1244_v33 = vadd.f32 %v1228_v27, %v1182_v6  ;;  %2979 = vmatmul.msk.f32.gmra.mxu0 %vm358_vm1, %v3219_v13  ;;  %v1070_v25 = vpop.f32.mrf.mxu1  ;;  %3015 = vmatmul.msk.f32.gmra.mxu2 %vm358_vm1, %v3222_v43 }
 0x136   : > { %v1349_v50 = vld [vmem:[#allocation2] sm:$0xff] }
 0x137   : > { %1260 = vst.msk [vmem:[#allocation2 + $0x8] sm:$0xff] %vm358_vm1, %v1244_v33  ;;  %v1365_v38 = vadd.f32 %v1349_v50, %v1301_v41 }
 0x138   : > { %2997 = vmatmul.msk.f32.gmra.mxu1 %vm358_vm1, %v3491_v31  ;;  %v1188_v24 = vpop.f32.mrf.mxu2  ;;  %v885_v51 = vld [vmem:[#allocation2 + $0x78] sm:$0xff] }
 0x139   : > { %1381 = vst.msk [vmem:[#allocation2] sm:$0xff] %vm358_vm1, %v1365_v38  ;;  %v904_v13 = vadd.f32 %v3792_v8, %v885_v51  ;;  %3033 = vmatmul.msk.f32.gmra.mxu3 %vm358_vm1, %v3525_v39 }
 0x13a   : > { %v955_v6 = vpop.f32.mrf.mxu0  ;;  %v1112_v12 = vld [vmem:[#allocation2 + $0x18] sm:$0xff] }
 0x13b   : > { %995 = vst.msk [vmem:[#allocation2 + $0x20] sm:$0xff] %vm358_vm1, %v955_v6  ;;  %v1128_v34 = vadd.f32 %v1112_v12, %v1070_v25  ;;  %v3225_v12 = vld [vmem:[%s3409_s10 + $0x78] sm:$0xff] }
 0x13c   : > { %v1229_v29 = vld [vmem:[#allocation2 + $0x10] sm:$0xff]  ;;  %920 = vst.msk [vmem:[%s3806_s12 + $0x78] sm:$0xff] %vm358_vm1, %v904_v13  ;;  %v1310_v14 = vpop.f32.mrf.mxu3 }
 0x13d   : > { %1144 = vst.msk [vmem:[#allocation2 + $0x18] sm:$0xff] %vm358_vm1, %v1128_v34  ;;  %v1245_v41 = vadd.f32 %v1229_v29, %v1185_v32  ;;  %2980 = vmatmul.msk.f32.gmra.mxu0 %vm358_vm1, %v3221_v59  ;;  %v1073_v62 = vpop.f32.mrf.mxu1  ;;  %3016 = vmatmul.msk.f32.gmra.mxu2 %vm358_vm1, %v3223_v10 }
 0x13e   : > { %v1350_v58 = vld [vmem:[#allocation2 + $0x8] sm:$0xff] }
 0x13f   : > { %1261 = vst.msk [vmem:[#allocation2 + $0x10] sm:$0xff] %vm358_vm1, %v1245_v41  ;;  %v1366_v2 = vadd.f32 %v1350_v58, %v1304_v37 }
 0x140   : > { %2998 = vmatmul.msk.f32.gmra.mxu1 %vm358_vm1, %v3510_v36  ;;  %v1191_v3 = vpop.f32.mrf.mxu2  ;;  %v1397_v22 = vld [vmem:[#allocation2] sm:$0xff] }
 0x141   : > { %1382 = vst.msk [vmem:[#allocation2 + $0x8] sm:$0xff] %vm358_vm1, %v1366_v2  ;;  %v1413_v59 = vadd.f32 %v3792_v8, %v1397_v22  ;;  %3034 = vmatmul.msk.f32.gmra.mxu3 %vm358_vm1, %v3544_v44 }
 0x142   : > { %v958_v7 = vpop.f32.mrf.mxu0  ;;  %v1113_v32 = vld [vmem:[#allocation2 + $0x20] sm:$0xff] }
 0x143   : > { %996 = vst.msk [vmem:[#allocation2 + $0x28] sm:$0xff] %vm358_vm1, %v958_v7  ;;  %v1129_v49 = vadd.f32 %v1113_v32, %v1073_v62  ;;  %v3226_v32 = vld [vmem:[%s3409_s10 + $0x80] sm:$0xff] }
 0x144   : > { %v1230_v57 = vld [vmem:[#allocation2 + $0x18] sm:$0xff]  ;;  %2958 = vst.msk [vmem:[%s3806_s12 + $0x80] sm:$0xff] %vm358_vm1, %v1413_v59  ;;  %v1313_v46 = vpop.f32.mrf.mxu3 }
 0x145   : > { %1145 = vst.msk [vmem:[#allocation2 + $0x20] sm:$0xff] %vm358_vm1, %v1129_v49  ;;  %v1246_v37 = vadd.f32 %v1230_v57, %v1188_v24  ;;  %2981 = vmatmul.msk.f32.gmra.mxu0 %vm358_vm1, %v3222_v43  ;;  %v1076_v21 = vpop.f32.mrf.mxu1  ;;  %3017 = vmatmul.msk.f32.gmra.mxu2 %vm358_vm1, %v3224_v26 }
 0x146   : > { %v1351_v27 = vld [vmem:[#allocation2 + $0x10] sm:$0xff] }
 0x147   : > { %1262 = vst.msk [vmem:[#allocation2 + $0x18] sm:$0xff] %vm358_vm1, %v1246_v37  ;;  %v1367_v33 = vadd.f32 %v1351_v27, %v1307_v1 }
 0x148   : > { %2999 = vmatmul.msk.f32.gmra.mxu1 %vm358_vm1, %v3525_v39  ;;  %v1194_v25 = vpop.f32.mrf.mxu2  ;;  %v1398_v50 = vld [vmem:[#allocation2 + $0x8] sm:$0xff] }
 0x149   : > { %1383 = vst.msk [vmem:[#allocation2 + $0x10] sm:$0xff] %vm358_vm1, %v1367_v33  ;;  %v1414_v43 = vadd.f32 %v3792_v8, %v1398_v50  ;;  %3035 = vmatmul.msk.f32.gmra.mxu3 %vm358_vm1, %v3559_v47 }
 0x14a   : > { %v961_v38 = vpop.f32.mrf.mxu0  ;;  %v1114_v24 = vld [vmem:[#allocation2 + $0x28] sm:$0xff] }
 0x14b   : > { %997 = vst.msk [vmem:[#allocation2 + $0x30] sm:$0xff] %vm358_vm1, %v961_v38  ;;  %v1130_v51 = vadd.f32 %v1114_v24, %v1076_v21  ;;  %v3227_v24 = vld [vmem:[%s3409_s10 + $0x90] sm:$0xff] }
 0x14c   : > { %v1231_v13 = vld [vmem:[#allocation2 + $0x20] sm:$0xff]  ;;  %2959 = vst.msk [vmem:[%s3806_s12 + $0x88] sm:$0xff] %vm358_vm1, %v1414_v43  ;;  %v1316_v34 = vpop.f32.mrf.mxu3 }
 0x14d   : > { %1146 = vst.msk [vmem:[#allocation2 + $0x28] sm:$0xff] %vm358_vm1, %v1130_v51  ;;  %v1247_v1 = vadd.f32 %v1231_v13, %v1191_v3  ;;  %2982 = vmatmul.msk.f32.gmra.mxu0 %vm358_vm1, %v3223_v10  ;;  %v1079_v6 = vpop.f32.mrf.mxu1  ;;  %3018 = vmatmul.msk.f32.gmra.mxu2 %vm358_vm1, %v3225_v12 }
 0x14e   : > { %v1352_v29 = vld [vmem:[#allocation2 + $0x18] sm:$0xff] }
 0x14f   : > { %1263 = vst.msk [vmem:[#allocation2 + $0x20] sm:$0xff] %vm358_vm1, %v1247_v1  ;;  %v1368_v41 = vadd.f32 %v1352_v29, %v1310_v14 }
 0x150   : > { %3000 = vmatmul.msk.f32.gmra.mxu1 %vm358_vm1, %v3544_v44  ;;  %v1197_v62 = vpop.f32.mrf.mxu2  ;;  %v1399_v58 = vld [vmem:[#allocation2 + $0x10] sm:$0xff] }
 0x151   : > { %1384 = vst.msk [vmem:[#allocation2 + $0x18] sm:$0xff] %vm358_vm1, %v1368_v41  ;;  %v1415_v10 = vadd.f32 %v3792_v8, %v1399_v58  ;;  %3036 = vmatmul.msk.f32.gmra.mxu3 %vm358_vm1, %v3578_v52 }
 0x152   : > { %v964_v2 = vpop.f32.mrf.mxu0  ;;  %v1115_v3 = vld [vmem:[#allocation2 + $0x30] sm:$0xff] }
 0x153   : > { %998 = vst.msk [vmem:[#allocation2 + $0x38] sm:$0xff] %vm358_vm1, %v964_v2  ;;  %v1131_v22 = vadd.f32 %v1115_v3, %v1079_v6  ;;  %v3228_v3 = vld [vmem:[%s3409_s10 + $0x98] sm:$0xff] }
 0x154   : > { %v1232_v59 = vld [vmem:[#allocation2 + $0x28] sm:$0xff]  ;;  %2960 = vst.msk [vmem:[%s3806_s12 + $0x90] sm:$0xff] %vm358_vm1, %v1415_v10  ;;  %v1319_v49 = vpop.f32.mrf.mxu3 }
 0x155   : > { %1147 = vst.msk [vmem:[#allocation2 + $0x30] sm:$0xff] %vm358_vm1, %v1131_v22  ;;  %v1248_v14 = vadd.f32 %v1232_v59, %v1194_v25  ;;  %2983 = vmatmul.msk.f32.gmra.mxu0 %vm358_vm1, %v3224_v26  ;;  %v1082_v7 = vpop.f32.mrf.mxu1  ;;  %3019 = vmatmul.msk.f32.gmra.mxu2 %vm358_vm1, %v3226_v32 }
 0x156   : > { %v1353_v57 = vld [vmem:[#allocation2 + $0x20] sm:$0xff] }
 0x157   : > { %1264 = vst.msk [vmem:[#allocation2 + $0x28] sm:$0xff] %vm358_vm1, %v1248_v14  ;;  %v1369_v37 = vadd.f32 %v1353_v57, %v1313_v46 }
 0x158   : > { %3001 = vmatmul.msk.f32.gmra.mxu1 %vm358_vm1, %v3559_v47  ;;  %v1200_v21 = vpop.f32.mrf.mxu2  ;;  %v1400_v27 = vld [vmem:[#allocation2 + $0x18] sm:$0xff] }
 0x159   : > { %1385 = vst.msk [vmem:[#allocation2 + $0x20] sm:$0xff] %vm358_vm1, %v1369_v37  ;;  %v1416_v26 = vadd.f32 %v3792_v8, %v1400_v27  ;;  %3037 = vmatmul.msk.f32.gmra.mxu3 %vm358_vm1, %v3593_v55 }
 0x15a   : > { %v967_v33 = vpop.f32.mrf.mxu0  ;;  %v1116_v25 = vld [vmem:[#allocation2 + $0x38] sm:$0xff] }
 0x15b   : > { %999 = vst.msk [vmem:[#allocation2 + $0x40] sm:$0xff] %vm358_vm1, %v967_v33  ;;  %v1132_v50 = vadd.f32 %v1116_v25, %v1082_v7  ;;  %v3229_v25 = vld [vmem:[%s3409_s10 + $0xa8] sm:$0xff] }
 0x15c   : > { %v1233_v43 = vld [vmem:[#allocation2 + $0x30] sm:$0xff]  ;;  %2961 = vst.msk [vmem:[%s3806_s12 + $0x98] sm:$0xff] %vm358_vm1, %v1416_v26  ;;  %v1322_v51 = vpop.f32.mrf.mxu3 }
 0x15d   : > { %1148 = vst.msk [vmem:[#allocation2 + $0x38] sm:$0xff] %vm358_vm1, %v1132_v50  ;;  %v1249_v46 = vadd.f32 %v1233_v43, %v1197_v62  ;;  %2984 = vmatmul.msk.f32.gmra.mxu0 %vm358_vm1, %v3225_v12  ;;  %v1085_v38 = vpop.f32.mrf.mxu1  ;;  %3020 = vmatmul.msk.f32.gmra.mxu2 %vm358_vm1, %v3227_v24 }
 0x15e   : > { %v1354_v13 = vld [vmem:[#allocation2 + $0x28] sm:$0xff] }
 0x15f   : > { %1265 = vst.msk [vmem:[#allocation2 + $0x30] sm:$0xff] %vm358_vm1, %v1249_v46  ;;  %v1370_v1 = vadd.f32 %v1354_v13, %v1316_v34 }
 0x160   : > { %3002 = vmatmul.msk.f32.gmra.mxu1 %vm358_vm1, %v3578_v52  ;;  %v1203_v6 = vpop.f32.mrf.mxu2  ;;  %v1401_v29 = vld [vmem:[#allocation2 + $0x20] sm:$0xff] }
 0x161   : > { %1386 = vst.msk [vmem:[#allocation2 + $0x28] sm:$0xff] %vm358_vm1, %v1370_v1  ;;  %v1417_v12 = vadd.f32 %v3792_v8, %v1401_v29  ;;  %3038 = vmatmul.msk.f32.gmra.mxu3 %vm358_vm1, %v3612_v60 }
 0x162   : > { %v970_v41 = vpop.f32.mrf.mxu0  ;;  %v1117_v62 = vld [vmem:[#allocation2 + $0x40] sm:$0xff] }
 0x163   : > { %1000 = vst.msk [vmem:[#allocation2 + $0x48] sm:$0xff] %vm358_vm1, %v970_v41  ;;  %v1133_v58 = vadd.f32 %v1117_v62, %v1085_v38  ;;  %v3230_v62 = vld [vmem:[%s3409_s10 + $0xb0] sm:$0xff] }
 0x164   : > { %v1234_v10 = vld [vmem:[#allocation2 + $0x38] sm:$0xff]  ;;  %2962 = vst.msk [vmem:[%s3806_s12 + $0xa0] sm:$0xff] %vm358_vm1, %v1417_v12  ;;  %v1325_v22 = vpop.f32.mrf.mxu3 }
 0x165   : > { %1149 = vst.msk [vmem:[#allocation2 + $0x40] sm:$0xff] %vm358_vm1, %v1133_v58  ;;  %v1250_v34 = vadd.f32 %v1234_v10, %v1200_v21  ;;  %2985 = vmatmul.msk.f32.gmra.mxu0 %vm358_vm1, %v3226_v32  ;;  %v1088_v2 = vpop.f32.mrf.mxu1  ;;  %3021 = vmatmul.msk.f32.gmra.mxu2 %vm358_vm1, %v3228_v3 }
 0x166   : > { %v1355_v59 = vld [vmem:[#allocation2 + $0x30] sm:$0xff] }
 0x167   : > { %1266 = vst.msk [vmem:[#allocation2 + $0x38] sm:$0xff] %vm358_vm1, %v1250_v34  ;;  %v1371_v14 = vadd.f32 %v1355_v59, %v1319_v49 }
 0x168   : > { %3003 = vmatmul.msk.f32.gmra.mxu1 %vm358_vm1, %v3593_v55  ;;  %v1206_v7 = vpop.f32.mrf.mxu2  ;;  %v1402_v57 = vld [vmem:[#allocation2 + $0x28] sm:$0xff] }
 0x169   : > { %1387 = vst.msk [vmem:[#allocation2 + $0x30] sm:$0xff] %vm358_vm1, %v1371_v14  ;;  %v1418_v32 = vadd.f32 %v3792_v8, %v1402_v57  ;;  %3039 = vmatmul.msk.f32.gmra.mxu3 %vm358_vm1, %v3627_v63 }
 0x16a   : > { %v973_v37 = vpop.f32.mrf.mxu0  ;;  %v1118_v21 = vld [vmem:[#allocation2 + $0x48] sm:$0xff] }
 0x16b   : > { %1001 = vst.msk [vmem:[#allocation2 + $0x50] sm:$0xff] %vm358_vm1, %v973_v37  ;;  %v1134_v27 = vadd.f32 %v1118_v21, %v1088_v2  ;;  %v3232_v21 = vld [vmem:[%s3409_s10 + $0xc0] sm:$0xff] }
 0x16c   : > { %v1235_v26 = vld [vmem:[#allocation2 + $0x40] sm:$0xff]  ;;  %2963 = vst.msk [vmem:[%s3806_s12 + $0xa8] sm:$0xff] %vm358_vm1, %v1418_v32  ;;  %v1328_v50 = vpop.f32.mrf.mxu3 }
 0x16d   : > { %1150 = vst.msk [vmem:[#allocation2 + $0x48] sm:$0xff] %vm358_vm1, %v1134_v27  ;;  %v1251_v49 = vadd.f32 %v1235_v26, %v1203_v6  ;;  %2986 = vmatmul.msk.f32.gmra.mxu0 %vm358_vm1, %v3227_v24  ;;  %v1091_v33 = vpop.f32.mrf.mxu1  ;;  %3022 = vmatmul.msk.f32.gmra.mxu2 %vm358_vm1, %v3229_v25 }
 0x16e   : > { %v1356_v43 = vld [vmem:[#allocation2 + $0x38] sm:$0xff] }
 0x16f   : > { %1267 = vst.msk [vmem:[#allocation2 + $0x40] sm:$0xff] %vm358_vm1, %v1251_v49  ;;  %v1372_v46 = vadd.f32 %v1356_v43, %v1322_v51 }
 0x170   : > { %3004 = vmatmul.msk.f32.gmra.mxu1 %vm358_vm1, %v3612_v60  ;;  %v1209_v38 = vpop.f32.mrf.mxu2  ;;  %v1403_v13 = vld [vmem:[#allocation2 + $0x30] sm:$0xff] }
 0x171   : > { %1388 = vst.msk [vmem:[#allocation2 + $0x38] sm:$0xff] %vm358_vm1, %v1372_v46  ;;  %v1419_v24 = vadd.f32 %v3792_v8, %v1403_v13  ;;  %3040 = vmatmul.msk.f32.gmra.mxu3 %vm358_vm1, %v3650_v5 }
 0x172   : > { %v976_v1 = vpop.f32.mrf.mxu0  ;;  %v1119_v6 = vld [vmem:[#allocation2 + $0x50] sm:$0xff] }
 0x173   : > { %1002 = vst.msk [vmem:[#allocation2 + $0x58] sm:$0xff] %vm358_vm1, %v976_v1  ;;  %v1135_v29 = vadd.f32 %v1119_v6, %v1091_v33  ;;  %v3233_v6 = vld [vmem:[%s3409_s10 + $0xc8] sm:$0xff] }
 0x174   : > { %v1236_v12 = vld [vmem:[#allocation2 + $0x48] sm:$0xff]  ;;  %2964 = vst.msk [vmem:[%s3806_s12 + $0xb0] sm:$0xff] %vm358_vm1, %v1419_v24  ;;  %v1331_v8 = vpop.f32.mrf.mxu3 }
 0x175   : > { %1151 = vst.msk [vmem:[#allocation2 + $0x50] sm:$0xff] %vm358_vm1, %v1135_v29  ;;  %v1252_v51 = vadd.f32 %v1236_v12, %v1206_v7  ;;  %2987 = vmatmul.msk.f32.gmra.mxu0 %vm358_vm1, %v3228_v3  ;;  %v1094_v41 = vpop.f32.mrf.mxu1  ;;  %3023 = vmatmul.msk.f32.gmra.mxu2 %vm358_vm1, %v3230_v62  ;;  %v4207_v3 = vld [vmem:[%s4830_s2] ss:$0 sm:$0xff] }
 0x176   : > { %v1357_v58 = vld [vmem:[#allocation2 + $0x40] sm:$0xff] }
 0x177   : > { %1268 = vst.msk [vmem:[#allocation2 + $0x48] sm:$0xff] %vm358_vm1, %v1252_v51  ;;  %v1373_v10 = vadd.f32 %v1357_v58, %v1325_v22  ;;  %v4237_v58 = vld [vmem:[%s3409_s10 + $0xe0] sm:$0xff] }
 0x178   : > { %3005 = vmatmul.msk.f32.gmra.mxu1 %vm358_vm1, %v3627_v63  ;;  %v1212_v34 = vpop.f32.mrf.mxu2  ;;  %v1404_v2 = vld [vmem:[#allocation2 + $0x38] sm:$0xff] }
 0x179   : > { %1389 = vst.msk [vmem:[#allocation2 + $0x40] sm:$0xff] %vm358_vm1, %v1373_v10  ;;  %v1420_v59 = vadd.f32 %v4207_v3, %v1404_v2  ;;  %3041 = vmatmul.msk.f32.gmra.mxu3 %vm358_vm1, %v3676_v17 }
 0x17a   : > { %v979_v14 = vpop.f32.mrf.mxu0  ;;  %v1120_v7 = vld [vmem:[#allocation2 + $0x58] sm:$0xff] }
 0x17b   : > { %1003 = vst.msk [vmem:[#allocation2 + $0x60] sm:$0xff] %vm358_vm1, %v979_v14  ;;  %v1136_v22 = vadd.f32 %v1120_v7, %v1094_v41  ;;  %v347_v7 = vrot.slane %v4237_v58, 1 }
 0x17c   : > { %v1237_v57 = vld [vmem:[#allocation2 + $0x50] sm:$0xff]  ;;  %2965 = vst.msk [vmem:[%s3806_s12 + $0xb8] sm:$0xff] %vm358_vm1, %v1420_v59  ;;  %v1334_v27 = vpop.f32.mrf.mxu3  ;;  %v4242_v59 = vld [vmem:[%s3409_s10 + $0xd8] sm:$0xff] }
 0x17d   : > { %1152 = vst.msk [vmem:[#allocation2 + $0x58] sm:$0xff] %vm358_vm1, %v1136_v22  ;;  %v1253_v32 = vadd.f32 %v1237_v57, %v1209_v38  ;;  %2988 = vmatmul.msk.f32.gmra.mxu0 %vm358_vm1, %v3229_v25  ;;  %v1097_v37 = vpop.f32.mrf.mxu1  ;;  %3024 = vmatmul.msk.f32.gmra.mxu2 %vm358_vm1, %v3232_v21  ;;  %v346_v14 = vrot.slane %v4242_v59, 1 }
 0x17e   : > { %v1358_v26 = vld [vmem:[#allocation2 + $0x48] sm:$0xff] }
 0x17f   : > { %1269 = vst.msk [vmem:[#allocation2 + $0x50] sm:$0xff] %vm358_vm1, %v1253_v32  ;;  %v1374_v49 = vadd.f32 %v1358_v26, %v1328_v50 }
 0x180   : > { %3006 = vmatmul.msk.f32.gmra.mxu1 %vm358_vm1, %v3650_v5  ;;  %v1215_v33 = vpop.f32.mrf.mxu2  ;;  %v1405_v43 = vld [vmem:[#allocation2 + $0x40] sm:$0xff] }
 0x181   : > { %1390 = vst.msk [vmem:[#allocation2 + $0x48] sm:$0xff] %vm358_vm1, %v1374_v49  ;;  %v1421_v25 = vadd.f32 %v4207_v3, %v1405_v43  ;;  %3042 = vmatmul.msk.f32.gmra.mxu3 %vm358_vm1, %v3695_v30  ;;  %v4257_v43 = vsel %vm248_vm2, %v346_v14, %v347_v7 }
 0x182   : > { %v982_v46 = vpop.f32.mrf.mxu0  ;;  %v1121_v38 = vld [vmem:[#allocation2 + $0x60] sm:$0xff] }
 0x183   : > { %1004 = vst.msk [vmem:[#allocation2 + $0x68] sm:$0xff] %vm358_vm1, %v982_v46  ;;  %v1137_v13 = vadd.f32 %v1121_v38, %v1097_v37 }
 0x184   : > { %v1238_v50 = vld [vmem:[#allocation2 + $0x58] sm:$0xff]  ;;  %2966 = vst.msk [vmem:[%s3806_s12 + $0xc0] sm:$0xff] %vm358_vm1, %v1421_v25  ;;  %v1337_v29 = vpop.f32.mrf.mxu3 }
 0x185   : > { %1153 = vst.msk [vmem:[#allocation2 + $0x60] sm:$0xff] %vm358_vm1, %v1137_v13  ;;  %v1254_v24 = vadd.f32 %v1238_v50, %v1212_v34  ;;  %2989 = vmatmul.msk.f32.gmra.mxu0 %vm358_vm1, %v3230_v62  ;;  %v1100_v1 = vpop.f32.mrf.mxu1  ;;  %3025 = vmatmul.msk.f32.gmra.mxu2 %vm358_vm1, %v3233_v6 }
 0x186   : > { %v1359_v12 = vld [vmem:[#allocation2 + $0x50] sm:$0xff] }
 0x187   : > { %1270 = vst.msk [vmem:[#allocation2 + $0x58] sm:$0xff] %vm358_vm1, %v1254_v24  ;;  %v1375_v51 = vadd.f32 %v1359_v12, %v1331_v8 }
 0x188   : > { %3007 = vmatmul.msk.f32.gmra.mxu1 %vm358_vm1, %v3676_v17  ;;  %v1218_v41 = vpop.f32.mrf.mxu2  ;;  %v1406_v10 = vld [vmem:[#allocation2 + $0x48] sm:$0xff] }
 0x189   : > { %1391 = vst.msk [vmem:[#allocation2 + $0x50] sm:$0xff] %vm358_vm1, %v1375_v51  ;;  %v1422_v62 = vadd.f32 %v4207_v3, %v1406_v10  ;;  %3043 = vmatmul.msk.f32.gmra.mxu3 %vm358_vm1, %v3714_v42 }
 0x18a   : > { %v985_v34 = vpop.f32.mrf.mxu0  ;;  %v1122_v2 = vld [vmem:[#allocation2 + $0x68] sm:$0xff] }
 0x18b   : > { %1005 = vst.msk [vmem:[#allocation2 + $0x70] sm:$0xff] %vm358_vm1, %v985_v34  ;;  %v1138_v8 = vadd.f32 %v1122_v2, %v1100_v1 }
 0x18c   : > { %v1239_v22 = vld [vmem:[#allocation2 + $0x60] sm:$0xff]  ;;  %2967 = vst.msk [vmem:[%s3806_s12 + $0xc8] sm:$0xff] %vm358_vm1, %v1422_v62  ;;  %v1340_v37 = vpop.f32.mrf.mxu3 }
 0x18d   : > { %1154 = vst.msk [vmem:[#allocation2 + $0x68] sm:$0xff] %vm358_vm1, %v1138_v8  ;;  %v1255_v57 = vadd.f32 %v1239_v22, %v1215_v33  ;;  %2990 = vmatmul.msk.f32.gmra.mxu0 %vm358_vm1, %v3232_v21  ;;  %v1103_v32 = vpop.f32.mrf.mxu1  ;;  %3026 = vmatmul.msk.f32.gmra.mxu2 %vm358_vm1, %v4242_v59  ;;  %v4262_v33 = vld [vmem:[%s3409_s10 + $0xe8] sm:$0x3] }
 0x18e   : > { %v1360_v26 = vld [vmem:[#allocation2 + $0x58] sm:$0xff]  ;;  %v349_v50 = vrot.slane %v4262_v33, 1 }
 0x18f   : > { %1271 = vst.msk [vmem:[#allocation2 + $0x60] sm:$0xff] %vm358_vm1, %v1255_v57  ;;  %v1376_v49 = vadd.f32 %v1360_v26, %v1334_v27 }
 0x190   : > { %3008 = vmatmul.msk.f32.gmra.mxu1 %vm358_vm1, %v3695_v30  ;;  %v1221_v25 = vpop.f32.mrf.mxu2  ;;  %v1407_v21 = vld [vmem:[#allocation2 + $0x50] sm:$0xff]  ;;  %v4278_v34 = vsel %vm248_vm2, %v347_v7, %v349_v50 }
 0x191   : > { %1392 = vst.msk [vmem:[#allocation2 + $0x58] sm:$0xff] %vm358_vm1, %v1376_v49  ;;  %v1423_v46 = vadd.f32 %v4207_v3, %v1407_v21  ;;  %3044 = vmatmul.msk.f32.gmra.mxu3 %vm358_vm1, %v4257_v43 }
 0x192   : > { %v988_v38 = vpop.f32.mrf.mxu0  ;;  %v1123_v13 = vld [vmem:[#allocation2 + $0x70] sm:$0xff] }
 0x193   : > { %1006 = vst.msk [vmem:[#allocation2 + $0x78] sm:$0xff] %vm358_vm1, %v988_v38  ;;  %v1139_v27 = vadd.f32 %v1123_v13, %v1103_v32 }
 0x194   : > { %v1240_v24 = vld [vmem:[#allocation2 + $0x68] sm:$0xff]  ;;  %2968 = vst.msk [vmem:[%s3806_s12 + $0xd0] sm:$0xff] %vm358_vm1, %v1423_v46  ;;  %v1343_v51 = vpop.f32.mrf.mxu3 }
 0x195   : > { %1155 = vst.msk [vmem:[#allocation2 + $0x70] sm:$0xff] %vm358_vm1, %v1139_v27  ;;  %v1256_v1 = vadd.f32 %v1240_v24, %v1218_v41  ;;  %2991 = vmatmul.msk.f32.gmra.mxu0 %vm358_vm1, %v3233_v6  ;;  %v1106_v12 = vpop.f32.mrf.mxu1  ;;  %3027 = vmatmul.msk.f32.gmra.mxu2 %vm358_vm1, %v4237_v58 }
 0x196   : > { %v1361_v10 = vld [vmem:[#allocation2 + $0x60] sm:$0xff] }
 0x197   : > { %1272 = vst.msk [vmem:[#allocation2 + $0x68] sm:$0xff] %vm358_vm1, %v1256_v1  ;;  %v1377_v62 = vadd.f32 %v1361_v10, %v1337_v29 }
 0x198   : > { %3009 = vmatmul.msk.f32.gmra.mxu1 %vm358_vm1, %v3714_v42  ;;  %v1224_v2 = vpop.f32.mrf.mxu2  ;;  %v1408_v41 = vld [vmem:[#allocation2 + $0x58] sm:$0xff] }
 0x199   : > { %1393 = vst.msk [vmem:[#allocation2 + $0x60] sm:$0xff] %vm358_vm1, %v1377_v62  ;;  %v1424_v6 = vadd.f32 %v4207_v3, %v1408_v41  ;;  %3045 = vmatmul.msk.f32.gmra.mxu3 %vm358_vm1, %v4278_v34 }
 0x19a   : > { %v1124_v8 = vld [vmem:[#allocation2 + $0x78] sm:$0xff]  ;;  %v1468_v14 = vpop.f32.mrf.mxu0 }
 0x19b   : > { %v1140_v22 = vadd.f32 %v1124_v8, %v1106_v12  ;;  %1516 = vst.msk [vmem:[#allocation2] sm:$0xff] %vm358_vm1, %v1468_v14 }
 0x19c   : > { %v1241_v29 = vld [vmem:[#allocation2 + $0x70] sm:$0xff]  ;;  %2969 = vst.msk [vmem:[%s3806_s12 + $0xd8] sm:$0xff] %vm358_vm1, %v1424_v6  ;;  %v1346_v32 = vpop.f32.mrf.mxu3 }
 0x19d   : > { %1156 = vst.msk [vmem:[#allocation2 + $0x78] sm:$0xff] %vm358_vm1, %v1140_v22  ;;  %v1257_v7 = vadd.f32 %v1241_v29, %v1221_v25  ;;  %3064 = vmatmul.msk.f32.vlgmr.msrb.gmra.mxu0 %vm358_vm1, %v3444_v20  ;;  %v1554_v57 = vpop.f32.mrf.mxu1  ;;  %3100 = vmatmul.msk.f32.vlgmr.msrb.gmra.mxu2 %vm358_vm1, %v3476_v28 }
 0x19e   : > { %v1362_v26 = vld [vmem:[#allocation2 + $0x68] sm:$0xff] }
 0x19f   : > { %1273 = vst.msk [vmem:[#allocation2 + $0x70] sm:$0xff] %vm358_vm1, %v1257_v7  ;;  %v1378_v49 = vadd.f32 %v1362_v26, %v1340_v37 }
 0x1a0   : > { %3082 = vmatmul.msk.f32.vlgmr.msrb.gmra.mxu1 %vm358_vm1, %v3728_v54  ;;  %v1676_v21 = vpop.f32.mrf.mxu2  ;;  %v1409_v46 = vld [vmem:[#allocation2 + $0x60] sm:$0xff] }
 0x1a1   : > { %1394 = vst.msk [vmem:[#allocation2 + $0x68] sm:$0xff] %vm358_vm1, %v1378_v49  ;;  %v1425_v25 = vadd.f32 %v4207_v3, %v1409_v46  ;;  %3118 = vmatmul.msk.f32.vlgmr.msrb.gmra.mxu3 %vm358_vm1, %v3758_v35 }
 0x1a2   : > { %v1471_v20 = vpop.f32.mrf.mxu0  ;;  %v1602_v38 = vld [vmem:[#allocation2] sm:$0xff] }
 0x1a3   : > { %1517 = vst.msk [vmem:[#allocation2 + $0x8] sm:$0xff] %vm358_vm1, %v1471_v20  ;;  %v1618_v13 = vadd.f32 %v1602_v38, %v1554_v57 }
 0x1a4   : > { %v1242_v27 = vld [vmem:[#allocation2 + $0x78] sm:$0xff]  ;;  %2970 = vst.msk [vmem:[%s3806_s12 + $0xe0] sm:$0xff] %vm358_vm1, %v1425_v25  ;;  %v1798_v50 = vpop.f32.mrf.mxu3 }
 0x1a5   : > { %1634 = vst.msk [vmem:[#allocation2] sm:$0xff] %vm358_vm1, %v1618_v13  ;;  %v1258_v54 = vadd.f32 %v1242_v27, %v1224_v2  ;;  %3065 = vmatmul.msk.f32.gmra.mxu0 %vm358_vm1, %v3457_v23  ;;  %v1557_v37 = vpop.f32.mrf.mxu1  ;;  %3101 = vmatmul.msk.f32.gmra.mxu2 %vm358_vm1, %v3491_v31 }
 0x1a6   : > { %v1363_v24 = vld [vmem:[#allocation2 + $0x70] sm:$0xff] }
 0x1a7   : > { %1274 = vst.msk [vmem:[#allocation2 + $0x78] sm:$0xff] %vm358_vm1, %v1258_v54  ;;  %v1379_v1 = vadd.f32 %v1363_v24, %v1343_v51 }
 0x1a8   : > { %3083 = vmatmul.msk.f32.gmra.mxu1 %vm358_vm1, %v3743_v4  ;;  %v1679_v12 = vpop.f32.mrf.mxu2  ;;  %v1410_v10 = vld [vmem:[#allocation2 + $0x68] sm:$0xff] }
 0x1a9   : > { %1395 = vst.msk [vmem:[#allocation2 + $0x70] sm:$0xff] %vm358_vm1, %v1379_v1  ;;  %v1426_v62 = vadd.f32 %v4207_v3, %v1410_v10  ;;  %3119 = vmatmul.msk.f32.gmra.mxu3 %vm358_vm1, %v3773_v15 }
 0x1aa   : > { %v1474_v23 = vpop.f32.mrf.mxu0  ;;  %v1603_v2 = vld [vmem:[#allocation2 + $0x8] sm:$0xff] }
 0x1ab   : > { %1518 = vst.msk [vmem:[#allocation2 + $0x10] sm:$0xff] %vm358_vm1, %v1474_v23  ;;  %v1619_v41 = vadd.f32 %v1603_v2, %v1557_v37 }
 0x1ac   : > { %v1724_v6 = vld [vmem:[#allocation2] sm:$0xff]  ;;  %2971 = vst.msk [vmem:[%s3806_s12 + $0xe8] sm:$0xff] %vm358_vm1, %v1426_v62  ;;  %v1801_v8 = vpop.f32.mrf.mxu3 }
 0x1ad   : > { %1635 = vst.msk [vmem:[#allocation2 + $0x8] sm:$0xff] %vm358_vm1, %v1619_v41  ;;  %v1740_v4 = vadd.f32 %v1724_v6, %v1676_v21  ;;  %3066 = vmatmul.msk.f32.gmra.mxu0 %vm358_vm1, %v3476_v28  ;;  %v1560_v51 = vpop.f32.mrf.mxu1  ;;  %3102 = vmatmul.msk.f32.gmra.mxu2 %vm358_vm1, %v3510_v36 }
 0x1ae   : > { %v1364_v14 = vld [vmem:[#allocation2 + $0x78] sm:$0xff] }
 0x1af   : > { %1756 = vst.msk [vmem:[#allocation2] sm:$0xff] %vm358_vm1, %v1740_v4  ;;  %v1380_v22 = vadd.f32 %v1364_v14, %v1346_v32 }
 0x1b0   : > { %3084 = vmatmul.msk.f32.gmra.mxu1 %vm358_vm1, %v3758_v35  ;;  %v1682_v29 = vpop.f32.mrf.mxu2  ;;  %v1411_v7 = vld [vmem:[#allocation2 + $0x70] sm:$0xff] }
 0x1b1   : > { %1396 = vst.msk [vmem:[#allocation2 + $0x78] sm:$0xff] %vm358_vm1, %v1380_v22  ;;  %v1427_v57 = vadd.f32 %v4207_v3, %v1411_v7  ;;  %3120 = vmatmul.msk.f32.gmra.mxu3 %vm358_vm1, %v3796_v9 }
 0x1b2   : > { %v1477_v28 = vpop.f32.mrf.mxu0  ;;  %v1604_v26 = vld [vmem:[#allocation2 + $0x10] sm:$0xff] }
 0x1b3   : > { %1519 = vst.msk [vmem:[#allocation2 + $0x18] sm:$0xff] %vm358_vm1, %v1477_v28  ;;  %v1620_v49 = vadd.f32 %v1604_v26, %v1560_v51 }
 0x1b4   : > { %v1725_v21 = vld [vmem:[#allocation2 + $0x8] sm:$0xff]  ;;  %2972 = vst.msk [vmem:[%s3806_s12 + $0xf0] sm:$0xff] %vm358_vm1, %v1427_v57  ;;  %v1804_v46 = vpop.f32.mrf.mxu3 }
 0x1b5   : > { %1636 = vst.msk [vmem:[#allocation2 + $0x10] sm:$0xff] %vm358_vm1, %v1620_v49  ;;  %v1741_v35 = vadd.f32 %v1725_v21, %v1679_v12  ;;  %3067 = vmatmul.msk.f32.gmra.mxu0 %vm358_vm1, %v3491_v31  ;;  %v1563_v32 = vpop.f32.mrf.mxu1  ;;  %3103 = vmatmul.msk.f32.gmra.mxu2 %vm358_vm1, %v3525_v39 }
 0x1b6   : > { %v1846_v25 = vld [vmem:[#allocation2] sm:$0xff] }
 0x1b7   : > { %1757 = vst.msk [vmem:[#allocation2 + $0x8] sm:$0xff] %vm358_vm1, %v1741_v35  ;;  %v1862_v20 = vadd.f32 %v1846_v25, %v1798_v50 }
 0x1b8   : > { %3085 = vmatmul.msk.f32.gmra.mxu1 %vm358_vm1, %v3773_v15  ;;  %v1685_v38 = vpop.f32.mrf.mxu2  ;;  %v1412_v13 = vld [vmem:[#allocation2 + $0x78] sm:$0xff] }
 0x1b9   : > { %1878 = vst.msk [vmem:[#allocation2] sm:$0xff] %vm358_vm1, %v1862_v20  ;;  %v1428_v27 = vadd.f32 %v4207_v3, %v1412_v13  ;;  %3121 = vmatmul.msk.f32.gmra.mxu3 %vm358_vm1, %v3817_v16 }
 0x1ba   : > { %v1480_v31 = vpop.f32.mrf.mxu0  ;;  %v1605_v54 = vld [vmem:[#allocation2 + $0x18] sm:$0xff] }
 0x1bb   : > { %1520 = vst.msk [vmem:[#allocation2 + $0x20] sm:$0xff] %vm358_vm1, %v1480_v31  ;;  %v1621_v37 = vadd.f32 %v1605_v54, %v1563_v32 }
 0x1bc   : > { %v1726_v24 = vld [vmem:[#allocation2 + $0x10] sm:$0xff]  ;;  %2973 = vst.msk [vmem:[%s3806_s12 + $0xf8] sm:$0xff] %vm358_vm1, %v1428_v27  ;;  %v1807_v1 = vpop.f32.mrf.mxu3 }
 0x1bd   : > { %1637 = vst.msk [vmem:[#allocation2 + $0x18] sm:$0xff] %vm358_vm1, %v1621_v37  ;;  %v1742_v15 = vadd.f32 %v1726_v24, %v1682_v29  ;;  %3068 = vmatmul.msk.f32.gmra.mxu0 %vm358_vm1, %v3510_v36  ;;  %v1566_v50 = vpop.f32.mrf.mxu1  ;;  %3104 = vmatmul.msk.f32.gmra.mxu2 %vm358_vm1, %v3544_v44 }
 0x1be   : > { %v1847_v12 = vld [vmem:[#allocation2 + $0x8] sm:$0xff] }
 0x1bf   : > { %1758 = vst.msk [vmem:[#allocation2 + $0x10] sm:$0xff] %vm358_vm1, %v1742_v15  ;;  %v1863_v10 = vadd.f32 %v1847_v12, %v1801_v8 }
 0x1c0   : > { %3086 = vmatmul.msk.f32.gmra.mxu1 %vm358_vm1, %v3796_v9  ;;  %v1688_v62 = vpop.f32.mrf.mxu2  ;;  %v1894_v23 = vld [vmem:[#allocation2] sm:$0xff] }
 0x1c1   : > { %1879 = vst.msk [vmem:[#allocation2 + $0x8] sm:$0xff] %vm358_vm1, %v1863_v10  ;;  %v1910_v2 = vadd.f32 %v4207_v3, %v1894_v23  ;;  %3122 = vmatmul.msk.f32.gmra.mxu3 %vm358_vm1, %v3837_v40 }
 0x1c2   : > { %v1483_v36 = vpop.f32.mrf.mxu0  ;;  %v1606_v41 = vld [vmem:[#allocation2 + $0x20] sm:$0xff] }
 0x1c3   : > { %1521 = vst.msk [vmem:[#allocation2 + $0x28] sm:$0xff] %vm358_vm1, %v1483_v36  ;;  %v1622_v6 = vadd.f32 %v1606_v41, %v1566_v50 }
 0x1c4   : > { %v1727_v4 = vld [vmem:[#allocation2 + $0x18] sm:$0xff]  ;;  %3046 = vst.msk [vmem:[%s3806_s12 + $0x100] sm:$0xff] %vm358_vm1, %v1910_v2  ;;  %v1810_v8 = vpop.f32.mrf.mxu3 }
 0x1c5   : > { %1638 = vst.msk [vmem:[#allocation2 + $0x20] sm:$0xff] %vm358_vm1, %v1622_v6  ;;  %v1743_v9 = vadd.f32 %v1727_v4, %v1685_v38  ;;  %3069 = vmatmul.msk.f32.gmra.mxu0 %vm358_vm1, %v3525_v39  ;;  %v1569_v51 = vpop.f32.mrf.mxu1  ;;  %3105 = vmatmul.msk.f32.gmra.mxu2 %vm358_vm1, %v3559_v47 }
 0x1c6   : > { %v1848_v14 = vld [vmem:[#allocation2 + $0x10] sm:$0xff] }
 0x1c7   : > { %1759 = vst.msk [vmem:[#allocation2 + $0x18] sm:$0xff] %vm358_vm1, %v1743_v9  ;;  %v1864_v22 = vadd.f32 %v1848_v14, %v1804_v46 }
 0x1c8   : > { %3087 = vmatmul.msk.f32.gmra.mxu1 %vm358_vm1, %v3817_v16  ;;  %v1691_v29 = vpop.f32.mrf.mxu2  ;;  %v1895_v7 = vld [vmem:[#allocation2 + $0x8] sm:$0xff] }
 0x1c9   : > { %1880 = vst.msk [vmem:[#allocation2 + $0x10] sm:$0xff] %vm358_vm1, %v1864_v22  ;;  %v1911_v57 = vadd.f32 %v4207_v3, %v1895_v7  ;;  %3123 = vmatmul.msk.f32.gmra.mxu3 %vm358_vm1, %v3856_v45 }
 0x1ca   : > { %v1486_v39 = vpop.f32.mrf.mxu0  ;;  %v1607_v28 = vld [vmem:[#allocation2 + $0x28] sm:$0xff] }
 0x1cb   : > { %1522 = vst.msk [vmem:[#allocation2 + $0x30] sm:$0xff] %vm358_vm1, %v1486_v39  ;;  %v1623_v26 = vadd.f32 %v1607_v28, %v1569_v51 }
 0x1cc   : > { %v1728_v49 = vld [vmem:[#allocation2 + $0x20] sm:$0xff]  ;;  %3047 = vst.msk [vmem:[%s3806_s12 + $0x108] sm:$0xff] %vm358_vm1, %v1911_v57  ;;  %v1813_v35 = vpop.f32.mrf.mxu3 }
 0x1cd   : > { %1639 = vst.msk [vmem:[#allocation2 + $0x28] sm:$0xff] %vm358_vm1, %v1623_v26  ;;  %v1744_v16 = vadd.f32 %v1728_v49, %v1688_v62  ;;  %3070 = vmatmul.msk.f32.gmra.mxu0 %vm358_vm1, %v3544_v44  ;;  %v1572_v21 = vpop.f32.mrf.mxu1  ;;  %3106 = vmatmul.msk.f32.gmra.mxu2 %vm358_vm1, %v3578_v52 }
 0x1ce   : > { %v1849_v32 = vld [vmem:[#allocation2 + $0x18] sm:$0xff] }
 0x1cf   : > { %1760 = vst.msk [vmem:[#allocation2 + $0x20] sm:$0xff] %vm358_vm1, %v1744_v16  ;;  %v1865_v46 = vadd.f32 %v1849_v32, %v1807_v1 }
 0x1d0   : > { %3088 = vmatmul.msk.f32.gmra.mxu1 %vm358_vm1, %v3837_v40  ;;  %v1694_v25 = vpop.f32.mrf.mxu2  ;;  %v1896_v20 = vld [vmem:[#allocation2 + $0x10] sm:$0xff] }
 0x1d1   : > { %1881 = vst.msk [vmem:[#allocation2 + $0x18] sm:$0xff] %vm358_vm1, %v1865_v46  ;;  %v1912_v38 = vadd.f32 %v4207_v3, %v1896_v20  ;;  %3124 = vmatmul.msk.f32.gmra.mxu3 %vm358_vm1, %v3876_v48 }
 0x1d2   : > { %v1489_v44 = vpop.f32.mrf.mxu0  ;;  %v1608_v13 = vld [vmem:[#allocation2 + $0x30] sm:$0xff] }
 0x1d3   : > { %1523 = vst.msk [vmem:[#allocation2 + $0x38] sm:$0xff] %vm358_vm1, %v1489_v44  ;;  %v1624_v27 = vadd.f32 %v1608_v13, %v1572_v21 }
 0x1d4   : > { %v1729_v31 = vld [vmem:[#allocation2 + $0x28] sm:$0xff]  ;;  %3048 = vst.msk [vmem:[%s3806_s12 + $0x110] sm:$0xff] %vm358_vm1, %v1912_v38  ;;  %v1816_v37 = vpop.f32.mrf.mxu3 }
 0x1d5   : > { %1640 = vst.msk [vmem:[#allocation2 + $0x30] sm:$0xff] %vm358_vm1, %v1624_v27  ;;  %v1745_v40 = vadd.f32 %v1729_v31, %v1691_v29  ;;  %3071 = vmatmul.msk.f32.gmra.mxu0 %vm358_vm1, %v3559_v47  ;;  %v1575_v54 = vpop.f32.mrf.mxu1  ;;  %3107 = vmatmul.msk.f32.gmra.mxu2 %vm358_vm1, %v3593_v55 }
 0x1d6   : > { %v1850_v24 = vld [vmem:[#allocation2 + $0x20] sm:$0xff] }
 0x1d7   : > { %1761 = vst.msk [vmem:[#allocation2 + $0x28] sm:$0xff] %vm358_vm1, %v1745_v40  ;;  %v1866_v15 = vadd.f32 %v1850_v24, %v1810_v8 }
 0x1d8   : > { %3089 = vmatmul.msk.f32.gmra.mxu1 %vm358_vm1, %v3856_v45  ;;  %v1697_v50 = vpop.f32.mrf.mxu2  ;;  %v1897_v1 = vld [vmem:[#allocation2 + $0x18] sm:$0xff] }
 0x1d9   : > { %1882 = vst.msk [vmem:[#allocation2 + $0x20] sm:$0xff] %vm358_vm1, %v1866_v15  ;;  %v1913_v12 = vadd.f32 %v4207_v3, %v1897_v1  ;;  %3125 = vmatmul.msk.f32.gmra.mxu3 %vm358_vm1, %v3895_v53 }
 0x1da   : > { %v1492_v47 = vpop.f32.mrf.mxu0  ;;  %v1609_v10 = vld [vmem:[#allocation2 + $0x38] sm:$0xff] }
 0x1db   : > { %1524 = vst.msk [vmem:[#allocation2 + $0x40] sm:$0xff] %vm358_vm1, %v1492_v47  ;;  %v1625_v62 = vadd.f32 %v1609_v10, %v1575_v54 }
 0x1dc   : > { %v1730_v23 = vld [vmem:[#allocation2 + $0x30] sm:$0xff]  ;;  %3049 = vst.msk [vmem:[%s3806_s12 + $0x118] sm:$0xff] %vm358_vm1, %v1913_v12  ;;  %v1819_v36 = vpop.f32.mrf.mxu3 }
 0x1dd   : > { %1641 = vst.msk [vmem:[#allocation2 + $0x38] sm:$0xff] %vm358_vm1, %v1625_v62  ;;  %v1746_v45 = vadd.f32 %v1730_v23, %v1694_v25  ;;  %3072 = vmatmul.msk.f32.gmra.mxu0 %vm358_vm1, %v3578_v52  ;;  %v1578_v2 = vpop.f32.mrf.mxu1  ;;  %3108 = vmatmul.msk.f32.gmra.mxu2 %vm358_vm1, %v3612_v60 }
 0x1de   : > { %v1851_v41 = vld [vmem:[#allocation2 + $0x28] sm:$0xff] }
 0x1df   : > { %1762 = vst.msk [vmem:[#allocation2 + $0x30] sm:$0xff] %vm358_vm1, %v1746_v45  ;;  %v1867_v6 = vadd.f32 %v1851_v41, %v1813_v35  ;;  %v352_v41 = vrot.slane %v4237_v58, 2 }
 0x1e0   : > { %3090 = vmatmul.msk.f32.gmra.mxu1 %vm358_vm1, %v3876_v48  ;;  %v1700_v4 = vpop.f32.mrf.mxu2  ;;  %v1898_v9 = vld [vmem:[#allocation2 + $0x20] sm:$0xff] }
 0x1e1   : > { %1883 = vst.msk [vmem:[#allocation2 + $0x28] sm:$0xff] %vm358_vm1, %v1867_v6  ;;  %v1914_v51 = vadd.f32 %v4207_v3, %v1898_v9  ;;  %3126 = vmatmul.msk.f32.gmra.mxu3 %vm358_vm1, %v3915_v56 }
 0x1e2   : > { %v1495_v52 = vpop.f32.mrf.mxu0  ;;  %v1610_v8 = vld [vmem:[#allocation2 + $0x40] sm:$0xff] }
 0x1e3   : > { %1525 = vst.msk [vmem:[#allocation2 + $0x48] sm:$0xff] %vm358_vm1, %v1495_v52  ;;  %v1626_v14 = vadd.f32 %v1610_v8, %v1578_v2 }
 0x1e4   : > { %v1731_v22 = vld [vmem:[#allocation2 + $0x38] sm:$0xff]  ;;  %3050 = vst.msk [vmem:[%s3806_s12 + $0x120] sm:$0xff] %vm358_vm1, %v1914_v51  ;;  %v1822_v7 = vpop.f32.mrf.mxu3 }
 0x1e5   : > { %1642 = vst.msk [vmem:[#allocation2 + $0x40] sm:$0xff] %vm358_vm1, %v1626_v14  ;;  %v1747_v48 = vadd.f32 %v1731_v22, %v1697_v50  ;;  %3073 = vmatmul.msk.f32.gmra.mxu0 %vm358_vm1, %v3593_v55  ;;  %v1581_v29 = vpop.f32.mrf.mxu1  ;;  %3109 = vmatmul.msk.f32.gmra.mxu2 %vm358_vm1, %v3627_v63 }
 0x1e6   : > { %v1852_v57 = vld [vmem:[#allocation2 + $0x30] sm:$0xff] }
 0x1e7   : > { %1763 = vst.msk [vmem:[#allocation2 + $0x38] sm:$0xff] %vm358_vm1, %v1747_v48  ;;  %v1868_v39 = vadd.f32 %v1852_v57, %v1816_v37 }
 0x1e8   : > { %3091 = vmatmul.msk.f32.gmra.mxu1 %vm358_vm1, %v3895_v53  ;;  %v1703_v28 = vpop.f32.mrf.mxu2  ;;  %v1899_v26 = vld [vmem:[#allocation2 + $0x28] sm:$0xff] }
 0x1e9   : > { %1884 = vst.msk [vmem:[#allocation2 + $0x30] sm:$0xff] %vm358_vm1, %v1868_v39  ;;  %v1915_v49 = vadd.f32 %v4207_v3, %v1899_v26  ;;  %3127 = vmatmul.msk.f32.gmra.mxu3 %vm358_vm1, %v3934_v61 }
 0x1ea   : > { %v1498_v55 = vpop.f32.mrf.mxu0  ;;  %v1611_v16 = vld [vmem:[#allocation2 + $0x48] sm:$0xff] }
 0x1eb   : > { %1526 = vst.msk [vmem:[#allocation2 + $0x50] sm:$0xff] %vm358_vm1, %v1498_v55  ;;  %v1627_v21 = vadd.f32 %v1611_v16, %v1581_v29 }
 0x1ec   : > { %v1732_v35 = vld [vmem:[#allocation2 + $0x40] sm:$0xff]  ;;  %3051 = vst.msk [vmem:[%s3806_s12 + $0x128] sm:$0xff] %vm358_vm1, %v1915_v49  ;;  %v1825_v46 = vpop.f32.mrf.mxu3 }
 0x1ed   : > { %1643 = vst.msk [vmem:[#allocation2 + $0x48] sm:$0xff] %vm358_vm1, %v1627_v21  ;;  %v1748_v53 = vadd.f32 %v1732_v35, %v1700_v4  ;;  %3074 = vmatmul.msk.f32.gmra.mxu0 %vm358_vm1, %v3612_v60  ;;  %v1584_v32 = vpop.f32.mrf.mxu1  ;;  %3110 = vmatmul.msk.f32.gmra.mxu2 %vm358_vm1, %v3650_v5 }
 0x1ee   : > { %v1853_v25 = vld [vmem:[#allocation2 + $0x38] sm:$0xff] }
 0x1ef   : > { %1764 = vst.msk [vmem:[#allocation2 + $0x40] sm:$0xff] %vm358_vm1, %v1748_v53  ;;  %v1869_v20 = vadd.f32 %v1853_v25, %v1819_v36  ;;  %v351_v36 = vrot.slane %v4242_v59, 2 }
 0x1f0   : > { %3092 = vmatmul.msk.f32.gmra.mxu1 %vm358_vm1, %v3915_v56  ;;  %v1706_v38 = vpop.f32.mrf.mxu2  ;;  %v1900_v44 = vld [vmem:[#allocation2 + $0x30] sm:$0xff] }
 0x1f1   : > { %1885 = vst.msk [vmem:[#allocation2 + $0x38] sm:$0xff] %vm358_vm1, %v1869_v20  ;;  %v1916_v13 = vadd.f32 %v4207_v3, %v1900_v44  ;;  %3128 = vmatmul.msk.f32.gmra.mxu3 %vm358_vm1, %v3954_v0  ;;  %v353_v8 = vsel %vm289_vm3, %v351_v36, %v352_v41 }
 0x1f2   : > { %v1501_v60 = vpop.f32.mrf.mxu0  ;;  %v1612_v27 = vld [vmem:[#allocation2 + $0x50] sm:$0xff] }
 0x1f3   : > { %1527 = vst.msk [vmem:[#allocation2 + $0x58] sm:$0xff] %vm358_vm1, %v1501_v60  ;;  %v1628_v31 = vadd.f32 %v1612_v27, %v1584_v32 }
 0x1f4   : > { %v1733_v40 = vld [vmem:[#allocation2 + $0x48] sm:$0xff]  ;;  %3052 = vst.msk [vmem:[%s3806_s12 + $0x130] sm:$0xff] %vm358_vm1, %v1916_v13  ;;  %v1828_v37 = vpop.f32.mrf.mxu3 }
 0x1f5   : > { %1644 = vst.msk [vmem:[#allocation2 + $0x50] sm:$0xff] %vm358_vm1, %v1628_v31  ;;  %v1749_v56 = vadd.f32 %v1733_v40, %v1703_v28  ;;  %3075 = vmatmul.msk.f32.gmra.mxu0 %vm358_vm1, %v3627_v63  ;;  %v1587_v54 = vpop.f32.mrf.mxu1  ;;  %3111 = vmatmul.msk.f32.gmra.mxu2 %vm358_vm1, %v3676_v17 }
 0x1f6   : > { %v1854_v24 = vld [vmem:[#allocation2 + $0x40] sm:$0xff] }
 0x1f7   : > { %1765 = vst.msk [vmem:[#allocation2 + $0x48] sm:$0xff] %vm358_vm1, %v1749_v56  ;;  %v1870_v15 = vadd.f32 %v1854_v24, %v1822_v7 }
 0x1f8   : > { %3093 = vmatmul.msk.f32.gmra.mxu1 %vm358_vm1, %v3934_v61  ;;  %v1709_v50 = vpop.f32.mrf.mxu2  ;;  %v1901_v1 = vld [vmem:[#allocation2 + $0x38] sm:$0xff] }
 0x1f9   : > { %1886 = vst.msk [vmem:[#allocation2 + $0x40] sm:$0xff] %vm358_vm1, %v1870_v15  ;;  %v1917_v12 = vadd.f32 %v4207_v3, %v1901_v1  ;;  %3129 = vmatmul.msk.f32.gmra.mxu3 %vm358_vm1, %v3977_v11 }
 0x1fa   : > { %v1504_v63 = vpop.f32.mrf.mxu0  ;;  %v1613_v47 = vld [vmem:[#allocation2 + $0x58] sm:$0xff] }
 0x1fb   : > { %1528 = vst.msk [vmem:[#allocation2 + $0x60] sm:$0xff] %vm358_vm1, %v1504_v63  ;;  %v1629_v10 = vadd.f32 %v1613_v47, %v1587_v54 }
 0x1fc   : > { %v1734_v62 = vld [vmem:[#allocation2 + $0x50] sm:$0xff]  ;;  %3053 = vst.msk [vmem:[%s3806_s12 + $0x138] sm:$0xff] %vm358_vm1, %v1917_v12  ;;  %v1831_v45 = vpop.f32.mrf.mxu3 }
 0x1fd   : > { %1645 = vst.msk [vmem:[#allocation2 + $0x58] sm:$0xff] %vm358_vm1, %v1629_v10  ;;  %v1750_v61 = vadd.f32 %v1734_v62, %v1706_v38  ;;  %3076 = vmatmul.msk.f32.gmra.mxu0 %vm358_vm1, %v3650_v5  ;;  %v1590_v23 = vpop.f32.mrf.mxu1  ;;  %3112 = vmatmul.msk.f32.gmra.mxu2 %vm358_vm1, %v3695_v30  ;;  %v354_v38 = vrot.slane %v4262_v33, 2 }
 0x1fe   : > { %v1855_v2 = vld [vmem:[#allocation2 + $0x48] sm:$0xff] }
 0x1ff   : > { %1766 = vst.msk [vmem:[#allocation2 + $0x50] sm:$0xff] %vm358_vm1, %v1750_v61  ;;  %v1871_v6 = vadd.f32 %v1855_v2, %v1825_v46  ;;  %v355_v33 = vsel %vm289_vm3, %v352_v41, %v354_v38 }
 0x200   : > { %3094 = vmatmul.msk.f32.gmra.mxu1 %vm358_vm1, %v3954_v0  ;;  %v1712_v4 = vpop.f32.mrf.mxu2  ;;  %v1902_v9 = vld [vmem:[#allocation2 + $0x40] sm:$0xff] }
 0x201   : > { %1887 = vst.msk [vmem:[#allocation2 + $0x48] sm:$0xff] %vm358_vm1, %v1871_v6  ;;  %v1918_v5 = vadd.f32 %v4207_v3, %v1902_v9  ;;  %3130 = vmatmul.msk.f32.gmra.mxu3 %vm358_vm1, %v4005_v19 }
 0x202   : > { %v1507_v51 = vpop.f32.mrf.mxu0  ;;  %v1614_v52 = vld [vmem:[#allocation2 + $0x60] sm:$0xff] }
 0x203   : > { %1529 = vst.msk [vmem:[#allocation2 + $0x68] sm:$0xff] %vm358_vm1, %v1507_v51  ;;  %v1630_v59 = vadd.f32 %v1614_v52, %v1590_v23 }
 0x204   : > { %v1735_v14 = vld [vmem:[#allocation2 + $0x58] sm:$0xff]  ;;  %3054 = vst.msk [vmem:[%s3806_s12 + $0x140] sm:$0xff] %vm358_vm1, %v1918_v5  ;;  %v1834_v48 = vpop.f32.mrf.mxu3 }
 0x205   : > { %1646 = vst.msk [vmem:[#allocation2 + $0x60] sm:$0xff] %vm358_vm1, %v1630_v59  ;;  %v1751_v0 = vadd.f32 %v1735_v14, %v1709_v50  ;;  %3077 = vmatmul.msk.f32.gmra.mxu0 %vm358_vm1, %v3676_v17  ;;  %v1593_v22 = vpop.f32.mrf.mxu1  ;;  %3113 = vmatmul.msk.f32.gmra.mxu2 %vm358_vm1, %v3714_v42 }
 0x206   : > { %v1856_v29 = vld [vmem:[#allocation2 + $0x50] sm:$0xff] }
 0x207   : > { %1767 = vst.msk [vmem:[#allocation2 + $0x58] sm:$0xff] %vm358_vm1, %v1751_v0  ;;  %v1872_v7 = vadd.f32 %v1856_v29, %v1828_v37 }
 0x208   : > { %3095 = vmatmul.msk.f32.gmra.mxu1 %vm358_vm1, %v3977_v11  ;;  %v1715_v57 = vpop.f32.mrf.mxu2  ;;  %v1903_v39 = vld [vmem:[#allocation2 + $0x48] sm:$0xff] }
 0x209   : > { %1888 = vst.msk [vmem:[#allocation2 + $0x50] sm:$0xff] %vm358_vm1, %v1872_v7  ;;  %v1919_v28 = vadd.f32 %v4207_v3, %v1903_v39  ;;  %3131 = vmatmul.msk.f32.gmra.mxu3 %vm358_vm1, %v4028_v18 }
 0x20a   : > { %v1510_v17 = vpop.f32.mrf.mxu0  ;;  %v1615_v26 = vld [vmem:[#allocation2 + $0x68] sm:$0xff] }
 0x20b   : > { %1530 = vst.msk [vmem:[#allocation2 + $0x70] sm:$0xff] %vm358_vm1, %v1510_v17  ;;  %v1631_v49 = vadd.f32 %v1615_v26, %v1593_v22 }
 0x20c   : > { %v1736_v55 = vld [vmem:[#allocation2 + $0x60] sm:$0xff]  ;;  %3055 = vst.msk [vmem:[%s3806_s12 + $0x148] sm:$0xff] %vm358_vm1, %v1919_v28  ;;  %v1837_v21 = vpop.f32.mrf.mxu3 }
 0x20d   : > { %1647 = vst.msk [vmem:[#allocation2 + $0x68] sm:$0xff] %vm358_vm1, %v1631_v49  ;;  %v1752_v11 = vadd.f32 %v1736_v55, %v1712_v4  ;;  %3078 = vmatmul.msk.f32.gmra.mxu0 %vm358_vm1, %v3695_v30  ;;  %v1596_v16 = vpop.f32.mrf.mxu1  ;;  %3114 = vmatmul.msk.f32.gmra.mxu2 %vm358_vm1, %v4257_v43 }
 0x20e   : > { %v1857_v35 = vld [vmem:[#allocation2 + $0x58] sm:$0xff] }
 0x20f   : > { %1768 = vst.msk [vmem:[#allocation2 + $0x60] sm:$0xff] %vm358_vm1, %v1752_v11  ;;  %v1873_v53 = vadd.f32 %v1857_v35, %v1831_v45 }
 0x210   : > { %3096 = vmatmul.msk.f32.gmra.mxu1 %vm358_vm1, %v4005_v19  ;;  %v1718_v32 = vpop.f32.mrf.mxu2  ;;  %v1904_v46 = vld [vmem:[#allocation2 + $0x50] sm:$0xff] }
 0x211   : > { %1889 = vst.msk [vmem:[#allocation2 + $0x58] sm:$0xff] %vm358_vm1, %v1873_v53  ;;  %v1920_v25 = vadd.f32 %v4207_v3, %v1904_v46  ;;  %3132 = vmatmul.msk.f32.gmra.mxu3 %vm358_vm1, %v353_v8 }
 0x212   : > { %v1513_v30 = vpop.f32.mrf.mxu0  ;;  %v1616_v20 = vld [vmem:[#allocation2 + $0x70] sm:$0xff] }
 0x213   : > { %1531 = vst.msk [vmem:[#allocation2 + $0x78] sm:$0xff] %vm358_vm1, %v1513_v30  ;;  %v1632_v43 = vadd.f32 %v1616_v20, %v1596_v16 }
 0x214   : > { %v1737_v44 = vld [vmem:[#allocation2 + $0x68] sm:$0xff]  ;;  %3056 = vst.msk [vmem:[%s3806_s12 + $0x150] sm:$0xff] %vm358_vm1, %v1920_v25  ;;  %v1840_v60 = vpop.f32.mrf.mxu3 }
 0x215   : > { %1648 = vst.msk [vmem:[#allocation2 + $0x70] sm:$0xff] %vm358_vm1, %v1632_v43  ;;  %v1753_v19 = vadd.f32 %v1737_v44, %v1715_v57  ;;  %3079 = vmatmul.msk.f32.gmra.mxu0 %vm358_vm1, %v3714_v42  ;;  %v1599_v13 = vpop.f32.mrf.mxu1  ;;  %3115 = vmatmul.msk.f32.gmra.mxu2 %vm358_vm1, %v4278_v34 }
 0x216   : > { %v1858_v27 = vld [vmem:[#allocation2 + $0x60] sm:$0xff] }
 0x217   : > { %1769 = vst.msk [vmem:[#allocation2 + $0x68] sm:$0xff] %vm358_vm1, %v1753_v19  ;;  %v1874_v31 = vadd.f32 %v1858_v27, %v1834_v48 }
 0x218   : > { %3097 = vmatmul.msk.f32.gmra.mxu1 %vm358_vm1, %v4028_v18  ;;  %v1721_v40 = vpop.f32.mrf.mxu2  ;;  %v1905_v56 = vld [vmem:[#allocation2 + $0x58] sm:$0xff] }
 0x219   : > { %1890 = vst.msk [vmem:[#allocation2 + $0x60] sm:$0xff] %vm358_vm1, %v1874_v31  ;;  %v1921_v42 = vadd.f32 %v4207_v3, %v1905_v56  ;;  %3133 = vmatmul.msk.f32.gmra.mxu3 %vm358_vm1, %v355_v33  ;;  %v4569_v31 = vld [vmem:[%s4830_s2] ss:$0 sm:$0xff] }
 0x21a   : > { %v1617_v34 = vld [vmem:[#allocation2 + $0x78] sm:$0xff]  ;;  %v1965_v54 = vpop.f32.mrf.mxu0 }
 0x21b   : > { %v1633_v37 = vadd.f32 %v1617_v34, %v1599_v13  ;;  %2013 = vst.msk [vmem:[#allocation2] sm:$0xff] %vm358_vm1, %v1965_v54 }
 0x21c   : > { %v1738_v24 = vld [vmem:[#allocation2 + $0x70] sm:$0xff]  ;;  %3057 = vst.msk [vmem:[%s3806_s12 + $0x158] sm:$0xff] %vm358_vm1, %v1921_v42  ;;  %v1843_v15 = vpop.f32.mrf.mxu3 }
 0x21d   : > { %1649 = vst.msk [vmem:[#allocation2 + $0x78] sm:$0xff] %vm358_vm1, %v1633_v37  ;;  %v1754_v18 = vadd.f32 %v1738_v24, %v1718_v32  ;;  %v2051_v58 = vpop.f32.mrf.mxu1 }
 0x21e   : > { %v1859_v50 = vld [vmem:[#allocation2 + $0x68] sm:$0xff] }
 0x21f   : > { %1770 = vst.msk [vmem:[#allocation2 + $0x70] sm:$0xff] %vm358_vm1, %v1754_v18  ;;  %v1875_v1 = vadd.f32 %v1859_v50, %v1837_v21 }
 0x220   : > { %v2169_v12 = vpop.f32.mrf.mxu2  ;;  %v1906_v63 = vld [vmem:[#allocation2 + $0x60] sm:$0xff] }
 0x221   : > { %1891 = vst.msk [vmem:[#allocation2 + $0x68] sm:$0xff] %vm358_vm1, %v1875_v1  ;;  %v1922_v47 = vadd.f32 %v4207_v3, %v1906_v63 }
 0x222   : > { %v1968_v10 = vpop.f32.mrf.mxu0  ;;  %v2099_v62 = vld [vmem:[#allocation2] sm:$0xff] }
 0x223   : > { %2014 = vst.msk [vmem:[#allocation2 + $0x8] sm:$0xff] %vm358_vm1, %v1968_v10  ;;  %v2115_v61 = vadd.f32 %v2099_v62, %v2051_v58 }
 0x224   : > { %v1739_v23 = vld [vmem:[#allocation2 + $0x78] sm:$0xff]  ;;  %3058 = vst.msk [vmem:[%s3806_s12 + $0x160] sm:$0xff] %vm358_vm1, %v1922_v47  ;;  %v2291_v36 = vpop.f32.mrf.mxu3 }
 0x225   : > { %2131 = vst.msk [vmem:[#allocation2] sm:$0xff] %vm358_vm1, %v2115_v61  ;;  %v1755_v45 = vadd.f32 %v1739_v23, %v1721_v40  ;;  %v2054_v2 = vpop.f32.mrf.mxu1 }
 0x226   : > { %v1860_v41 = vld [vmem:[#allocation2 + $0x70] sm:$0xff] }
 0x227   : > { %1771 = vst.msk [vmem:[#allocation2 + $0x78] sm:$0xff] %vm358_vm1, %v1755_v45  ;;  %v1876_v6 = vadd.f32 %v1860_v41, %v1840_v60 }
 0x228   : > { %v2172_v4 = vpop.f32.mrf.mxu2  ;;  %v1907_v9 = vld [vmem:[#allocation2 + $0x68] sm:$0xff] }
 0x229   : > { %1892 = vst.msk [vmem:[#allocation2 + $0x70] sm:$0xff] %vm358_vm1, %v1876_v6  ;;  %v1923_v5 = vadd.f32 %v4207_v3, %v1907_v9 }
 0x22a   : > { %v1971_v51 = vpop.f32.mrf.mxu0  ;;  %v2100_v52 = vld [vmem:[#allocation2 + $0x8] sm:$0xff] }
 0x22b   : > { %2015 = vst.msk [vmem:[#allocation2 + $0x10] sm:$0xff] %vm358_vm1, %v1971_v51  ;;  %v2116_v59 = vadd.f32 %v2100_v52, %v2054_v2 }
 0x22c   : > { %v2217_v8 = vld [vmem:[#allocation2] sm:$0xff]  ;;  %3059 = vst.msk [vmem:[%s3806_s12 + $0x168] sm:$0xff] %vm358_vm1, %v1923_v5  ;;  %v2294_v22 = vpop.f32.mrf.mxu3 }
 0x22d   : > { %2132 = vst.msk [vmem:[#allocation2 + $0x8] sm:$0xff] %vm358_vm1, %v2116_v59  ;;  %v2233_v14 = vadd.f32 %v2217_v8, %v2169_v12  ;;  %v2057_v0 = vpop.f32.mrf.mxu1 }
 0x22e   : > { %v1861_v48 = vld [vmem:[#allocation2 + $0x78] sm:$0xff] }
 0x22f   : > { %2249 = vst.msk [vmem:[#allocation2] sm:$0xff] %vm358_vm1, %v2233_v14  ;;  %v1877_v29 = vadd.f32 %v1861_v48, %v1843_v15 }
 0x230   : > { %v2175_v7 = vpop.f32.mrf.mxu2  ;;  %v1908_v57 = vld [vmem:[#allocation2 + $0x70] sm:$0xff] }
 0x231   : > { %1893 = vst.msk [vmem:[#allocation2 + $0x78] sm:$0xff] %vm358_vm1, %v1877_v29  ;;  %v1924_v39 = vadd.f32 %v4207_v3, %v1908_v57 }
 0x232   : > { %v1974_v28 = vpop.f32.mrf.mxu0  ;;  %v2101_v17 = vld [vmem:[#allocation2 + $0x10] sm:$0xff] }
 0x233   : > { %2016 = vst.msk [vmem:[#allocation2 + $0x18] sm:$0xff] %vm358_vm1, %v1974_v28  ;;  %v2117_v26 = vadd.f32 %v2101_v17, %v2057_v0 }
 0x234   : > { %v2218_v49 = vld [vmem:[#allocation2 + $0x8] sm:$0xff]  ;;  %3060 = vst.msk [vmem:[%s3806_s12 + $0x170] sm:$0xff] %vm358_vm1, %v1924_v39  ;;  %v2297_v16 = vpop.f32.mrf.mxu3 }
 0x235   : > { %2133 = vst.msk [vmem:[#allocation2 + $0x10] sm:$0xff] %vm358_vm1, %v2117_v26  ;;  %v2234_v55 = vadd.f32 %v2218_v49, %v2172_v4  ;;  %v2060_v11 = vpop.f32.mrf.mxu1 }
 0x236   : > { %v2339_v21 = vld [vmem:[#allocation2] sm:$0xff] }
 0x237   : > { %2250 = vst.msk [vmem:[#allocation2 + $0x8] sm:$0xff] %vm358_vm1, %v2234_v55  ;;  %v2355_v35 = vadd.f32 %v2339_v21, %v2291_v36 }
 0x238   : > { %v2178_v53 = vpop.f32.mrf.mxu2  ;;  %v1909_v32 = vld [vmem:[#allocation2 + $0x78] sm:$0xff] }
 0x239   : > { %2371 = vst.msk [vmem:[#allocation2] sm:$0xff] %vm358_vm1, %v2355_v35  ;;  %v1925_v46 = vadd.f32 %v4207_v3, %v1909_v32 }
 0x23a   : > { %v1977_v25 = vpop.f32.mrf.mxu0  ;;  %v2102_v30 = vld [vmem:[#allocation2 + $0x18] sm:$0xff] }
 0x23b   : > { %2017 = vst.msk [vmem:[#allocation2 + $0x20] sm:$0xff] %vm358_vm1, %v1977_v25  ;;  %v2118_v20 = vadd.f32 %v2102_v30, %v2060_v11 }
 0x23c   : > { %v2219_v43 = vld [vmem:[#allocation2 + $0x10] sm:$0xff]  ;;  %3061 = vst.msk [vmem:[%s3806_s12 + $0x178] sm:$0xff] %vm358_vm1, %v1925_v46  ;;  %v2300_v19 = vpop.f32.mrf.mxu3 }
 0x23d   : > { %2134 = vst.msk [vmem:[#allocation2 + $0x18] sm:$0xff] %vm358_vm1, %v2118_v20  ;;  %v2235_v38 = vadd.f32 %v2219_v43, %v2175_v7  ;;  %v2063_v44 = vpop.f32.mrf.mxu1 }
 0x23e   : > { %v2340_v13 = vld [vmem:[#allocation2 + $0x8] sm:$0xff] }
 0x23f   : > { %2251 = vst.msk [vmem:[#allocation2 + $0x10] sm:$0xff] %vm358_vm1, %v2235_v38  ;;  %v2356_v60 = vadd.f32 %v2340_v13, %v2294_v22 }
 0x240   : > { %v2387_v27 = vld [vmem:[#allocation2] sm:$0xff]  ;;  %v2181_v3 = vpop.f32.mrf.mxu2 }
 0x241   : > { %v2403_v33 = vadd.f32 %v4569_v31, %v2387_v27  ;;  %2372 = vst.msk [vmem:[#allocation2 + $0x8] sm:$0xff] %vm358_vm1, %v2356_v60 }
 0x242   : > { %v1980_v40 = vpop.f32.mrf.mxu0  ;;  %v2103_v56 = vld [vmem:[#allocation2 + $0x20] sm:$0xff] }
 0x243   : > { %3134 = vst.msk [vmem:[%s3806_s12 + $0x180] sm:$0xff] %vm358_vm1, %v2403_v33  ;;  %v2119_v42 = vadd.f32 %v2103_v56, %v2063_v44 }
 0x244   : > { %2018 = vst.msk [vmem:[#allocation2 + $0x28] sm:$0xff] %vm358_vm1, %v1980_v40  ;;  %v2220_v34 = vld [vmem:[#allocation2 + $0x18] sm:$0xff]  ;;  %v2303_v24 = vpop.f32.mrf.mxu3 }
 0x245   : > { %2135 = vst.msk [vmem:[#allocation2 + $0x20] sm:$0xff] %vm358_vm1, %v2119_v42  ;;  %v2236_v54 = vadd.f32 %v2220_v34, %v2178_v53  ;;  %v2066_v37 = vpop.f32.mrf.mxu1 }
 0x246   : > { %v2341_v18 = vld [vmem:[#allocation2 + $0x10] sm:$0xff] }
 0x247   : > { %2252 = vst.msk [vmem:[#allocation2 + $0x18] sm:$0xff] %vm358_vm1, %v2236_v54  ;;  %v2357_v58 = vadd.f32 %v2341_v18, %v2297_v16 }
 0x248   : > { %v2388_v15 = vld [vmem:[#allocation2 + $0x8] sm:$0xff]  ;;  %v2184_v50 = vpop.f32.mrf.mxu2 }
 0x249   : > { %v2404_v1 = vadd.f32 %v4569_v31, %v2388_v15  ;;  %2373 = vst.msk [vmem:[#allocation2 + $0x10] sm:$0xff] %vm358_vm1, %v2357_v58 }
 0x24a   : > { %v1983_v12 = vpop.f32.mrf.mxu0 }
 0x24b   : > { %3135 = vst.msk [vmem:[%s3806_s12 + $0x188] sm:$0xff] %vm358_vm1, %v2404_v1  ;;  %v2104_v63 = vld [vmem:[#allocation2 + $0x28] sm:$0xff] }
 0x24c   : > { %2019 = vst.msk [vmem:[#allocation2 + $0x30] sm:$0xff] %vm358_vm1, %v1983_v12  ;;  %v2120_v47 = vadd.f32 %v2104_v63, %v2066_v37  ;;  %v2221_v10 = vld [vmem:[#allocation2 + $0x20] sm:$0xff]  ;;  %v2306_v23 = vpop.f32.mrf.mxu3 }
 0x24d   : > { %v2237_v62 = vadd.f32 %v2221_v10, %v2181_v3  ;;  %v2069_v61 = vpop.f32.mrf.mxu1 }
 0x24e   : > { %2136 = vst.msk [vmem:[#allocation2 + $0x28] sm:$0xff] %vm358_vm1, %v2120_v47  ;;  %v2342_v45 = vld [vmem:[#allocation2 + $0x18] sm:$0xff] }
 0x24f   : > { %2253 = vst.msk [vmem:[#allocation2 + $0x20] sm:$0xff] %vm358_vm1, %v2237_v62  ;;  %v2358_v2 = vadd.f32 %v2342_v45, %v2300_v19 }
 0x250   : > { %v2389_v36 = vld [vmem:[#allocation2 + $0x10] sm:$0xff]  ;;  %v2187_v41 = vpop.f32.mrf.mxu2 }
 0x251   : > { %v2405_v6 = vadd.f32 %v4569_v31, %v2389_v36  ;;  %2374 = vst.msk [vmem:[#allocation2 + $0x18] sm:$0xff] %vm358_vm1, %v2358_v2 }
 0x252   : > { %v1986_v4 = vpop.f32.mrf.mxu0 }
 0x253   : > { %3136 = vst.msk [vmem:[%s3806_s12 + $0x190] sm:$0xff] %vm358_vm1, %v2405_v6  ;;  %v2105_v9 = vld [vmem:[#allocation2 + $0x30] sm:$0xff] }
 0x254   : > { %2020 = vst.msk [vmem:[#allocation2 + $0x38] sm:$0xff] %vm358_vm1, %v1986_v4  ;;  %v2121_v5 = vadd.f32 %v2105_v9, %v2069_v61  ;;  %v2309_v59 = vpop.f32.mrf.mxu3 }
 0x255   : > { %v2222_v51 = vld [vmem:[#allocation2 + $0x28] sm:$0xff]  ;;  %v2072_v52 = vpop.f32.mrf.mxu1 }
 0x256   : > { %2137 = vst.msk [vmem:[#allocation2 + $0x30] sm:$0xff] %vm358_vm1, %v2121_v5  ;;  %v2238_v8 = vadd.f32 %v2222_v51, %v2184_v50  ;;  %v2343_v14 = vld [vmem:[#allocation2 + $0x20] sm:$0xff] }
 0x257   : > { %v2359_v0 = vadd.f32 %v2343_v14, %v2303_v24 }
 0x258   : > { %v2390_v22 = vld [vmem:[#allocation2 + $0x18] sm:$0xff]  ;;  %2254 = vst.msk [vmem:[#allocation2 + $0x28] sm:$0xff] %vm358_vm1, %v2238_v8  ;;  %v2190_v48 = vpop.f32.mrf.mxu2 }
 0x259   : > { %v2406_v29 = vadd.f32 %v4569_v31, %v2390_v22  ;;  %2375 = vst.msk [vmem:[#allocation2 + $0x20] sm:$0xff] %vm358_vm1, %v2359_v0 }
 0x25a   : > { %v1989_v7 = vpop.f32.mrf.mxu0 }
 0x25b   : > { %3137 = vst.msk [vmem:[%s3806_s12 + $0x198] sm:$0xff] %vm358_vm1, %v2406_v29  ;;  %v2106_v57 = vld [vmem:[#allocation2 + $0x38] sm:$0xff] }
 0x25c   : > { %2021 = vst.msk [vmem:[#allocation2 + $0x40] sm:$0xff] %vm358_vm1, %v1989_v7  ;;  %v2122_v39 = vadd.f32 %v2106_v57, %v2072_v52  ;;  %v2312_v26 = vpop.f32.mrf.mxu3 }
 0x25d   : > { %v2223_v28 = vld [vmem:[#allocation2 + $0x30] sm:$0xff]  ;;  %v2075_v17 = vpop.f32.mrf.mxu1 }
 0x25e   : > { %2138 = vst.msk [vmem:[#allocation2 + $0x38] sm:$0xff] %vm358_vm1, %v2122_v39  ;;  %v2239_v49 = vadd.f32 %v2223_v28, %v2187_v41 }
 0x25f   : > { %v2344_v55 = vld [vmem:[#allocation2 + $0x28] sm:$0xff] }
 0x260   : > { %v2391_v11 = vld [vmem:[#allocation2 + $0x20] sm:$0xff]  ;;  %2255 = vst.msk [vmem:[#allocation2 + $0x30] sm:$0xff] %vm358_vm1, %v2239_v49  ;;  %v2360_v16 = vadd.f32 %v2344_v55, %v2306_v23  ;;  %v2193_v21 = vpop.f32.mrf.mxu2 }
 0x261   : > { %v2407_v35 = vadd.f32 %v4569_v31, %v2391_v11 }
 0x262   : > { %2376 = vst.msk [vmem:[#allocation2 + $0x28] sm:$0xff] %vm358_vm1, %v2360_v16  ;;  %v1992_v53 = vpop.f32.mrf.mxu0 }
 0x263   : > { %3138 = vst.msk [vmem:[%s3806_s12 + $0x1a0] sm:$0xff] %vm358_vm1, %v2407_v35  ;;  %v2107_v32 = vld [vmem:[#allocation2 + $0x40] sm:$0xff] }
 0x264   : > { %2022 = vst.msk [vmem:[#allocation2 + $0x48] sm:$0xff] %vm358_vm1, %v1992_v53  ;;  %v2123_v46 = vadd.f32 %v2107_v32, %v2075_v17  ;;  %v2315_v43 = vpop.f32.mrf.mxu3 }
 0x265   : > { %v2224_v25 = vld [vmem:[#allocation2 + $0x38] sm:$0xff]  ;;  %v2078_v30 = vpop.f32.mrf.mxu1 }
 0x266   : > { %2139 = vst.msk [vmem:[#allocation2 + $0x40] sm:$0xff] %vm358_vm1, %v2123_v46  ;;  %v2240_v20 = vadd.f32 %v2224_v25, %v2190_v48 }
 0x267   : > { %v2345_v38 = vld [vmem:[#allocation2 + $0x30] sm:$0xff] }
 0x268   : > { %2256 = vst.msk [vmem:[#allocation2 + $0x38] sm:$0xff] %vm358_vm1, %v2240_v20  ;;  %v2361_v44 = vadd.f32 %v2345_v38, %v2309_v59  ;;  %v2196_v19 = vpop.f32.mrf.mxu2 }
 0x269   : > { %v2392_v13 = vld [vmem:[#allocation2 + $0x28] sm:$0xff] }
 0x26a   : > { %v2408_v60 = vadd.f32 %v4569_v31, %v2392_v13  ;;  %2377 = vst.msk [vmem:[#allocation2 + $0x30] sm:$0xff] %vm358_vm1, %v2361_v44  ;;  %v1995_v27 = vpop.f32.mrf.mxu0 }
 0x26b   : > { %2023 = vst.msk [vmem:[#allocation2 + $0x50] sm:$0xff] %vm358_vm1, %v1995_v27  ;;  %v2108_v3 = vld [vmem:[#allocation2 + $0x48] sm:$0xff] }
 0x26c   : > { %3139 = vst.msk [vmem:[%s3806_s12 + $0x1a8] sm:$0xff] %vm358_vm1, %v2408_v60  ;;  %v2124_v33 = vadd.f32 %v2108_v3, %v2078_v30  ;;  %v2318_v37 = vpop.f32.mrf.mxu3 }
 0x26d   : > { %v2225_v40 = vld [vmem:[#allocation2 + $0x40] sm:$0xff]  ;;  %v2081_v56 = vpop.f32.mrf.mxu1 }
 0x26e   : > { %2140 = vst.msk [vmem:[#allocation2 + $0x48] sm:$0xff] %vm358_vm1, %v2124_v33  ;;  %v2241_v42 = vadd.f32 %v2225_v40, %v2193_v21 }
 0x26f   : > { %v2346_v34 = vld [vmem:[#allocation2 + $0x38] sm:$0xff] }
 0x270   : > { %2257 = vst.msk [vmem:[#allocation2 + $0x40] sm:$0xff] %vm358_vm1, %v2241_v42  ;;  %v2362_v54 = vadd.f32 %v2346_v34, %v2312_v26  ;;  %v2199_v18 = vpop.f32.mrf.mxu2 }
 0x271   : > { %v2393_v24 = vld [vmem:[#allocation2 + $0x30] sm:$0xff] }
 0x272   : > { %v2409_v58 = vadd.f32 %v4569_v31, %v2393_v24  ;;  %2378 = vst.msk [vmem:[#allocation2 + $0x38] sm:$0xff] %vm358_vm1, %v2362_v54  ;;  %v1998_v15 = vpop.f32.mrf.mxu0  ;;  %v2109_v50 = vld [vmem:[#allocation2 + $0x50] sm:$0xff] }
 0x273   : > { %2024 = vst.msk [vmem:[#allocation2 + $0x58] sm:$0xff] %vm358_vm1, %v1998_v15  ;;  %v2125_v1 = vadd.f32 %v2109_v50, %v2081_v56 }
 0x274   : > { %3140 = vst.msk [vmem:[%s3806_s12 + $0x1b0] sm:$0xff] %vm358_vm1, %v2409_v58  ;;  %v2321_v36 = vpop.f32.mrf.mxu3 }
 0x275   : > { %2141 = vst.msk [vmem:[#allocation2 + $0x50] sm:$0xff] %vm358_vm1, %v2125_v1  ;;  %v2226_v12 = vld [vmem:[#allocation2 + $0x48] sm:$0xff]  ;;  %v2084_v63 = vpop.f32.mrf.mxu1 }
 0x276   : > { %v2242_v47 = vadd.f32 %v2226_v12, %v2196_v19 }
 0x277   : > { %v2347_v10 = vld [vmem:[#allocation2 + $0x40] sm:$0xff] }
 0x278   : > { %2258 = vst.msk [vmem:[#allocation2 + $0x48] sm:$0xff] %vm358_vm1, %v2242_v47  ;;  %v2363_v62 = vadd.f32 %v2347_v10, %v2315_v43  ;;  %v2202_v6 = vpop.f32.mrf.mxu2 }
 0x279   : > { %v2394_v61 = vld [vmem:[#allocation2 + $0x38] sm:$0xff] }
 0x27a   : > { %v2410_v23 = vadd.f32 %v4569_v31, %v2394_v61  ;;  %2379 = vst.msk [vmem:[#allocation2 + $0x40] sm:$0xff] %vm358_vm1, %v2363_v62  ;;  %v2001_v45 = vpop.f32.mrf.mxu0  ;;  %v2110_v2 = vld [vmem:[#allocation2 + $0x58] sm:$0xff] }
 0x27b   : > { %2025 = vst.msk [vmem:[#allocation2 + $0x60] sm:$0xff] %vm358_vm1, %v2001_v45  ;;  %v2126_v41 = vadd.f32 %v2110_v2, %v2084_v63 }
 0x27c   : > { %3141 = vst.msk [vmem:[%s3806_s12 + $0x1b8] sm:$0xff] %vm358_vm1, %v2410_v23  ;;  %v2227_v4 = vld [vmem:[#allocation2 + $0x50] sm:$0xff]  ;;  %v2324_v29 = vpop.f32.mrf.mxu3 }
 0x27d   : > { %2142 = vst.msk [vmem:[#allocation2 + $0x58] sm:$0xff] %vm358_vm1, %v2126_v41  ;;  %v2243_v9 = vadd.f32 %v2227_v4, %v2199_v18  ;;  %v2087_v5 = vpop.f32.mrf.mxu1 }
 0x27f   : > { %2259 = vst.msk [vmem:[#allocation2 + $0x50] sm:$0xff] %vm358_vm1, %v2243_v9  ;;  %v2348_v51 = vld [vmem:[#allocation2 + $0x48] sm:$0xff] }
 0x280   : > { %v2364_v52 = vadd.f32 %v2348_v51, %v2318_v37  ;;  %v2205_v39 = vpop.f32.mrf.mxu2  ;;  %v2603_v51 = vld [vmem:[%s3806_s12] sm:$0xff] (%p3357_p5) }
 0x281   : > { %v2395_v59 = vld [vmem:[#allocation2 + $0x40] sm:$0xff]  ;;  %2604 = vst [vmem:[%s4679_s8] sm:$0xff] (%p3357_p5), %v2603_v51 }
 0x282   : > { %v2411_v8 = vadd.f32 %v4569_v31, %v2395_v59  ;;  %2380 = vst.msk [vmem:[#allocation2 + $0x48] sm:$0xff] %vm358_vm1, %v2364_v52  ;;  %v2004_v14 = vpop.f32.mrf.mxu0  ;;  %v2111_v0 = vld [vmem:[#allocation2 + $0x60] sm:$0xff]  ;;  %v2607_v52 = vld [vmem:[%s3806_s12 + $0x10] sm:$0xff] (%p3357_p5)  ;;  %v2609_v59 = vld [vmem:[%s3806_s12 + $0x18] sm:$0xff] (%p3357_p5) }
 0x283   : > { %2026 = vst.msk [vmem:[#allocation2 + $0x68] sm:$0xff] %vm358_vm1, %v2004_v14  ;;  %v2127_v22 = vadd.f32 %v2111_v0, %v2087_v5  ;;  %v2613_v14 = vld [vmem:[%s3806_s12 + $0x28] sm:$0xff] (%p3357_p5)  ;;  %v2615_v0 = vld [vmem:[%s3806_s12 + $0x30] sm:$0xff] (%p3357_p5) }
 0x284   : > { %3142 = vst.msk [vmem:[%s3806_s12 + $0x1c0] sm:$0xff] %vm358_vm1, %v2411_v8  ;;  %v2228_v48 = vld [vmem:[#allocation2 + $0x58] sm:$0xff]  ;;  %v2327_v32 = vpop.f32.mrf.mxu3  ;;  %v2611_v8 = vld [vmem:[%s3806_s12 + $0x20] sm:$0xff] (%p3357_p5) }
 0x285   : > { %2143 = vst.msk [vmem:[#allocation2 + $0x60] sm:$0xff] %vm358_vm1, %v2127_v22  ;;  %v2244_v7 = vadd.f32 %v2228_v48, %v2202_v6  ;;  %v2090_v57 = vpop.f32.mrf.mxu1  ;;  %v2617_v22 = vld [vmem:[%s3806_s12 + $0x38] sm:$0xff] (%p3357_p5)  ;;  %v2619_v48 = vld [vmem:[%s3806_s12 + $0x40] sm:$0xff] (%p3357_p5) }
 0x286   : > { %v2349_v28 = vld [vmem:[#allocation2 + $0x50] sm:$0xff]  ;;  %2608 = vst [vmem:[%s4679_s8 + $0x10] sm:$0xff] (%p3357_p5), %v2607_v52 }
 0x287   : > { %2260 = vst.msk [vmem:[#allocation2 + $0x58] sm:$0xff] %vm358_vm1, %v2244_v7  ;;  %v2365_v17 = vadd.f32 %v2349_v28, %v2321_v36  ;;  %v2623_v7 = vld [vmem:[%s3806_s12 + $0x50] sm:$0xff] (%p3357_p5)  ;;  %v2629_v28 = vld [vmem:[%s3806_s12 + $0x68] sm:$0xff] (%p3357_p5) }
 0x288   : > { %v2208_v30 = vpop.f32.mrf.mxu2  ;;  %2610 = vst [vmem:[%s4679_s8 + $0x18] sm:$0xff] (%p3357_p5), %v2609_v59 }
 0x289   : > { %v2396_v26 = vld [vmem:[#allocation2 + $0x48] sm:$0xff]  ;;  %2381 = vst.msk [vmem:[#allocation2 + $0x50] sm:$0xff] %vm358_vm1, %v2365_v17  ;;  %v2631_v17 = vld [vmem:[%s3806_s12 + $0x70] sm:$0xff] (%p3357_p5) }
 0x28a   : > { %v2412_v49 = vadd.f32 %v4569_v31, %v2396_v26  ;;  %v2007_v55 = vpop.f32.mrf.mxu0  ;;  %v2112_v11 = vld [vmem:[#allocation2 + $0x68] sm:$0xff]  ;;  %2612 = vst [vmem:[%s4679_s8 + $0x20] sm:$0xff] (%p3357_p5), %v2611_v8  ;;  %v2633_v26 = vld [vmem:[%s3806_s12 + $0x78] sm:$0xff] (%p3357_p5) }
 0x28b   : > { %2027 = vst.msk [vmem:[#allocation2 + $0x70] sm:$0xff] %vm358_vm1, %v2007_v55  ;;  %v2128_v16 = vadd.f32 %v2112_v11, %v2090_v57  ;;  %v2625_v57 = vld [vmem:[%s3806_s12 + $0x58] sm:$0xff] (%p3357_p5)  ;;  %v2637_v55 = vld [vmem:[%s3806_s12 + $0x88] sm:$0xff] (%p3357_p5)  ;;  %v2639_v11 = vld [vmem:[%s3806_s12 + $0x90] sm:$0xff] (%p3357_p5) }
 0x28c   : > { %3143 = vst.msk [vmem:[%s3806_s12 + $0x1c8] sm:$0xff] %vm358_vm1, %v2412_v49  ;;  %v2229_v21 = vld [vmem:[#allocation2 + $0x60] sm:$0xff]  ;;  %v2330_v40 = vpop.f32.mrf.mxu3 }
 0x28d   : > { %2144 = vst.msk [vmem:[#allocation2 + $0x68] sm:$0xff] %vm358_vm1, %v2128_v16  ;;  %v2245_v35 = vadd.f32 %v2229_v21, %v2205_v39  ;;  %v2093_v25 = vpop.f32.mrf.mxu1  ;;  %v2627_v39 = vld [vmem:[%s3806_s12 + $0x60] sm:$0xff] (%p3357_p5)  ;;  %v2641_v16 = vld [vmem:[%s3806_s12 + $0x98] sm:$0xff] (%p3357_p5) }
 0x28e   : > { %v2350_v53 = vld [vmem:[#allocation2 + $0x58] sm:$0xff]  ;;  %2614 = vst [vmem:[%s4679_s8 + $0x28] sm:$0xff] (%p3357_p5), %v2613_v14  ;;  %v2635_v49 = vld [vmem:[%s3806_s12 + $0x80] sm:$0xff] (%p3357_p5) }
 0x28f   : > { %2261 = vst.msk [vmem:[#allocation2 + $0x60] sm:$0xff] %vm358_vm1, %v2245_v35  ;;  %v2366_v46 = vadd.f32 %v2350_v53, %v2324_v29  ;;  %v2621_v29 = vld [vmem:[%s3806_s12 + $0x48] sm:$0xff] (%p3357_p5)  ;;  %v2643_v21 = vld [vmem:[%s3806_s12 + $0xa0] sm:$0xff] (%p3357_p5)  ;;  %v2647_v53 = vld [vmem:[%s3806_s12 + $0xb0] sm:$0xff] (%p3357_p5) }
 0x290   : > { %v2397_v20 = vld [vmem:[#allocation2 + $0x50] sm:$0xff]  ;;  %v2211_v34 = vpop.f32.mrf.mxu2  ;;  %2616 = vst [vmem:[%s4679_s8 + $0x30] sm:$0xff] (%p3357_p5), %v2615_v0  ;;  %v2645_v35 = vld [vmem:[%s3806_s12 + $0xa8] sm:$0xff] (%p3357_p5) }
 0x291   : > { %v2413_v43 = vadd.f32 %v4569_v31, %v2397_v20  ;;  %2382 = vst.msk [vmem:[#allocation2 + $0x58] sm:$0xff] %vm358_vm1, %v2366_v46  ;;  %v2651_v46 = vld [vmem:[%s3806_s12 + $0xc0] sm:$0xff] (%p3357_p5)  ;;  %v2657_v20 = vld [vmem:[%s3806_s12 + $0xd8] sm:$0xff] (%p3357_p5) }
 0x292   : > { %v2010_v38 = vpop.f32.mrf.mxu0  ;;  %v2113_v44 = vld [vmem:[#allocation2 + $0x70] sm:$0xff]  ;;  %2618 = vst [vmem:[%s4679_s8 + $0x38] sm:$0xff] (%p3357_p5), %v2617_v22 }
 0x293   : > { %3144 = vst.msk [vmem:[%s3806_s12 + $0x1d0] sm:$0xff] %vm358_vm1, %v2413_v43  ;;  %v2129_v19 = vadd.f32 %v2113_v44, %v2093_v25  ;;  %v2653_v25 = vld [vmem:[%s3806_s12 + $0xc8] sm:$0xff] (%p3357_p5)  ;;  %v2659_v43 = vld [vmem:[%s3806_s12 + $0xe0] sm:$0xff] (%p3357_p5)  ;;  %v2663_v44 = vld [vmem:[%s3806_s12 + $0xf0] sm:$0xff] (%p3357_p5) }
 0x294   : > { %2028 = vst.msk [vmem:[#allocation2 + $0x78] sm:$0xff] %vm358_vm1, %v2010_v38  ;;  %v2230_v13 = vld [vmem:[#allocation2 + $0x68] sm:$0xff]  ;;  %v2333_v63 = vpop.f32.mrf.mxu3 }
 0x295   : > { %2145 = vst.msk [vmem:[#allocation2 + $0x70] sm:$0xff] %vm358_vm1, %v2129_v19  ;;  %v2246_v60 = vadd.f32 %v2230_v13, %v2208_v30  ;;  %v2096_v42 = vpop.f32.mrf.mxu1  ;;  %v2655_v30 = vld [vmem:[%s3806_s12 + $0xd0] sm:$0xff] (%p3357_p5)  ;;  %v2661_v38 = vld [vmem:[%s3806_s12 + $0xe8] sm:$0xff] (%p3357_p5)  ;;  %v2665_v19 = vld [vmem:[%s3806_s12 + $0xf8] sm:$0xff] (%p3357_p5) }
 0x296   : > { %v2351_v27 = vld [vmem:[#allocation2 + $0x60] sm:$0xff]  ;;  %2620 = vst [vmem:[%s4679_s8 + $0x40] sm:$0xff] (%p3357_p5), %v2619_v48 }
 0x297   : > { %2262 = vst.msk [vmem:[#allocation2 + $0x68] sm:$0xff] %vm358_vm1, %v2246_v60  ;;  %v2367_v3 = vadd.f32 %v2351_v27, %v2327_v32  ;;  %v2649_v32 = vld [vmem:[%s3806_s12 + $0xb8] sm:$0xff] (%p3357_p5)  ;;  %v2667_v13 = vld [vmem:[%s3806_s12 + $0x100] sm:$0xff] (%p3357_p5)  ;;  %v2669_v60 = vld [vmem:[%s3806_s12 + $0x108] sm:$0xff] (%p3357_p5) }
 0x298   : > { %v2398_v33 = vld [vmem:[#allocation2 + $0x58] sm:$0xff]  ;;  %v2214_v12 = vpop.f32.mrf.mxu2  ;;  %2622 = vst [vmem:[%s4679_s8 + $0x48] sm:$0xff] (%p3357_p5), %v2621_v29  ;;  %v2671_v27 = vld [vmem:[%s3806_s12 + $0x110] sm:$0xff] (%p3357_p5) }
 0x299   : > { %v2414_v56 = vadd.f32 %v4569_v31, %v2398_v33  ;;  %2383 = vst.msk [vmem:[#allocation2 + $0x60] sm:$0xff] %vm358_vm1, %v2367_v3  ;;  %v2673_v3 = vld [vmem:[%s3806_s12 + $0x118] sm:$0xff] (%p3357_p5)  ;;  %v2675_v33 = vld [vmem:[%s3806_s12 + $0x120] sm:$0xff] (%p3357_p5) }
 0x29a   : > { %2624 = vst [vmem:[%s4679_s8 + $0x50] sm:$0xff] (%p3357_p5), %v2623_v7 }
 0x29b   : > { %3145 = vst.msk [vmem:[%s3806_s12 + $0x1d8] sm:$0xff] %vm358_vm1, %v2414_v56  ;;  %v2114_v54 = vld [vmem:[#allocation2 + $0x78] sm:$0xff]  ;;  %v2679_v56 = vld [vmem:[%s3806_s12 + $0x130] sm:$0xff] (%p3357_p5) }
 0x29c   : > { %v2130_v37 = vadd.f32 %v2114_v54, %v2096_v42  ;;  %v2231_v24 = vld [vmem:[#allocation2 + $0x70] sm:$0xff]  ;;  %v2336_v2 = vpop.f32.mrf.mxu3  ;;  %2626 = vst [vmem:[%s4679_s8 + $0x58] sm:$0xff] (%p3357_p5), %v2625_v57  ;;  %v2681_v42 = vld [vmem:[%s3806_s12 + $0x138] sm:$0xff] (%p3357_p5)  ;;  %v2685_v54 = vld [vmem:[%s3806_s12 + $0x148] sm:$0xff] (%p3357_p5) }
 0x29d   : > { %v2247_v18 = vadd.f32 %v2231_v24, %v2211_v34  ;;  %2628 = vst [vmem:[%s4679_s8 + $0x60] sm:$0xff] (%p3357_p5), %v2627_v39  ;;  %v2683_v34 = vld [vmem:[%s3806_s12 + $0x140] sm:$0xff] (%p3357_p5)  ;;  %v2689_v24 = vld [vmem:[%s3806_s12 + $0x158] sm:$0xff] (%p3357_p5) }
 0x29e   : > { %2146 = vst.msk [vmem:[#allocation2 + $0x78] sm:$0xff] %vm358_vm1, %v2130_v37  ;;  %v2352_v58 = vld [vmem:[#allocation2 + $0x68] sm:$0xff]  ;;  %v2687_v37 = vld [vmem:[%s3806_s12 + $0x150] sm:$0xff] (%p3357_p5) }
 0x29f   : > { %2263 = vst.msk [vmem:[#allocation2 + $0x70] sm:$0xff] %vm358_vm1, %v2247_v18  ;;  %v2368_v15 = vadd.f32 %v2352_v58, %v2330_v40  ;;  %v2677_v40 = vld [vmem:[%s3806_s12 + $0x128] sm:$0xff] (%p3357_p5)  ;;  %v2691_v18 = vld [vmem:[%s3806_s12 + $0x160] sm:$0xff] (%p3357_p5) }
 0x2a0   : > { %v2399_v50 = vld [vmem:[#allocation2 + $0x60] sm:$0xff]  ;;  %2630 = vst [vmem:[%s4679_s8 + $0x68] sm:$0xff] (%p3357_p5), %v2629_v28  ;;  %v2693_v58 = vld [vmem:[%s3806_s12 + $0x168] sm:$0xff] (%p3357_p5) }
 0x2a1   : > { %v2415_v1 = vadd.f32 %v4569_v31, %v2399_v50  ;;  %2384 = vst.msk [vmem:[#allocation2 + $0x68] sm:$0xff] %vm358_vm1, %v2368_v15  ;;  %v2695_v15 = vld [vmem:[%s3806_s12 + $0x170] sm:$0xff] (%p3357_p5)  ;;  %v2697_v50 = vld [vmem:[%s3806_s12 + $0x178] sm:$0xff] (%p3357_p5) }
 0x2a2   : > { %2632 = vst [vmem:[%s4679_s8 + $0x70] sm:$0xff] (%p3357_p5), %v2631_v17 }
 0x2a3   : > { %3146 = vst.msk [vmem:[%s3806_s12 + $0x1e0] sm:$0xff] %vm358_vm1, %v2415_v1  ;;  %v2699_v1 = vld [vmem:[%s3806_s12 + $0x180] sm:$0xff] (%p3357_p5) }
 0x2a4   : > { %2634 = vst [vmem:[%s4679_s8 + $0x78] sm:$0xff] (%p3357_p5), %v2633_v26 }
 0x2a5   : > { %v2232_v47 = vld [vmem:[#allocation2 + $0x78] sm:$0xff]  ;;  %2636 = vst [vmem:[%s4679_s8 + $0x100] sm:$0xff] (%p3357_p5), %v2635_v49 }
 0x2a6   : > { %v2248_v10 = vadd.f32 %v2232_v47, %v2214_v12  ;;  %v2353_v62 = vld [vmem:[#allocation2 + $0x70] sm:$0xff]  ;;  %2638 = vst [vmem:[%s4679_s8 + $0x108] sm:$0xff] (%p3357_p5), %v2637_v55  ;;  %v2701_v12 = vld [vmem:[%s3806_s12 + $0x188] sm:$0xff] (%p3357_p5)  ;;  %v2705_v47 = vld [vmem:[%s3806_s12 + $0x198] sm:$0xff] (%p3357_p5) }
 0x2a7   : > { %v2369_v61 = vadd.f32 %v2353_v62, %v2333_v63  ;;  %2640 = vst [vmem:[%s4679_s8 + $0x110] sm:$0xff] (%p3357_p5), %v2639_v11  ;;  %v2703_v63 = vld [vmem:[%s3806_s12 + $0x190] sm:$0xff] (%p3357_p5)  ;;  %v2709_v62 = vld [vmem:[%s3806_s12 + $0x1a8] sm:$0xff] (%p3357_p5) }
 0x2a8   : > { %v2400_v23 = vld [vmem:[#allocation2 + $0x68] sm:$0xff]  ;;  %2264 = vst.msk [vmem:[#allocation2 + $0x78] sm:$0xff] %vm358_vm1, %v2248_v10  ;;  %v2707_v10 = vld [vmem:[%s3806_s12 + $0x1a0] sm:$0xff] (%p3357_p5) }
 0x2a9   : > { %v2416_v45 = vadd.f32 %v4569_v31, %v2400_v23  ;;  %2385 = vst.msk [vmem:[#allocation2 + $0x70] sm:$0xff] %vm358_vm1, %v2369_v61  ;;  %v2711_v61 = vld [vmem:[%s3806_s12 + $0x1b0] sm:$0xff] (%p3357_p5)  ;;  %v2713_v23 = vld [vmem:[%s3806_s12 + $0x1b8] sm:$0xff] (%p3357_p5) }
 0x2aa   : > { %2642 = vst [vmem:[%s4679_s8 + $0x118] sm:$0xff] (%p3357_p5), %v2641_v16 }
 0x2ab   : > { %3147 = vst.msk [vmem:[%s3806_s12 + $0x1e8] sm:$0xff] %vm358_vm1, %v2416_v45  ;;  %v2715_v45 = vld [vmem:[%s3806_s12 + $0x1c0] sm:$0xff] (%p3357_p5) }
 0x2ac   : > { %2644 = vst [vmem:[%s4679_s8 + $0x120] sm:$0xff] (%p3357_p5), %v2643_v21 }
 0x2ad   : > { %2646 = vst [vmem:[%s4679_s8 + $0x128] sm:$0xff] (%p3357_p5), %v2645_v35 }
 0x2ae   : > { %2648 = vst [vmem:[%s4679_s8 + $0x130] sm:$0xff] (%p3357_p5), %v2647_v53 }
 0x2af   : > { %v2354_v36 = vld [vmem:[#allocation2 + $0x78] sm:$0xff]  ;;  %2650 = vst [vmem:[%s4679_s8 + $0x138] sm:$0xff] (%p3357_p5), %v2649_v32 }
 0x2b0   : > { %v2401_v41 = vld [vmem:[#allocation2 + $0x70] sm:$0xff]  ;;  %v2370_v6 = vadd.f32 %v2354_v36, %v2336_v2  ;;  %2652 = vst [vmem:[%s4679_s8 + $0x140] sm:$0xff] (%p3357_p5), %v2651_v46  ;;  %v2717_v2 = vld [vmem:[%s3806_s12 + $0x1c8] sm:$0xff] (%p3357_p5) }
 0x2b1   : > { %v2417_v4 = vadd.f32 %v4569_v31, %v2401_v41  ;;  %2654 = vst [vmem:[%s4679_s8 + $0x148] sm:$0xff] (%p3357_p5), %v2653_v25  ;;  %v2719_v36 = vld [vmem:[%s3806_s12 + $0x1d0] sm:$0xff] (%p3357_p5)  ;;  %v2721_v41 = vld [vmem:[%s3806_s12 + $0x1d8] sm:$0xff] (%p3357_p5) }
 0x2b2   : > { %2386 = vst.msk [vmem:[#allocation2 + $0x78] sm:$0xff] %vm358_vm1, %v2370_v6  ;;  %v2723_v6 = vld [vmem:[%s3806_s12 + $0x1e0] sm:$0xff] (%p3357_p5) }
 0x2b3   : > { %3148 = vst.msk [vmem:[%s3806_s12 + $0x1f0] sm:$0xff] %vm358_vm1, %v2417_v4  ;;  %v2725_v4 = vld [vmem:[%s3806_s12 + $0x1e8] sm:$0xff] (%p3357_p5) }
 0x2b4   : > { %2656 = vst [vmem:[%s4679_s8 + $0x150] sm:$0xff] (%p3357_p5), %v2655_v30 }
 0x2b5   : > { %2658 = vst [vmem:[%s4679_s8 + $0x158] sm:$0xff] (%p3357_p5), %v2657_v20 }
 0x2b6   : > { %2660 = vst [vmem:[%s4679_s8 + $0x160] sm:$0xff] (%p3357_p5), %v2659_v43 }
 0x2b7   : > { %2662 = vst [vmem:[%s4679_s8 + $0x168] sm:$0xff] (%p3357_p5), %v2661_v38 }
 0x2b8   : > { %2442 = sbr.rel (!%p3357_p5) target bundleno = 732 (0x2dc), region = 36  ;;  %2664 = vst [vmem:[%s4679_s8 + $0x170] sm:$0xff] (%p3357_p5), %v2663_v44 }
 0x2b9   : > { %v2402_v9 = vld [vmem:[#allocation2 + $0x78] sm:$0xff]  ;;  %2666 = vst [vmem:[%s4679_s8 + $0x178] sm:$0xff] (%p3357_p5), %v2665_v19 }
 0x2ba   : > { %v2418_v5 = vadd.f32 %v4569_v31, %v2402_v9  ;;  %v2605_v31 = vld [vmem:[%s3806_s12 + $0x8] sm:$0xff] (%p3357_p5)  ;;  %2668 = vst [vmem:[%s4679_s8 + $0x200] sm:$0xff] (%p3357_p5), %v2667_v13  ;;  %v2727_v9 = vld [vmem:[%s3806_s12 + $0x1f0] sm:$0xff] (%p3357_p5) }
 0x2bb   : > { %2606 = vst [vmem:[%s4679_s8 + $0x8] sm:$0xff] (%p3357_p5), %v2605_v31 }
 0x2bc   : > { %3149 = vst.msk [vmem:[%s3806_s12 + $0x1f8] sm:$0xff] %vm358_vm1, %v2418_v5 }
 0x2bd   : > { %2670 = vst [vmem:[%s4679_s8 + $0x208] sm:$0xff] %v2669_v60 }
 0x2be   : > { %2672 = vst [vmem:[%s4679_s8 + $0x210] sm:$0xff] %v2671_v27 }
 0x2bf   : > { %2674 = vst [vmem:[%s4679_s8 + $0x218] sm:$0xff] %v2673_v3 }
 0x2c0   : > { %2676 = vst [vmem:[%s4679_s8 + $0x220] sm:$0xff] %v2675_v33 }
 0x2c1   : > { %2678 = vst [vmem:[%s4679_s8 + $0x228] sm:$0xff] %v2677_v40 }
 0x2c2   : > { %2680 = vst [vmem:[%s4679_s8 + $0x230] sm:$0xff] %v2679_v56 }
 0x2c3   : > { %2682 = vst [vmem:[%s4679_s8 + $0x238] sm:$0xff] %v2681_v42  ;;  %v2729_v5 = vld [vmem:[%s3806_s12 + $0x1f8] sm:$0xff] }
 0x2c4   : > { %2684 = vst [vmem:[%s4679_s8 + $0x240] sm:$0xff] %v2683_v34 }
 0x2c5   : > { %2686 = vst [vmem:[%s4679_s8 + $0x248] sm:$0xff] %v2685_v54 }
 0x2c6   : > { %2688 = vst [vmem:[%s4679_s8 + $0x250] sm:$0xff] %v2687_v37 }
 0x2c7   : > { %2690 = vst [vmem:[%s4679_s8 + $0x258] sm:$0xff] %v2689_v24 }
 0x2c8   : > { %2692 = vst [vmem:[%s4679_s8 + $0x260] sm:$0xff] %v2691_v18 }
 0x2c9   : > { %2694 = vst [vmem:[%s4679_s8 + $0x268] sm:$0xff] %v2693_v58 }
 0x2ca   : > { %2696 = vst [vmem:[%s4679_s8 + $0x270] sm:$0xff] %v2695_v15 }
 0x2cb   : > { %2698 = vst [vmem:[%s4679_s8 + $0x278] sm:$0xff] %v2697_v50 }
 0x2cc   : > { %2700 = vst [vmem:[%s4679_s8 + $0x300] sm:$0xff] %v2699_v1 }
 0x2cd   : > { %2702 = vst [vmem:[%s4679_s8 + $0x308] sm:$0xff] %v2701_v12 }
 0x2ce   : > { %2704 = vst [vmem:[%s4679_s8 + $0x310] sm:$0xff] %v2703_v63 }
 0x2cf   : > { %2706 = vst [vmem:[%s4679_s8 + $0x318] sm:$0xff] %v2705_v47 }
 0x2d0   : > { %2708 = vst [vmem:[%s4679_s8 + $0x320] sm:$0xff] %v2707_v10 }
 0x2d1   : > { %2710 = vst [vmem:[%s4679_s8 + $0x328] sm:$0xff] %v2709_v62 }
 0x2d2   : > { %2712 = vst [vmem:[%s4679_s8 + $0x330] sm:$0xff] %v2711_v61 }
 0x2d3   : > { %2714 = vst [vmem:[%s4679_s8 + $0x338] sm:$0xff] %v2713_v23 }
 0x2d4   : > { %2716 = vst [vmem:[%s4679_s8 + $0x340] sm:$0xff] %v2715_v45 }
 0x2d5   : > { %2718 = vst [vmem:[%s4679_s8 + $0x348] sm:$0xff] %v2717_v2 }
 0x2d6   : > { %2720 = vst [vmem:[%s4679_s8 + $0x350] sm:$0xff] %v2719_v36 }
 0x2d7   : > { %2722 = vst [vmem:[%s4679_s8 + $0x358] sm:$0xff] %v2721_v41 }
 0x2d8   : > { %2724 = vst [vmem:[%s4679_s8 + $0x360] sm:$0xff] %v2723_v6 }
 0x2d9   : > { %2726 = vst [vmem:[%s4679_s8 + $0x368] sm:$0xff] %v2725_v4 }
 0x2da   : > { %2728 = vst [vmem:[%s4679_s8 + $0x370] sm:$0xff] %v2727_v9 }
 0x2db   : > { %2730 = vst [vmem:[%s4679_s8 + $0x378] sm:$0xff] %v2729_v5 }
 0x2dc PF: > { %s13_s18 = sadd.s32 1, %s3289_s18   ;;  %s4833_s12 = smov %s3269_s13 }
 0x2dd   : > { %p10_p11 = scmp.ge.s32.totalorder %s13_s18, 6   ;;  %s4834_s13 = smov %s3368_s27 }
 0x2de   : > { %s4835_s14 = smov %s3281_s16  ;;  %s4836_s15 = smov %s3285_s17 }
 0x2df   : > { %s4837_s16 = smov %s4840_s19  ;;  %s4838_s17 = smov %s4844_s20 }
 0x2e0   :  { %12 = sbr.rel (!%p10_p11) target bundleno = 4 (0x4), region = 118 }

</bundles_post_ra>
